<compile_context>
chip_gen: v6e
topology: v6e:2x2x1
jax: 0.10.0
libtpu: 0.0.40
codegen_flags: <defaults>
</compile_context>

<pallas_src>
import jax
import jax.numpy as jnp
from jax import lax
from jax.experimental import pallas as pl
from jax.experimental.pallas import tpu as pltpu

# ----- synthetic config (deterministic, small) -------------------------------
VOCAB_SIZE = 50
EMBEDDING_SIZE = 16
HIDDEN_SIZE = 32
NUM_LAYERS = 1          # config.num_layers = 1 (inter-layer dropout inactive)
TAGSET_SIZE = 8         # len(TAG2IDX), includes START / END
START_TAG_IDX = 6
END_TAG_IDX = 7

SUBLANE = 8             # f32 sublane group
LANE = 128              # lane width (emission projection padded to this)


# ----- fused Pallas kernel ----------------------------------------------------
def _fused_bilstm_kernel(x_ref, len_ref, wih_ref, bih_ref, whh_ref,
                         wp_ref, bp_ref, out_ref,
                         gx_ref, hseq_ref, hc_ref, cf_ref, cb_ref):
    """Whole BiLSTM + projection in one kernel invocation.

    x_ref    : (T*Bp, E)   time-major rows, row = t*Bp + b
    len_ref  : (Bp, 1)     int32 sequence lengths (padded rows have length 0)
    wih_ref  : (E, 8H)     [W_ih_fwd | W_ih_bwd], gate order [i,f,o,g]
    bih_ref  : (1, 8H)     folded b_ih + b_hh for both directions, same order
    whh_ref  : (2H, 8H)    block-diag [W_hh_fwd 0; 0 W_hh_bwd], gate order [i,f,o,g]
    wp_ref   : (2H, 128)   projection weight, lane-padded tagset
    bp_ref   : (1, 128)    lane-padded projection bias
    out_ref  : (T*Bp, 128) lane-padded emissions
    gx_ref   : (T*Bp, 8H)  scratch: x@W_ih + b for both directions
    hseq_ref : (T*Bp, 2H)  scratch: masked LSTM outputs [h_fwd | h_bwd]
    hc_ref   : (Bp, 2H)    scratch: combined hidden state [h_fwd | h_bwd]
    cf_ref   : (Bp, H)     scratch: forward cell state
    cb_ref   : (Bp, H)     scratch: backward cell state
    """
    Bp = hc_ref.shape[0]
    H = cf_ref.shape[1]
    G = 4 * H                      # one direction's gate width (128 for H=32)
    TBp = x_ref.shape[0]
    T = TBp // Bp

    # ---- prologue (runs once, off the serial critical path) -----------------
    # input->hidden projection for BOTH directions in one MXU matmul
    gx_ref[...] = (
        jnp.dot(x_ref[...], wih_ref[...], preferred_element_type=jnp.float32)
        + bih_ref[...])
    # zero initial LSTM state (required for packed-sequence equivalence)
    hc_ref[...] = jnp.zeros_like(hc_ref)
    cf_ref[...] = jnp.zeros_like(cf_ref)
    cb_ref[...] = jnp.zeros_like(cb_ref)

    lens = len_ref[...]                                    # (Bp, 1) int32

    # ---- serial recurrence: both directions advanced every step -------------
    # Every (row-block, column-half) of hseq_ref is written exactly once across
    # the loop with length-masked values, so padded positions end up exactly 0
    # and project to the bias alone in the epilogue.
    def step(t, carry):
        tf = t                       # forward processes / writes position tf
        tb = T - 1 - t               # backward processes / writes position tb
        rf = pl.multiple_of(tf * Bp, Bp)
        rb = pl.multiple_of(tb * Bp, Bp)

        # one MXU push for both directions' hidden->hidden projection
        gates_hh = jnp.dot(hc_ref[...], whh_ref[...],
                           preferred_element_type=jnp.float32)   # (Bp, 8H)

        # -- forward direction (gate order [i,f,o,g])
        gates_f = gx_ref[pl.ds(rf, Bp), 0:G] + gates_hh[:, 0:G]
        sig_f = jax.nn.sigmoid(gates_f[:, 0:3 * H])              # [i|f|o] at once
        g_f = jnp.tanh(gates_f[:, 3 * H:4 * H])
        c_f_new = sig_f[:, H:2 * H] * cf_ref[...] + sig_f[:, 0:H] * g_f
        h_f_new = sig_f[:, 2 * H:3 * H] * jnp.tanh(c_f_new)
        m_f = tf < lens                                          # (Bp, 1) bool
        cf_ref[...] = jnp.where(m_f, c_f_new, cf_ref[...])
        hc_ref[:, 0:H] = jnp.where(m_f, h_f_new, hc_ref[:, 0:H])
        hseq_ref[pl.ds(rf, Bp), 0:H] = jnp.where(m_f, h_f_new, 0.0)

        # -- backward direction (independent chain; overlaps with forward)
        gates_b = gx_ref[pl.ds(rb, Bp), G:2 * G] + gates_hh[:, G:2 * G]
        sig_b = jax.nn.sigmoid(gates_b[:, 0:3 * H])
        g_b = jnp.tanh(gates_b[:, 3 * H:4 * H])
        c_b_new = sig_b[:, H:2 * H] * cb_ref[...] + sig_b[:, 0:H] * g_b
        h_b_new = sig_b[:, 2 * H:3 * H] * jnp.tanh(c_b_new)
        m_b = tb < lens
        cb_ref[...] = jnp.where(m_b, c_b_new, cb_ref[...])
        hc_ref[:, H:2 * H] = jnp.where(m_b, h_b_new, hc_ref[:, H:2 * H])
        hseq_ref[pl.ds(rb, Bp), H:2 * H] = jnp.where(m_b, h_b_new, 0.0)
        return carry

    lax.fori_loop(0, T, step, None, unroll=True)

    # ---- epilogue: single well-shaped projection matmul + bias --------------
    out_ref[...] = (
        jnp.dot(hseq_ref[...], wp_ref[...], preferred_element_type=jnp.float32)
        + bp_ref[...])


# ----- parameters -------------------------------------------------------------
def init_params(key):
    ks = jax.random.split(key, 10)
    scale = 1.0 / jnp.sqrt(jnp.float32(HIDDEN_SIZE))

    def u(k, shape):
        return jax.random.uniform(k, shape, jnp.float32, -scale, scale)

    params = dict(
        embedding=jax.random.normal(ks[0], (VOCAB_SIZE, EMBEDDING_SIZE), jnp.float32),
        # PyTorch LSTM gate order [i, f, g, o]; b = b_ih + b_hh folded together.
        w_ih_f=u(ks[1], (EMBEDDING_SIZE, 4 * HIDDEN_SIZE)),
        w_hh_f=u(ks[2], (HIDDEN_SIZE, 4 * HIDDEN_SIZE)),
        b_f=u(ks[3], (1, 4 * HIDDEN_SIZE)),
        w_ih_b=u(ks[4], (EMBEDDING_SIZE, 4 * HIDDEN_SIZE)),
        w_hh_b=u(ks[5], (HIDDEN_SIZE, 4 * HIDDEN_SIZE)),
        b_b=u(ks[6], (1, 4 * HIDDEN_SIZE)),
        w_proj=u(ks[7], (2 * HIDDEN_SIZE, TAGSET_SIZE)),
        b_proj=u(ks[8], (1, TAGSET_SIZE)),
    )
    trans = jax.random.normal(ks[9], (TAGSET_SIZE, TAGSET_SIZE), jnp.float32)
    trans = trans.at[START_TAG_IDX, :].set(-10000.0)
    trans = trans.at[:, END_TAG_IDX].set(-10000.0)
    params["transitions"] = trans   # CRF transitions; unused by forward()
    return params


# ----- forward (Pallas) -------------------------------------------------------
def _perm_ifog(w):
    """Permute the 4H gate columns from PyTorch [i,f,g,o] to [i,f,o,g]."""
    H = HIDDEN_SIZE
    return jnp.concatenate(
        [w[..., 0:2 * H], w[..., 3 * H:4 * H], w[..., 2 * H:3 * H]], axis=-1)


def bilstm_crf_forward(params, ids, lengths):
    B, T = ids.shape
    E, H = EMBEDDING_SIZE, HIDDEN_SIZE
    Bp = ((B + SUBLANE - 1) // SUBLANE) * SUBLANE    # pad batch to sublane group
    KP = LANE                                        # lane-dense emission width

    # embedding gather (XLA glue, == nn.Embedding)
    embeds = params["embedding"][ids]                           # (B, T, E)
    embeds = jnp.pad(embeds, ((0, Bp - B), (0, 0), (0, 0)))     # (Bp, T, E)
    lens = jnp.pad(lengths.astype(jnp.int32), (0, Bp - B))[:, None]   # (Bp, 1)
    x2d = jnp.transpose(embeds, (1, 0, 2)).reshape(T * Bp, E)   # time-major rows

    # both directions' input weights fused into one matmul operand, gate order [i,f,o,g]
    wih = jnp.concatenate([_perm_ifog(params["w_ih_f"]),
                           _perm_ifog(params["w_ih_b"])], axis=1)        # (E, 8H)
    bih = jnp.concatenate([_perm_ifog(params["b_f"]),
                           _perm_ifog(params["b_b"])], axis=1)           # (1, 8H)
    # block-diagonal hidden->hidden weight: one MXU push per step for both dirs
    whhf = _perm_ifog(params["w_hh_f"])                                  # (H, 4H)
    whhb = _perm_ifog(params["w_hh_b"])                                  # (H, 4H)
    zeros = jnp.zeros((H, 4 * H), jnp.float32)
    whh = jnp.concatenate(
        [jnp.concatenate([whhf, zeros], axis=1),
         jnp.concatenate([zeros, whhb], axis=1)], axis=0)                # (2H, 8H)
    # projection weight/bias, lane-padded to 128 tags
    pad_k = ((0, 0), (0, KP - TAGSET_SIZE))
    wp = jnp.pad(params["w_proj"], pad_k)                                # (2H, KP)
    bp = jnp.pad(params["b_proj"], pad_k)                                # (1, KP)

    out2d = pl.pallas_call(
        _fused_bilstm_kernel,
        out_shape=jax.ShapeDtypeStruct((T * Bp, KP), jnp.float32),
        grid=(1,),
        in_specs=[
            pl.BlockSpec((T * Bp, E), lambda i: (0, 0)),
            pl.BlockSpec((Bp, 1), lambda i: (0, 0)),
            pl.BlockSpec((E, 8 * H), lambda i: (0, 0)),
            pl.BlockSpec((1, 8 * H), lambda i: (0, 0)),
            pl.BlockSpec((2 * H, 8 * H), lambda i: (0, 0)),
            pl.BlockSpec((2 * H, KP), lambda i: (0, 0)),
            pl.BlockSpec((1, KP), lambda i: (0, 0)),
        ],
        out_specs=pl.BlockSpec((T * Bp, KP), lambda i: (0, 0)),
        scratch_shapes=[
            pltpu.VMEM((T * Bp, 8 * H), jnp.float32),   # gx: x@W_ih + b, both dirs
            pltpu.VMEM((T * Bp, 2 * H), jnp.float32),   # hseq: masked LSTM outputs
            pltpu.VMEM((Bp, 2 * H), jnp.float32),       # hc: [h_fwd | h_bwd]
            pltpu.VMEM((Bp, H), jnp.float32),           # c forward
            pltpu.VMEM((Bp, H), jnp.float32),           # c backward
        ],
        compiler_params=pltpu.CompilerParams(
            dimension_semantics=("arbitrary",),          # serial recurrence
            vmem_limit_bytes=32 * 1024 * 1024),
    )(x2d, lens, wih, bih, whh, wp, bp)

    emission = out2d.reshape(T, Bp, KP).transpose(1, 0, 2)      # (Bp, T, KP)
    return emission[:B, :, :TAGSET_SIZE]                        # (B, T, TAGSET)


# ----- pure-JAX reference for verification ------------------------------------
def _ref_lstm_dir(x_bte, mask_bt, w_ih, w_hh, b, reverse):
    B, T, E = x_bte.shape
    H = w_hh.shape[0]
    h = jnp.zeros((B, H), jnp.float32)
    c = jnp.zeros((B, H), jnp.float32)
    outs = [None] * T
    ts = range(T - 1, -1, -1) if reverse else range(T)
    for t in ts:
        m = mask_bt[:, t:t + 1]
        gates = x_bte[:, t] @ w_ih + h @ w_hh + b
        i = jax.nn.sigmoid(gates[:, :H])
        f = jax.nn.sigmoid(gates[:, H:2 * H])
        g = jnp.tanh(gates[:, 2 * H:3 * H])
        o = jax.nn.sigmoid(gates[:, 3 * H:])
        c_new = f * c + i * g
        h_new = o * jnp.tanh(c_new)
        c = m * c_new + (1.0 - m) * c
        h = m * h_new + (1.0 - m) * h
        outs[t] = m * h_new
    return jnp.stack(outs, axis=1)


def _ref_forward(params, ids, lengths):
    B, T = ids.shape
    embeds = params["embedding"][ids]
    mask = (jnp.arange(T)[None, :] < lengths[:, None]).astype(jnp.float32)
    hf = _ref_lstm_dir(embeds, mask, params["w_ih_f"], params["w_hh_f"],
                       params["b_f"], reverse=False)
    hb = _ref_lstm_dir(embeds, mask, params["w_ih_b"], params["w_hh_b"],
                       params["b_b"], reverse=True)
    lstm_out = jnp.concatenate([hf, hb], axis=-1)
    return lstm_out @ params["w_proj"] + params["b_proj"]


# ----- main -------------------------------------------------------------------
if __name__ == "__main__":
    key = jax.random.PRNGKey(0)
    k_params, k_ids = jax.random.split(key)
    params = init_params(k_params)

    B, T = 2, 8
    ids = jax.random.randint(k_ids, (B, T), 0, VOCAB_SIZE, dtype=jnp.int32)
    lengths = jnp.array([8, 5], dtype=jnp.int32)

    fwd = jax.jit(bilstm_crf_forward)
    emission = jax.block_until_ready(fwd(params, ids, lengths))

    ref = _ref_forward(params, ids, lengths)
    assert emission.shape == (B, T, TAGSET_SIZE)
    assert jnp.allclose(emission, ref, atol=1e-5, rtol=1e-5), "mismatch vs reference"

    print("KERNEL_OK")
</pallas_src>

<mosaic_0001>
module attributes {stable_mosaic.version = 11 : i64} {
  func.func @_fused_bilstm_kernel(%arg0: i32, %arg1: memref<64x16xf32, #tpu.memory_space<vmem>>, %arg2: memref<8x1xi32, #tpu.memory_space<vmem>>, %arg3: memref<16x256xf32, #tpu.memory_space<vmem>>, %arg4: memref<1x256xf32, #tpu.memory_space<vmem>>, %arg5: memref<64x256xf32, #tpu.memory_space<vmem>>, %arg6: memref<64x128xf32, #tpu.memory_space<vmem>>, %arg7: memref<1x128xf32, #tpu.memory_space<vmem>>, %arg8: memref<64x128xf32, #tpu.memory_space<vmem>>, %arg9: memref<64x256xf32, #tpu.memory_space<vmem>>, %arg10: memref<64x64xf32, #tpu.memory_space<vmem>>, %arg11: memref<8x64xf32, #tpu.memory_space<vmem>>, %arg12: memref<8x32xf32, #tpu.memory_space<vmem>>, %arg13: memref<8x32xf32, #tpu.memory_space<vmem>>) attributes {dimension_semantics = [#tpu.dimension_semantics<arbitrary>], iteration_bounds = array<i64: 1>, scalar_prefetch = 0 : i64, scratch_operands = 5 : i64, tpu.core_type = #tpu.core_type<tc>, window_params = [{pipeline_mode = #tpu.pipeline_mode<synchronous>, transform_indices = @transform_0, window_bounds = array<i64: 64, 16>}, {pipeline_mode = #tpu.pipeline_mode<synchronous>, transform_indices = @transform_1, window_bounds = array<i64: 8, 1>}, {pipeline_mode = #tpu.pipeline_mode<synchronous>, transform_indices = @transform_2, window_bounds = array<i64: 16, 256>}, {pipeline_mode = #tpu.pipeline_mode<synchronous>, transform_indices = @transform_3, window_bounds = array<i64: 1, 256>}, {pipeline_mode = #tpu.pipeline_mode<synchronous>, transform_indices = @transform_4, window_bounds = array<i64: 64, 256>}, {pipeline_mode = #tpu.pipeline_mode<synchronous>, transform_indices = @transform_5, window_bounds = array<i64: 64, 128>}, {pipeline_mode = #tpu.pipeline_mode<synchronous>, transform_indices = @transform_6, window_bounds = array<i64: 1, 128>}, {pipeline_mode = #tpu.pipeline_mode<synchronous>, transform_indices = @transform_7, window_bounds = array<i64: 64, 128>}]} {
    %c0 = arith.constant 0 : index
    %c0_0 = arith.constant 0 : index
    %0 = vector.load %arg1[%c0, %c0_0] : memref<64x16xf32, #tpu.memory_space<vmem>>, vector<64x16xf32>
    %c0_1 = arith.constant 0 : index
    %c0_2 = arith.constant 0 : index
    %1 = vector.load %arg3[%c0_1, %c0_2] : memref<16x256xf32, #tpu.memory_space<vmem>>, vector<16x256xf32>
    %cst = arith.constant dense<0.000000e+00> : vector<64x256xf32>
    %2 = tpu.matmul %0, %1, %cst {dimension_numbers = #tpu.dot_dimension_numbers<[1], [0], [0], [1], [0, 0, 1, 1], [], []>} : vector<64x16xf32>, vector<16x256xf32>, vector<64x256xf32> -> vector<64x256xf32>
    %c0_3 = arith.constant 0 : index
    %c0_4 = arith.constant 0 : index
    %3 = vector.load %arg4[%c0_3, %c0_4] : memref<1x256xf32, #tpu.memory_space<vmem>>, vector<1x256xf32>
    %4 = vector.broadcast %3 : vector<1x256xf32> to vector<64x256xf32>
    %5 = arith.addf %2, %4 : vector<64x256xf32>
    %c0_5 = arith.constant 0 : index
    %c0_6 = arith.constant 0 : index
    %6 = vector.load %arg9[%c0_5, %c0_6] : memref<64x256xf32, #tpu.memory_space<vmem>>, vector<64x256xf32>
    tpu.vector_store %arg9[%c0_5, %c0_6], %5 {strides = array<i32>} : memref<64x256xf32, #tpu.memory_space<vmem>>, vector<64x256xf32>,
    %cst_7 = arith.constant 0.000000e+00 : f32
    %7 = vector.broadcast %cst_7 : f32 to vector<8x64xf32>
    %c0_8 = arith.constant 0 : index
    %c0_9 = arith.constant 0 : index
    %8 = vector.load %arg11[%c0_8, %c0_9] : memref<8x64xf32, #tpu.memory_space<vmem>>, vector<8x64xf32>
    tpu.vector_store %arg11[%c0_8, %c0_9], %7 {strides = array<i32>} : memref<8x64xf32, #tpu.memory_space<vmem>>, vector<8x64xf32>,
    %cst_10 = arith.constant 0.000000e+00 : f32
    %9 = vector.broadcast %cst_10 : f32 to vector<8x32xf32>
    %c0_11 = arith.constant 0 : index
    %c0_12 = arith.constant 0 : index
    %10 = vector.load %arg12[%c0_11, %c0_12] : memref<8x32xf32, #tpu.memory_space<vmem>>, vector<8x32xf32>
    tpu.vector_store %arg12[%c0_11, %c0_12], %9 {strides = array<i32>} : memref<8x32xf32, #tpu.memory_space<vmem>>, vector<8x32xf32>,
    %cst_13 = arith.constant 0.000000e+00 : f32
    %11 = vector.broadcast %cst_13 : f32 to vector<8x32xf32>
    %c0_14 = arith.constant 0 : index
    %c0_15 = arith.constant 0 : index
    %12 = vector.load %arg13[%c0_14, %c0_15] : memref<8x32xf32, #tpu.memory_space<vmem>>, vector<8x32xf32>
    tpu.vector_store %arg13[%c0_14, %c0_15], %11 {strides = array<i32>} : memref<8x32xf32, #tpu.memory_space<vmem>>, vector<8x32xf32>,
    %c0_16 = arith.constant 0 : index
    %c0_17 = arith.constant 0 : index
    %13 = vector.load %arg2[%c0_16, %c0_17] : memref<8x1xi32, #tpu.memory_space<vmem>>, vector<8x1xi32>
    %c0_i32 = arith.constant 0 : i32
    %c7_i32 = arith.constant 7 : i32
    %14 = arith.subi %c7_i32, %c0_i32 : i32
    %c8_i32 = arith.constant 8 : i32
    %15 = arith.muli %c0_i32, %c8_i32 : i32
    %16 = tpu.assume_multiple %15, 8 : i32
    %c8_i32_18 = arith.constant 8 : i32
    %17 = arith.muli %14, %c8_i32_18 : i32
    %18 = tpu.assume_multiple %17, 8 : i32
    %c0_19 = arith.constant 0 : index
    %c0_20 = arith.constant 0 : index
    %19 = vector.load %arg11[%c0_19, %c0_20] : memref<8x64xf32, #tpu.memory_space<vmem>>, vector<8x64xf32>
    %c0_21 = arith.constant 0 : index
    %c0_22 = arith.constant 0 : index
    %20 = vector.load %arg5[%c0_21, %c0_22] : memref<64x256xf32, #tpu.memory_space<vmem>>, vector<64x256xf32>
    %cst_23 = arith.constant dense<0.000000e+00> : vector<8x256xf32>
    %21 = tpu.matmul %19, %20, %cst_23 {dimension_numbers = #tpu.dot_dimension_numbers<[1], [0], [0], [1], [0, 0, 1, 1], [], []>} : vector<8x64xf32>, vector<64x256xf32>, vector<8x256xf32> -> vector<8x256xf32>
    %22 = arith.index_cast %16 : i32 to index
    %c0_24 = arith.constant 0 : index
    %23 = vector.load %arg9[%22, %c0_24] : memref<64x256xf32, #tpu.memory_space<vmem>>, vector<8x128xf32>
    %24 = vector.extract_strided_slice %21 {offsets = [0, 0], sizes = [8, 128], strides = [1, 1]} : vector<8x256xf32> to vector<8x128xf32>
    %25 = arith.addf %23, %24 : vector<8x128xf32>
    %26 = vector.extract_strided_slice %25 {offsets = [0, 0], sizes = [8, 96], strides = [1, 1]} : vector<8x128xf32> to vector<8x96xf32>
    %27 = arith.negf %26 : vector<8x96xf32>
    %28 = math.exp %27 : vector<8x96xf32>
    %cst_25 = arith.constant 1.000000e+00 : f32
    %29 = vector.broadcast %cst_25 : f32 to vector<8x96xf32>
    %30 = arith.addf %29, %28 : vector<8x96xf32>
    %31 = arith.divf %29, %30 : vector<8x96xf32>
    %32 = vector.extract_strided_slice %25 {offsets = [0, 96], sizes = [8, 32], strides = [1, 1]} : vector<8x128xf32> to vector<8x32xf32>
    %33 = math.tanh %32 : vector<8x32xf32>
    %34 = vector.extract_strided_slice %31 {offsets = [0, 32], sizes = [8, 32], strides = [1, 1]} : vector<8x96xf32> to vector<8x32xf32>
    %c0_26 = arith.constant 0 : index
    %c0_27 = arith.constant 0 : index
    %35 = vector.load %arg12[%c0_26, %c0_27] : memref<8x32xf32, #tpu.memory_space<vmem>>, vector<8x32xf32>
    %36 = arith.mulf %34, %35 : vector<8x32xf32>
    %37 = vector.extract_strided_slice %31 {offsets = [0, 0], sizes = [8, 32], strides = [1, 1]} : vector<8x96xf32> to vector<8x32xf32>
    %38 = arith.mulf %37, %33 : vector<8x32xf32>
    %39 = arith.addf %36, %38 : vector<8x32xf32>
    %40 = vector.extract_strided_slice %31 {offsets = [0, 64], sizes = [8, 32], strides = [1, 1]} : vector<8x96xf32> to vector<8x32xf32>
    %41 = math.tanh %39 : vector<8x32xf32>
    %42 = arith.mulf %40, %41 : vector<8x32xf32>
    %43 = vector.broadcast %c0_i32 : i32 to vector<8x1xi32>
    %44 = arith.cmpi slt, %43, %13 : vector<8x1xi32>
    %c0_28 = arith.constant 0 : index
    %c0_29 = arith.constant 0 : index
    %45 = vector.load %arg12[%c0_28, %c0_29] : memref<8x32xf32, #tpu.memory_space<vmem>>, vector<8x32xf32>
    %46 = vector.shape_cast %44 : vector<8x1xi1> to vector<8x1xi1>
    %47 = vector.broadcast %46 : vector<8x1xi1> to vector<8x32xi1>
    %48 = arith.select %47, %39, %45 : vector<8x32xi1>, vector<8x32xf32>
    %c0_30 = arith.constant 0 : index
    %c0_31 = arith.constant 0 : index
    %49 = vector.load %arg12[%c0_30, %c0_31] : memref<8x32xf32, #tpu.memory_space<vmem>>, vector<8x32xf32>
    tpu.vector_store %arg12[%c0_30, %c0_31], %48 {strides = array<i32>} : memref<8x32xf32, #tpu.memory_space<vmem>>, vector<8x32xf32>,
    %c0_32 = arith.constant 0 : index
    %c0_33 = arith.constant 0 : index
    %50 = vector.load %arg11[%c0_32, %c0_33] : memref<8x64xf32, #tpu.memory_space<vmem>>, vector<8x32xf32>
    %51 = vector.shape_cast %44 : vector<8x1xi1> to vector<8x1xi1>
    %52 = vector.broadcast %51 : vector<8x1xi1> to vector<8x32xi1>
    %53 = arith.select %52, %42, %50 : vector<8x32xi1>, vector<8x32xf32>
    %c0_34 = arith.constant 0 : index
    %c0_35 = arith.constant 0 : index
    %54 = vector.load %arg11[%c0_34, %c0_35] : memref<8x64xf32, #tpu.memory_space<vmem>>, vector<8x32xf32>
    tpu.vector_store %arg11[%c0_34, %c0_35], %53 {strides = array<i32>} : memref<8x64xf32, #tpu.memory_space<vmem>>, vector<8x32xf32>,
    %cst_36 = arith.constant 0.000000e+00 : f32
    %55 = vector.shape_cast %44 : vector<8x1xi1> to vector<8x1xi1>
    %56 = vector.broadcast %55 : vector<8x1xi1> to vector<8x32xi1>
    %57 = vector.broadcast %cst_36 : f32 to vector<8x32xf32>
    %58 = arith.select %56, %42, %57 : vector<8x32xi1>, vector<8x32xf32>
    %59 = arith.index_cast %16 : i32 to index
    %c0_37 = arith.constant 0 : index
    %60 = vector.load %arg10[%59, %c0_37] : memref<64x64xf32, #tpu.memory_space<vmem>>, vector<8x32xf32>
    tpu.vector_store %arg10[%59, %c0_37], %58 {strides = array<i32>} : memref<64x64xf32, #tpu.memory_space<vmem>>, vector<8x32xf32>,
    %61 = arith.index_cast %18 : i32 to index
    %c128 = arith.constant 128 : index
    %62 = vector.load %arg9[%61, %c128] : memref<64x256xf32, #tpu.memory_space<vmem>>, vector<8x128xf32>
    %63 = vector.extract_strided_slice %21 {offsets = [0, 128], sizes = [8, 128], strides = [1, 1]} : vector<8x256xf32> to vector<8x128xf32>
    %64 = arith.addf %62, %63 : vector<8x128xf32>
    %65 = vector.extract_strided_slice %64 {offsets = [0, 0], sizes = [8, 96], strides = [1, 1]} : vector<8x128xf32> to vector<8x96xf32>
    %66 = arith.negf %65 : vector<8x96xf32>
    %67 = math.exp %66 : vector<8x96xf32>
    %cst_38 = arith.constant 1.000000e+00 : f32
    %68 = vector.broadcast %cst_38 : f32 to vector<8x96xf32>
    %69 = arith.addf %68, %67 : vector<8x96xf32>
    %70 = arith.divf %68, %69 : vector<8x96xf32>
    %71 = vector.extract_strided_slice %64 {offsets = [0, 96], sizes = [8, 32], strides = [1, 1]} : vector<8x128xf32> to vector<8x32xf32>
    %72 = math.tanh %71 : vector<8x32xf32>
    %73 = vector.extract_strided_slice %70 {offsets = [0, 32], sizes = [8, 32], strides = [1, 1]} : vector<8x96xf32> to vector<8x32xf32>
    %c0_39 = arith.constant 0 : index
    %c0_40 = arith.constant 0 : index
    %74 = vector.load %arg13[%c0_39, %c0_40] : memref<8x32xf32, #tpu.memory_space<vmem>>, vector<8x32xf32>
    %75 = arith.mulf %73, %74 : vector<8x32xf32>
    %76 = vector.extract_strided_slice %70 {offsets = [0, 0], sizes = [8, 32], strides = [1, 1]} : vector<8x96xf32> to vector<8x32xf32>
    %77 = arith.mulf %76, %72 : vector<8x32xf32>
    %78 = arith.addf %75, %77 : vector<8x32xf32>
    %79 = vector.extract_strided_slice %70 {offsets = [0, 64], sizes = [8, 32], strides = [1, 1]} : vector<8x96xf32> to vector<8x32xf32>
    %80 = math.tanh %78 : vector<8x32xf32>
    %81 = arith.mulf %79, %80 : vector<8x32xf32>
    %82 = vector.broadcast %14 : i32 to vector<8x1xi32>
    %83 = arith.cmpi slt, %82, %13 : vector<8x1xi32>
    %c0_41 = arith.constant 0 : index
    %c0_42 = arith.constant 0 : index
    %84 = vector.load %arg13[%c0_41, %c0_42] : memref<8x32xf32, #tpu.memory_space<vmem>>, vector<8x32xf32>
    %85 = vector.shape_cast %83 : vector<8x1xi1> to vector<8x1xi1>
    %86 = vector.broadcast %85 : vector<8x1xi1> to vector<8x32xi1>
    %87 = arith.select %86, %78, %84 : vector<8x32xi1>, vector<8x32xf32>
    %c0_43 = arith.constant 0 : index
    %c0_44 = arith.constant 0 : index
    %88 = vector.load %arg13[%c0_43, %c0_44] : memref<8x32xf32, #tpu.memory_space<vmem>>, vector<8x32xf32>
    tpu.vector_store %arg13[%c0_43, %c0_44], %87 {strides = array<i32>} : memref<8x32xf32, #tpu.memory_space<vmem>>, vector<8x32xf32>,
    %c0_45 = arith.constant 0 : index
    %c32 = arith.constant 32 : index
    %89 = vector.load %arg11[%c0_45, %c32] : memref<8x64xf32, #tpu.memory_space<vmem>>, vector<8x32xf32>
    %90 = vector.shape_cast %83 : vector<8x1xi1> to vector<8x1xi1>
    %91 = vector.broadcast %90 : vector<8x1xi1> to vector<8x32xi1>
    %92 = arith.select %91, %81, %89 : vector<8x32xi1>, vector<8x32xf32>
    %c0_46 = arith.constant 0 : index
    %c32_47 = arith.constant 32 : index
    %93 = vector.load %arg11[%c0_46, %c32_47] : memref<8x64xf32, #tpu.memory_space<vmem>>, vector<8x32xf32>
    tpu.vector_store %arg11[%c0_46, %c32_47], %92 {strides = array<i32>} : memref<8x64xf32, #tpu.memory_space<vmem>>, vector<8x32xf32>,
    %cst_48 = arith.constant 0.000000e+00 : f32
    %94 = vector.shape_cast %83 : vector<8x1xi1> to vector<8x1xi1>
    %95 = vector.broadcast %94 : vector<8x1xi1> to vector<8x32xi1>
    %96 = vector.broadcast %cst_48 : f32 to vector<8x32xf32>
    %97 = arith.select %95, %81, %96 : vector<8x32xi1>, vector<8x32xf32>
    %98 = arith.index_cast %18 : i32 to index
    %c32_49 = arith.constant 32 : index
    %99 = vector.load %arg10[%98, %c32_49] : memref<64x64xf32, #tpu.memory_space<vmem>>, vector<8x32xf32>
    tpu.vector_store %arg10[%98, %c32_49], %97 {strides = array<i32>} : memref<64x64xf32, #tpu.memory_space<vmem>>, vector<8x32xf32>,
    %c1_i32 = arith.constant 1 : i32
    %c7_i32_50 = arith.constant 7 : i32
    %100 = arith.subi %c7_i32_50, %c1_i32 : i32
    %c8_i32_51 = arith.constant 8 : i32
    %101 = arith.muli %c1_i32, %c8_i32_51 : i32
    %102 = tpu.assume_multiple %101, 8 : i32
    %c8_i32_52 = arith.constant 8 : i32
    %103 = arith.muli %100, %c8_i32_52 : i32
    %104 = tpu.assume_multiple %103, 8 : i32
    %c0_53 = arith.constant 0 : index
    %c0_54 = arith.constant 0 : index
    %105 = vector.load %arg11[%c0_53, %c0_54] : memref<8x64xf32, #tpu.memory_space<vmem>>, vector<8x64xf32>
    %c0_55 = arith.constant 0 : index
    %c0_56 = arith.constant 0 : index
    %106 = vector.load %arg5[%c0_55, %c0_56] : memref<64x256xf32, #tpu.memory_space<vmem>>, vector<64x256xf32>
    %cst_57 = arith.constant dense<0.000000e+00> : vector<8x256xf32>
    %107 = tpu.matmul %105, %106, %cst_57 {dimension_numbers = #tpu.dot_dimension_numbers<[1], [0], [0], [1], [0, 0, 1, 1], [], []>} : vector<8x64xf32>, vector<64x256xf32>, vector<8x256xf32> -> vector<8x256xf32>
    %108 = arith.index_cast %102 : i32 to index
    %c0_58 = arith.constant 0 : index
    %109 = vector.load %arg9[%108, %c0_58] : memref<64x256xf32, #tpu.memory_space<vmem>>, vector<8x128xf32>
    %110 = vector.extract_strided_slice %107 {offsets = [0, 0], sizes = [8, 128], strides = [1, 1]} : vector<8x256xf32> to vector<8x128xf32>
    %111 = arith.addf %109, %110 : vector<8x128xf32>
    %112 = vector.extract_strided_slice %111 {offsets = [0, 0], sizes = [8, 96], strides = [1, 1]} : vector<8x128xf32> to vector<8x96xf32>
    %113 = arith.negf %112 : vector<8x96xf32>
    %114 = math.exp %113 : vector<8x96xf32>
    %cst_59 = arith.constant 1.000000e+00 : f32
    %115 = vector.broadcast %cst_59 : f32 to vector<8x96xf32>
    %116 = arith.addf %115, %114 : vector<8x96xf32>
    %117 = arith.divf %115, %116 : vector<8x96xf32>
    %118 = vector.extract_strided_slice %111 {offsets = [0, 96], sizes = [8, 32], strides = [1, 1]} : vector<8x128xf32> to vector<8x32xf32>
    %119 = math.tanh %118 : vector<8x32xf32>
    %120 = vector.extract_strided_slice %117 {offsets = [0, 32], sizes = [8, 32], strides = [1, 1]} : vector<8x96xf32> to vector<8x32xf32>
    %c0_60 = arith.constant 0 : index
    %c0_61 = arith.constant 0 : index
    %121 = vector.load %arg12[%c0_60, %c0_61] : memref<8x32xf32, #tpu.memory_space<vmem>>, vector<8x32xf32>
    %122 = arith.mulf %120, %121 : vector<8x32xf32>
    %123 = vector.extract_strided_slice %117 {offsets = [0, 0], sizes = [8, 32], strides = [1, 1]} : vector<8x96xf32> to vector<8x32xf32>
    %124 = arith.mulf %123, %119 : vector<8x32xf32>
    %125 = arith.addf %122, %124 : vector<8x32xf32>
    %126 = vector.extract_strided_slice %117 {offsets = [0, 64], sizes = [8, 32], strides = [1, 1]} : vector<8x96xf32> to vector<8x32xf32>
    %127 = math.tanh %125 : vector<8x32xf32>
    %128 = arith.mulf %126, %127 : vector<8x32xf32>
    %129 = vector.broadcast %c1_i32 : i32 to vector<8x1xi32>
    %130 = arith.cmpi slt, %129, %13 : vector<8x1xi32>
    %c0_62 = arith.constant 0 : index
    %c0_63 = arith.constant 0 : index
    %131 = vector.load %arg12[%c0_62, %c0_63] : memref<8x32xf32, #tpu.memory_space<vmem>>, vector<8x32xf32>
    %132 = vector.shape_cast %130 : vector<8x1xi1> to vector<8x1xi1>
    %133 = vector.broadcast %132 : vector<8x1xi1> to vector<8x32xi1>
    %134 = arith.select %133, %125, %131 : vector<8x32xi1>, vector<8x32xf32>
    %c0_64 = arith.constant 0 : index
    %c0_65 = arith.constant 0 : index
    %135 = vector.load %arg12[%c0_64, %c0_65] : memref<8x32xf32, #tpu.memory_space<vmem>>, vector<8x32xf32>
    tpu.vector_store %arg12[%c0_64, %c0_65], %134 {strides = array<i32>} : memref<8x32xf32, #tpu.memory_space<vmem>>, vector<8x32xf32>,
    %c0_66 = arith.constant 0 : index
    %c0_67 = arith.constant 0 : index
    %136 = vector.load %arg11[%c0_66, %c0_67] : memref<8x64xf32, #tpu.memory_space<vmem>>, vector<8x32xf32>
    %137 = vector.shape_cast %130 : vector<8x1xi1> to vector<8x1xi1>
    %138 = vector.broadcast %137 : vector<8x1xi1> to vector<8x32xi1>
    %139 = arith.select %138, %128, %136 : vector<8x32xi1>, vector<8x32xf32>
    %c0_68 = arith.constant 0 : index
    %c0_69 = arith.constant 0 : index
    %140 = vector.load %arg11[%c0_68, %c0_69] : memref<8x64xf32, #tpu.memory_space<vmem>>, vector<8x32xf32>
    tpu.vector_store %arg11[%c0_68, %c0_69], %139 {strides = array<i32>} : memref<8x64xf32, #tpu.memory_space<vmem>>, vector<8x32xf32>,
    %cst_70 = arith.constant 0.000000e+00 : f32
    %141 = vector.shape_cast %130 : vector<8x1xi1> to vector<8x1xi1>
    %142 = vector.broadcast %141 : vector<8x1xi1> to vector<8x32xi1>
    %143 = vector.broadcast %cst_70 : f32 to vector<8x32xf32>
    %144 = arith.select %142, %128, %143 : vector<8x32xi1>, vector<8x32xf32>
    %145 = arith.index_cast %102 : i32 to index
    %c0_71 = arith.constant 0 : index
    %146 = vector.load %arg10[%145, %c0_71] : memref<64x64xf32, #tpu.memory_space<vmem>>, vector<8x32xf32>
    tpu.vector_store %arg10[%145, %c0_71], %144 {strides = array<i32>} : memref<64x64xf32, #tpu.memory_space<vmem>>, vector<8x32xf32>,
    %147 = arith.index_cast %104 : i32 to index
    %c128_72 = arith.constant 128 : index
    %148 = vector.load %arg9[%147, %c128_72] : memref<64x256xf32, #tpu.memory_space<vmem>>, vector<8x128xf32>
    %149 = vector.extract_strided_slice %107 {offsets = [0, 128], sizes = [8, 128], strides = [1, 1]} : vector<8x256xf32> to vector<8x128xf32>
    %150 = arith.addf %148, %149 : vector<8x128xf32>
    %151 = vector.extract_strided_slice %150 {offsets = [0, 0], sizes = [8, 96], strides = [1, 1]} : vector<8x128xf32> to vector<8x96xf32>
    %152 = arith.negf %151 : vector<8x96xf32>
    %153 = math.exp %152 : vector<8x96xf32>
    %cst_73 = arith.constant 1.000000e+00 : f32
    %154 = vector.broadcast %cst_73 : f32 to vector<8x96xf32>
    %155 = arith.addf %154, %153 : vector<8x96xf32>
    %156 = arith.divf %154, %155 : vector<8x96xf32>
    %157 = vector.extract_strided_slice %150 {offsets = [0, 96], sizes = [8, 32], strides = [1, 1]} : vector<8x128xf32> to vector<8x32xf32>
    %158 = math.tanh %157 : vector<8x32xf32>
    %159 = vector.extract_strided_slice %156 {offsets = [0, 32], sizes = [8, 32], strides = [1, 1]} : vector<8x96xf32> to vector<8x32xf32>
    %c0_74 = arith.constant 0 : index
    %c0_75 = arith.constant 0 : index
    %160 = vector.load %arg13[%c0_74, %c0_75] : memref<8x32xf32, #tpu.memory_space<vmem>>, vector<8x32xf32>
    %161 = arith.mulf %159, %160 : vector<8x32xf32>
    %162 = vector.extract_strided_slice %156 {offsets = [0, 0], sizes = [8, 32], strides = [1, 1]} : vector<8x96xf32> to vector<8x32xf32>
    %163 = arith.mulf %162, %158 : vector<8x32xf32>
    %164 = arith.addf %161, %163 : vector<8x32xf32>
    %165 = vector.extract_strided_slice %156 {offsets = [0, 64], sizes = [8, 32], strides = [1, 1]} : vector<8x96xf32> to vector<8x32xf32>
    %166 = math.tanh %164 : vector<8x32xf32>
    %167 = arith.mulf %165, %166 : vector<8x32xf32>
    %168 = vector.broadcast %100 : i32 to vector<8x1xi32>
    %169 = arith.cmpi slt, %168, %13 : vector<8x1xi32>
    %c0_76 = arith.constant 0 : index
    %c0_77 = arith.constant 0 : index
    %170 = vector.load %arg13[%c0_76, %c0_77] : memref<8x32xf32, #tpu.memory_space<vmem>>, vector<8x32xf32>
    %171 = vector.shape_cast %169 : vector<8x1xi1> to vector<8x1xi1>
    %172 = vector.broadcast %171 : vector<8x1xi1> to vector<8x32xi1>
    %173 = arith.select %172, %164, %170 : vector<8x32xi1>, vector<8x32xf32>
    %c0_78 = arith.constant 0 : index
    %c0_79 = arith.constant 0 : index
    %174 = vector.load %arg13[%c0_78, %c0_79] : memref<8x32xf32, #tpu.memory_space<vmem>>, vector<8x32xf32>
    tpu.vector_store %arg13[%c0_78, %c0_79], %173 {strides = array<i32>} : memref<8x32xf32, #tpu.memory_space<vmem>>, vector<8x32xf32>,
    %c0_80 = arith.constant 0 : index
    %c32_81 = arith.constant 32 : index
    %175 = vector.load %arg11[%c0_80, %c32_81] : memref<8x64xf32, #tpu.memory_space<vmem>>, vector<8x32xf32>
    %176 = vector.shape_cast %169 : vector<8x1xi1> to vector<8x1xi1>
    %177 = vector.broadcast %176 : vector<8x1xi1> to vector<8x32xi1>
    %178 = arith.select %177, %167, %175 : vector<8x32xi1>, vector<8x32xf32>
    %c0_82 = arith.constant 0 : index
    %c32_83 = arith.constant 32 : index
    %179 = vector.load %arg11[%c0_82, %c32_83] : memref<8x64xf32, #tpu.memory_space<vmem>>, vector<8x32xf32>
    tpu.vector_store %arg11[%c0_82, %c32_83], %178 {strides = array<i32>} : memref<8x64xf32, #tpu.memory_space<vmem>>, vector<8x32xf32>,
    %cst_84 = arith.constant 0.000000e+00 : f32
    %180 = vector.shape_cast %169 : vector<8x1xi1> to vector<8x1xi1>
    %181 = vector.broadcast %180 : vector<8x1xi1> to vector<8x32xi1>
    %182 = vector.broadcast %cst_84 : f32 to vector<8x32xf32>
    %183 = arith.select %181, %167, %182 : vector<8x32xi1>, vector<8x32xf32>
    %184 = arith.index_cast %104 : i32 to index
    %c32_85 = arith.constant 32 : index
    %185 = vector.load %arg10[%184, %c32_85] : memref<64x64xf32, #tpu.memory_space<vmem>>, vector<8x32xf32>
    tpu.vector_store %arg10[%184, %c32_85], %183 {strides = array<i32>} : memref<64x64xf32, #tpu.memory_space<vmem>>, vector<8x32xf32>,
    %c2_i32 = arith.constant 2 : i32
    %c7_i32_86 = arith.constant 7 : i32
    %186 = arith.subi %c7_i32_86, %c2_i32 : i32
    %c8_i32_87 = arith.constant 8 : i32
    %187 = arith.muli %c2_i32, %c8_i32_87 : i32
    %188 = tpu.assume_multiple %187, 8 : i32
    %c8_i32_88 = arith.constant 8 : i32
    %189 = arith.muli %186, %c8_i32_88 : i32
    %190 = tpu.assume_multiple %189, 8 : i32
    %c0_89 = arith.constant 0 : index
    %c0_90 = arith.constant 0 : index
    %191 = vector.load %arg11[%c0_89, %c0_90] : memref<8x64xf32, #tpu.memory_space<vmem>>, vector<8x64xf32>
    %c0_91 = arith.constant 0 : index
    %c0_92 = arith.constant 0 : index
    %192 = vector.load %arg5[%c0_91, %c0_92] : memref<64x256xf32, #tpu.memory_space<vmem>>, vector<64x256xf32>
    %cst_93 = arith.constant dense<0.000000e+00> : vector<8x256xf32>
    %193 = tpu.matmul %191, %192, %cst_93 {dimension_numbers = #tpu.dot_dimension_numbers<[1], [0], [0], [1], [0, 0, 1, 1], [], []>} : vector<8x64xf32>, vector<64x256xf32>, vector<8x256xf32> -> vector<8x256xf32>
    %194 = arith.index_cast %188 : i32 to index
    %c0_94 = arith.constant 0 : index
    %195 = vector.load %arg9[%194, %c0_94] : memref<64x256xf32, #tpu.memory_space<vmem>>, vector<8x128xf32>
    %196 = vector.extract_strided_slice %193 {offsets = [0, 0], sizes = [8, 128], strides = [1, 1]} : vector<8x256xf32> to vector<8x128xf32>
    %197 = arith.addf %195, %196 : vector<8x128xf32>
    %198 = vector.extract_strided_slice %197 {offsets = [0, 0], sizes = [8, 96], strides = [1, 1]} : vector<8x128xf32> to vector<8x96xf32>
    %199 = arith.negf %198 : vector<8x96xf32>
    %200 = math.exp %199 : vector<8x96xf32>
    %cst_95 = arith.constant 1.000000e+00 : f32
    %201 = vector.broadcast %cst_95 : f32 to vector<8x96xf32>
    %202 = arith.addf %201, %200 : vector<8x96xf32>
    %203 = arith.divf %201, %202 : vector<8x96xf32>
    %204 = vector.extract_strided_slice %197 {offsets = [0, 96], sizes = [8, 32], strides = [1, 1]} : vector<8x128xf32> to vector<8x32xf32>
    %205 = math.tanh %204 : vector<8x32xf32>
    %206 = vector.extract_strided_slice %203 {offsets = [0, 32], sizes = [8, 32], strides = [1, 1]} : vector<8x96xf32> to vector<8x32xf32>
    %c0_96 = arith.constant 0 : index
    %c0_97 = arith.constant 0 : index
    %207 = vector.load %arg12[%c0_96, %c0_97] : memref<8x32xf32, #tpu.memory_space<vmem>>, vector<8x32xf32>
    %208 = arith.mulf %206, %207 : vector<8x32xf32>
    %209 = vector.extract_strided_slice %203 {offsets = [0, 0], sizes = [8, 32], strides = [1, 1]} : vector<8x96xf32> to vector<8x32xf32>
    %210 = arith.mulf %209, %205 : vector<8x32xf32>
    %211 = arith.addf %208, %210 : vector<8x32xf32>
    %212 = vector.extract_strided_slice %203 {offsets = [0, 64], sizes = [8, 32], strides = [1, 1]} : vector<8x96xf32> to vector<8x32xf32>
    %213 = math.tanh %211 : vector<8x32xf32>
    %214 = arith.mulf %212, %213 : vector<8x32xf32>
    %215 = vector.broadcast %c2_i32 : i32 to vector<8x1xi32>
    %216 = arith.cmpi slt, %215, %13 : vector<8x1xi32>
    %c0_98 = arith.constant 0 : index
    %c0_99 = arith.constant 0 : index
    %217 = vector.load %arg12[%c0_98, %c0_99] : memref<8x32xf32, #tpu.memory_space<vmem>>, vector<8x32xf32>
    %218 = vector.shape_cast %216 : vector<8x1xi1> to vector<8x1xi1>
    %219 = vector.broadcast %218 : vector<8x1xi1> to vector<8x32xi1>
    %220 = arith.select %219, %211, %217 : vector<8x32xi1>, vector<8x32xf32>
    %c0_100 = arith.constant 0 : index
    %c0_101 = arith.constant 0 : index
    %221 = vector.load %arg12[%c0_100, %c0_101] : memref<8x32xf32, #tpu.memory_space<vmem>>, vector<8x32xf32>
    tpu.vector_store %arg12[%c0_100, %c0_101], %220 {strides = array<i32>} : memref<8x32xf32, #tpu.memory_space<vmem>>, vector<8x32xf32>,
    %c0_102 = arith.constant 0 : index
    %c0_103 = arith.constant 0 : index
    %222 = vector.load %arg11[%c0_102, %c0_103] : memref<8x64xf32, #tpu.memory_space<vmem>>, vector<8x32xf32>
    %223 = vector.shape_cast %216 : vector<8x1xi1> to vector<8x1xi1>
    %224 = vector.broadcast %223 : vector<8x1xi1> to vector<8x32xi1>
    %225 = arith.select %224, %214, %222 : vector<8x32xi1>, vector<8x32xf32>
    %c0_104 = arith.constant 0 : index
    %c0_105 = arith.constant 0 : index
    %226 = vector.load %arg11[%c0_104, %c0_105] : memref<8x64xf32, #tpu.memory_space<vmem>>, vector<8x32xf32>
    tpu.vector_store %arg11[%c0_104, %c0_105], %225 {strides = array<i32>} : memref<8x64xf32, #tpu.memory_space<vmem>>, vector<8x32xf32>,
    %cst_106 = arith.constant 0.000000e+00 : f32
    %227 = vector.shape_cast %216 : vector<8x1xi1> to vector<8x1xi1>
    %228 = vector.broadcast %227 : vector<8x1xi1> to vector<8x32xi1>
    %229 = vector.broadcast %cst_106 : f32 to vector<8x32xf32>
    %230 = arith.select %228, %214, %229 : vector<8x32xi1>, vector<8x32xf32>
    %231 = arith.index_cast %188 : i32 to index
    %c0_107 = arith.constant 0 : index
    %232 = vector.load %arg10[%231, %c0_107] : memref<64x64xf32, #tpu.memory_space<vmem>>, vector<8x32xf32>
    tpu.vector_store %arg10[%231, %c0_107], %230 {strides = array<i32>} : memref<64x64xf32, #tpu.memory_space<vmem>>, vector<8x32xf32>,
    %233 = arith.index_cast %190 : i32 to index
    %c128_108 = arith.constant 128 : index
    %234 = vector.load %arg9[%233, %c128_108] : memref<64x256xf32, #tpu.memory_space<vmem>>, vector<8x128xf32>
    %235 = vector.extract_strided_slice %193 {offsets = [0, 128], sizes = [8, 128], strides = [1, 1]} : vector<8x256xf32> to vector<8x128xf32>
    %236 = arith.addf %234, %235 : vector<8x128xf32>
    %237 = vector.extract_strided_slice %236 {offsets = [0, 0], sizes = [8, 96], strides = [1, 1]} : vector<8x128xf32> to vector<8x96xf32>
    %238 = arith.negf %237 : vector<8x96xf32>
    %239 = math.exp %238 : vector<8x96xf32>
    %cst_109 = arith.constant 1.000000e+00 : f32
    %240 = vector.broadcast %cst_109 : f32 to vector<8x96xf32>
    %241 = arith.addf %240, %239 : vector<8x96xf32>
    %242 = arith.divf %240, %241 : vector<8x96xf32>
    %243 = vector.extract_strided_slice %236 {offsets = [0, 96], sizes = [8, 32], strides = [1, 1]} : vector<8x128xf32> to vector<8x32xf32>
    %244 = math.tanh %243 : vector<8x32xf32>
    %245 = vector.extract_strided_slice %242 {offsets = [0, 32], sizes = [8, 32], strides = [1, 1]} : vector<8x96xf32> to vector<8x32xf32>
    %c0_110 = arith.constant 0 : index
    %c0_111 = arith.constant 0 : index
    %246 = vector.load %arg13[%c0_110, %c0_111] : memref<8x32xf32, #tpu.memory_space<vmem>>, vector<8x32xf32>
    %247 = arith.mulf %245, %246 : vector<8x32xf32>
    %248 = vector.extract_strided_slice %242 {offsets = [0, 0], sizes = [8, 32], strides = [1, 1]} : vector<8x96xf32> to vector<8x32xf32>
    %249 = arith.mulf %248, %244 : vector<8x32xf32>
    %250 = arith.addf %247, %249 : vector<8x32xf32>
    %251 = vector.extract_strided_slice %242 {offsets = [0, 64], sizes = [8, 32], strides = [1, 1]} : vector<8x96xf32> to vector<8x32xf32>
    %252 = math.tanh %250 : vector<8x32xf32>
    %253 = arith.mulf %251, %252 : vector<8x32xf32>
    %254 = vector.broadcast %186 : i32 to vector<8x1xi32>
    %255 = arith.cmpi slt, %254, %13 : vector<8x1xi32>
    %c0_112 = arith.constant 0 : index
    %c0_113 = arith.constant 0 : index
    %256 = vector.load %arg13[%c0_112, %c0_113] : memref<8x32xf32, #tpu.memory_space<vmem>>, vector<8x32xf32>
    %257 = vector.shape_cast %255 : vector<8x1xi1> to vector<8x1xi1>
    %258 = vector.broadcast %257 : vector<8x1xi1> to vector<8x32xi1>
    %259 = arith.select %258, %250, %256 : vector<8x32xi1>, vector<8x32xf32>
    %c0_114 = arith.constant 0 : index
    %c0_115 = arith.constant 0 : index
    %260 = vector.load %arg13[%c0_114, %c0_115] : memref<8x32xf32, #tpu.memory_space<vmem>>, vector<8x32xf32>
    tpu.vector_store %arg13[%c0_114, %c0_115], %259 {strides = array<i32>} : memref<8x32xf32, #tpu.memory_space<vmem>>, vector<8x32xf32>,
    %c0_116 = arith.constant 0 : index
    %c32_117 = arith.constant 32 : index
    %261 = vector.load %arg11[%c0_116, %c32_117] : memref<8x64xf32, #tpu.memory_space<vmem>>, vector<8x32xf32>
    %262 = vector.shape_cast %255 : vector<8x1xi1> to vector<8x1xi1>
    %263 = vector.broadcast %262 : vector<8x1xi1> to vector<8x32xi1>
    %264 = arith.select %263, %253, %261 : vector<8x32xi1>, vector<8x32xf32>
    %c0_118 = arith.constant 0 : index
    %c32_119 = arith.constant 32 : index
    %265 = vector.load %arg11[%c0_118, %c32_119] : memref<8x64xf32, #tpu.memory_space<vmem>>, vector<8x32xf32>
    tpu.vector_store %arg11[%c0_118, %c32_119], %264 {strides = array<i32>} : memref<8x64xf32, #tpu.memory_space<vmem>>, vector<8x32xf32>,
    %cst_120 = arith.constant 0.000000e+00 : f32
    %266 = vector.shape_cast %255 : vector<8x1xi1> to vector<8x1xi1>
    %267 = vector.broadcast %266 : vector<8x1xi1> to vector<8x32xi1>
    %268 = vector.broadcast %cst_120 : f32 to vector<8x32xf32>
    %269 = arith.select %267, %253, %268 : vector<8x32xi1>, vector<8x32xf32>
    %270 = arith.index_cast %190 : i32 to index
    %c32_121 = arith.constant 32 : index
    %271 = vector.load %arg10[%270, %c32_121] : memref<64x64xf32, #tpu.memory_space<vmem>>, vector<8x32xf32>
    tpu.vector_store %arg10[%270, %c32_121], %269 {strides = array<i32>} : memref<64x64xf32, #tpu.memory_space<vmem>>, vector<8x32xf32>,
    %c3_i32 = arith.constant 3 : i32
    %c7_i32_122 = arith.constant 7 : i32
    %272 = arith.subi %c7_i32_122, %c3_i32 : i32
    %c8_i32_123 = arith.constant 8 : i32
    %273 = arith.muli %c3_i32, %c8_i32_123 : i32
    %274 = tpu.assume_multiple %273, 8 : i32
    %c8_i32_124 = arith.constant 8 : i32
    %275 = arith.muli %272, %c8_i32_124 : i32
    %276 = tpu.assume_multiple %275, 8 : i32
    %c0_125 = arith.constant 0 : index
    %c0_126 = arith.constant 0 : index
    %277 = vector.load %arg11[%c0_125, %c0_126] : memref<8x64xf32, #tpu.memory_space<vmem>>, vector<8x64xf32>
    %c0_127 = arith.constant 0 : index
    %c0_128 = arith.constant 0 : index
    %278 = vector.load %arg5[%c0_127, %c0_128] : memref<64x256xf32, #tpu.memory_space<vmem>>, vector<64x256xf32>
    %cst_129 = arith.constant dense<0.000000e+00> : vector<8x256xf32>
    %279 = tpu.matmul %277, %278, %cst_129 {dimension_numbers = #tpu.dot_dimension_numbers<[1], [0], [0], [1], [0, 0, 1, 1], [], []>} : vector<8x64xf32>, vector<64x256xf32>, vector<8x256xf32> -> vector<8x256xf32>
    %280 = arith.index_cast %274 : i32 to index
    %c0_130 = arith.constant 0 : index
    %281 = vector.load %arg9[%280, %c0_130] : memref<64x256xf32, #tpu.memory_space<vmem>>, vector<8x128xf32>
    %282 = vector.extract_strided_slice %279 {offsets = [0, 0], sizes = [8, 128], strides = [1, 1]} : vector<8x256xf32> to vector<8x128xf32>
    %283 = arith.addf %281, %282 : vector<8x128xf32>
    %284 = vector.extract_strided_slice %283 {offsets = [0, 0], sizes = [8, 96], strides = [1, 1]} : vector<8x128xf32> to vector<8x96xf32>
    %285 = arith.negf %284 : vector<8x96xf32>
    %286 = math.exp %285 : vector<8x96xf32>
    %cst_131 = arith.constant 1.000000e+00 : f32
    %287 = vector.broadcast %cst_131 : f32 to vector<8x96xf32>
    %288 = arith.addf %287, %286 : vector<8x96xf32>
    %289 = arith.divf %287, %288 : vector<8x96xf32>
    %290 = vector.extract_strided_slice %283 {offsets = [0, 96], sizes = [8, 32], strides = [1, 1]} : vector<8x128xf32> to vector<8x32xf32>
    %291 = math.tanh %290 : vector<8x32xf32>
    %292 = vector.extract_strided_slice %289 {offsets = [0, 32], sizes = [8, 32], strides = [1, 1]} : vector<8x96xf32> to vector<8x32xf32>
    %c0_132 = arith.constant 0 : index
    %c0_133 = arith.constant 0 : index
    %293 = vector.load %arg12[%c0_132, %c0_133] : memref<8x32xf32, #tpu.memory_space<vmem>>, vector<8x32xf32>
    %294 = arith.mulf %292, %293 : vector<8x32xf32>
    %295 = vector.extract_strided_slice %289 {offsets = [0, 0], sizes = [8, 32], strides = [1, 1]} : vector<8x96xf32> to vector<8x32xf32>
    %296 = arith.mulf %295, %291 : vector<8x32xf32>
    %297 = arith.addf %294, %296 : vector<8x32xf32>
    %298 = vector.extract_strided_slice %289 {offsets = [0, 64], sizes = [8, 32], strides = [1, 1]} : vector<8x96xf32> to vector<8x32xf32>
    %299 = math.tanh %297 : vector<8x32xf32>
    %300 = arith.mulf %298, %299 : vector<8x32xf32>
    %301 = vector.broadcast %c3_i32 : i32 to vector<8x1xi32>
    %302 = arith.cmpi slt, %301, %13 : vector<8x1xi32>
    %c0_134 = arith.constant 0 : index
    %c0_135 = arith.constant 0 : index
    %303 = vector.load %arg12[%c0_134, %c0_135] : memref<8x32xf32, #tpu.memory_space<vmem>>, vector<8x32xf32>
    %304 = vector.shape_cast %302 : vector<8x1xi1> to vector<8x1xi1>
    %305 = vector.broadcast %304 : vector<8x1xi1> to vector<8x32xi1>
    %306 = arith.select %305, %297, %303 : vector<8x32xi1>, vector<8x32xf32>
    %c0_136 = arith.constant 0 : index
    %c0_137 = arith.constant 0 : index
    %307 = vector.load %arg12[%c0_136, %c0_137] : memref<8x32xf32, #tpu.memory_space<vmem>>, vector<8x32xf32>
    tpu.vector_store %arg12[%c0_136, %c0_137], %306 {strides = array<i32>} : memref<8x32xf32, #tpu.memory_space<vmem>>, vector<8x32xf32>,
    %c0_138 = arith.constant 0 : index
    %c0_139 = arith.constant 0 : index
    %308 = vector.load %arg11[%c0_138, %c0_139] : memref<8x64xf32, #tpu.memory_space<vmem>>, vector<8x32xf32>
    %309 = vector.shape_cast %302 : vector<8x1xi1> to vector<8x1xi1>
    %310 = vector.broadcast %309 : vector<8x1xi1> to vector<8x32xi1>
    %311 = arith.select %310, %300, %308 : vector<8x32xi1>, vector<8x32xf32>
    %c0_140 = arith.constant 0 : index
    %c0_141 = arith.constant 0 : index
    %312 = vector.load %arg11[%c0_140, %c0_141] : memref<8x64xf32, #tpu.memory_space<vmem>>, vector<8x32xf32>
    tpu.vector_store %arg11[%c0_140, %c0_141], %311 {strides = array<i32>} : memref<8x64xf32, #tpu.memory_space<vmem>>, vector<8x32xf32>,
    %cst_142 = arith.constant 0.000000e+00 : f32
    %313 = vector.shape_cast %302 : vector<8x1xi1> to vector<8x1xi1>
    %314 = vector.broadcast %313 : vector<8x1xi1> to vector<8x32xi1>
    %315 = vector.broadcast %cst_142 : f32 to vector<8x32xf32>
    %316 = arith.select %314, %300, %315 : vector<8x32xi1>, vector<8x32xf32>
    %317 = arith.index_cast %274 : i32 to index
    %c0_143 = arith.constant 0 : index
    %318 = vector.load %arg10[%317, %c0_143] : memref<64x64xf32, #tpu.memory_space<vmem>>, vector<8x32xf32>
    tpu.vector_store %arg10[%317, %c0_143], %316 {strides = array<i32>} : memref<64x64xf32, #tpu.memory_space<vmem>>, vector<8x32xf32>,
    %319 = arith.index_cast %276 : i32 to index
    %c128_144 = arith.constant 128 : index
    %320 = vector.load %arg9[%319, %c128_144] : memref<64x256xf32, #tpu.memory_space<vmem>>, vector<8x128xf32>
    %321 = vector.extract_strided_slice %279 {offsets = [0, 128], sizes = [8, 128], strides = [1, 1]} : vector<8x256xf32> to vector<8x128xf32>
    %322 = arith.addf %320, %321 : vector<8x128xf32>
    %323 = vector.extract_strided_slice %322 {offsets = [0, 0], sizes = [8, 96], strides = [1, 1]} : vector<8x128xf32> to vector<8x96xf32>
    %324 = arith.negf %323 : vector<8x96xf32>
    %325 = math.exp %324 : vector<8x96xf32>
    %cst_145 = arith.constant 1.000000e+00 : f32
    %326 = vector.broadcast %cst_145 : f32 to vector<8x96xf32>
    %327 = arith.addf %326, %325 : vector<8x96xf32>
    %328 = arith.divf %326, %327 : vector<8x96xf32>
    %329 = vector.extract_strided_slice %322 {offsets = [0, 96], sizes = [8, 32], strides = [1, 1]} : vector<8x128xf32> to vector<8x32xf32>
    %330 = math.tanh %329 : vector<8x32xf32>
    %331 = vector.extract_strided_slice %328 {offsets = [0, 32], sizes = [8, 32], strides = [1, 1]} : vector<8x96xf32> to vector<8x32xf32>
    %c0_146 = arith.constant 0 : index
    %c0_147 = arith.constant 0 : index
    %332 = vector.load %arg13[%c0_146, %c0_147] : memref<8x32xf32, #tpu.memory_space<vmem>>, vector<8x32xf32>
    %333 = arith.mulf %331, %332 : vector<8x32xf32>
    %334 = vector.extract_strided_slice %328 {offsets = [0, 0], sizes = [8, 32], strides = [1, 1]} : vector<8x96xf32> to vector<8x32xf32>
    %335 = arith.mulf %334, %330 : vector<8x32xf32>
    %336 = arith.addf %333, %335 : vector<8x32xf32>
    %337 = vector.extract_strided_slice %328 {offsets = [0, 64], sizes = [8, 32], strides = [1, 1]} : vector<8x96xf32> to vector<8x32xf32>
    %338 = math.tanh %336 : vector<8x32xf32>
    %339 = arith.mulf %337, %338 : vector<8x32xf32>
    %340 = vector.broadcast %272 : i32 to vector<8x1xi32>
    %341 = arith.cmpi slt, %340, %13 : vector<8x1xi32>
    %c0_148 = arith.constant 0 : index
    %c0_149 = arith.constant 0 : index
    %342 = vector.load %arg13[%c0_148, %c0_149] : memref<8x32xf32, #tpu.memory_space<vmem>>, vector<8x32xf32>
    %343 = vector.shape_cast %341 : vector<8x1xi1> to vector<8x1xi1>
    %344 = vector.broadcast %343 : vector<8x1xi1> to vector<8x32xi1>
    %345 = arith.select %344, %336, %342 : vector<8x32xi1>, vector<8x32xf32>
    %c0_150 = arith.constant 0 : index
    %c0_151 = arith.constant 0 : index
    %346 = vector.load %arg13[%c0_150, %c0_151] : memref<8x32xf32, #tpu.memory_space<vmem>>, vector<8x32xf32>
    tpu.vector_store %arg13[%c0_150, %c0_151], %345 {strides = array<i32>} : memref<8x32xf32, #tpu.memory_space<vmem>>, vector<8x32xf32>,
    %c0_152 = arith.constant 0 : index
    %c32_153 = arith.constant 32 : index
    %347 = vector.load %arg11[%c0_152, %c32_153] : memref<8x64xf32, #tpu.memory_space<vmem>>, vector<8x32xf32>
    %348 = vector.shape_cast %341 : vector<8x1xi1> to vector<8x1xi1>
    %349 = vector.broadcast %348 : vector<8x1xi1> to vector<8x32xi1>
    %350 = arith.select %349, %339, %347 : vector<8x32xi1>, vector<8x32xf32>
    %c0_154 = arith.constant 0 : index
    %c32_155 = arith.constant 32 : index
    %351 = vector.load %arg11[%c0_154, %c32_155] : memref<8x64xf32, #tpu.memory_space<vmem>>, vector<8x32xf32>
    tpu.vector_store %arg11[%c0_154, %c32_155], %350 {strides = array<i32>} : memref<8x64xf32, #tpu.memory_space<vmem>>, vector<8x32xf32>,
    %cst_156 = arith.constant 0.000000e+00 : f32
    %352 = vector.shape_cast %341 : vector<8x1xi1> to vector<8x1xi1>
    %353 = vector.broadcast %352 : vector<8x1xi1> to vector<8x32xi1>
    %354 = vector.broadcast %cst_156 : f32 to vector<8x32xf32>
    %355 = arith.select %353, %339, %354 : vector<8x32xi1>, vector<8x32xf32>
    %356 = arith.index_cast %276 : i32 to index
    %c32_157 = arith.constant 32 : index
    %357 = vector.load %arg10[%356, %c32_157] : memref<64x64xf32, #tpu.memory_space<vmem>>, vector<8x32xf32>
    tpu.vector_store %arg10[%356, %c32_157], %355 {strides = array<i32>} : memref<64x64xf32, #tpu.memory_space<vmem>>, vector<8x32xf32>,
    %c4_i32 = arith.constant 4 : i32
    %c7_i32_158 = arith.constant 7 : i32
    %358 = arith.subi %c7_i32_158, %c4_i32 : i32
    %c8_i32_159 = arith.constant 8 : i32
    %359 = arith.muli %c4_i32, %c8_i32_159 : i32
    %360 = tpu.assume_multiple %359, 8 : i32
    %c8_i32_160 = arith.constant 8 : i32
    %361 = arith.muli %358, %c8_i32_160 : i32
    %362 = tpu.assume_multiple %361, 8 : i32
    %c0_161 = arith.constant 0 : index
    %c0_162 = arith.constant 0 : index
    %363 = vector.load %arg11[%c0_161, %c0_162] : memref<8x64xf32, #tpu.memory_space<vmem>>, vector<8x64xf32>
    %c0_163 = arith.constant 0 : index
    %c0_164 = arith.constant 0 : index
    %364 = vector.load %arg5[%c0_163, %c0_164] : memref<64x256xf32, #tpu.memory_space<vmem>>, vector<64x256xf32>
    %cst_165 = arith.constant dense<0.000000e+00> : vector<8x256xf32>
    %365 = tpu.matmul %363, %364, %cst_165 {dimension_numbers = #tpu.dot_dimension_numbers<[1], [0], [0], [1], [0, 0, 1, 1], [], []>} : vector<8x64xf32>, vector<64x256xf32>, vector<8x256xf32> -> vector<8x256xf32>
    %366 = arith.index_cast %360 : i32 to index
    %c0_166 = arith.constant 0 : index
    %367 = vector.load %arg9[%366, %c0_166] : memref<64x256xf32, #tpu.memory_space<vmem>>, vector<8x128xf32>
    %368 = vector.extract_strided_slice %365 {offsets = [0, 0], sizes = [8, 128], strides = [1, 1]} : vector<8x256xf32> to vector<8x128xf32>
    %369 = arith.addf %367, %368 : vector<8x128xf32>
    %370 = vector.extract_strided_slice %369 {offsets = [0, 0], sizes = [8, 96], strides = [1, 1]} : vector<8x128xf32> to vector<8x96xf32>
    %371 = arith.negf %370 : vector<8x96xf32>
    %372 = math.exp %371 : vector<8x96xf32>
    %cst_167 = arith.constant 1.000000e+00 : f32
    %373 = vector.broadcast %cst_167 : f32 to vector<8x96xf32>
    %374 = arith.addf %373, %372 : vector<8x96xf32>
    %375 = arith.divf %373, %374 : vector<8x96xf32>
    %376 = vector.extract_strided_slice %369 {offsets = [0, 96], sizes = [8, 32], strides = [1, 1]} : vector<8x128xf32> to vector<8x32xf32>
    %377 = math.tanh %376 : vector<8x32xf32>
    %378 = vector.extract_strided_slice %375 {offsets = [0, 32], sizes = [8, 32], strides = [1, 1]} : vector<8x96xf32> to vector<8x32xf32>
    %c0_168 = arith.constant 0 : index
    %c0_169 = arith.constant 0 : index
    %379 = vector.load %arg12[%c0_168, %c0_169] : memref<8x32xf32, #tpu.memory_space<vmem>>, vector<8x32xf32>
    %380 = arith.mulf %378, %379 : vector<8x32xf32>
    %381 = vector.extract_strided_slice %375 {offsets = [0, 0], sizes = [8, 32], strides = [1, 1]} : vector<8x96xf32> to vector<8x32xf32>
    %382 = arith.mulf %381, %377 : vector<8x32xf32>
    %383 = arith.addf %380, %382 : vector<8x32xf32>
    %384 = vector.extract_strided_slice %375 {offsets = [0, 64], sizes = [8, 32], strides = [1, 1]} : vector<8x96xf32> to vector<8x32xf32>
    %385 = math.tanh %383 : vector<8x32xf32>
    %386 = arith.mulf %384, %385 : vector<8x32xf32>
    %387 = vector.broadcast %c4_i32 : i32 to vector<8x1xi32>
    %388 = arith.cmpi slt, %387, %13 : vector<8x1xi32>
    %c0_170 = arith.constant 0 : index
    %c0_171 = arith.constant 0 : index
    %389 = vector.load %arg12[%c0_170, %c0_171] : memref<8x32xf32, #tpu.memory_space<vmem>>, vector<8x32xf32>
    %390 = vector.shape_cast %388 : vector<8x1xi1> to vector<8x1xi1>
    %391 = vector.broadcast %390 : vector<8x1xi1> to vector<8x32xi1>
    %392 = arith.select %391, %383, %389 : vector<8x32xi1>, vector<8x32xf32>
    %c0_172 = arith.constant 0 : index
    %c0_173 = arith.constant 0 : index
    %393 = vector.load %arg12[%c0_172, %c0_173] : memref<8x32xf32, #tpu.memory_space<vmem>>, vector<8x32xf32>
    tpu.vector_store %arg12[%c0_172, %c0_173], %392 {strides = array<i32>} : memref<8x32xf32, #tpu.memory_space<vmem>>, vector<8x32xf32>,
    %c0_174 = arith.constant 0 : index
    %c0_175 = arith.constant 0 : index
    %394 = vector.load %arg11[%c0_174, %c0_175] : memref<8x64xf32, #tpu.memory_space<vmem>>, vector<8x32xf32>
    %395 = vector.shape_cast %388 : vector<8x1xi1> to vector<8x1xi1>
    %396 = vector.broadcast %395 : vector<8x1xi1> to vector<8x32xi1>
    %397 = arith.select %396, %386, %394 : vector<8x32xi1>, vector<8x32xf32>
    %c0_176 = arith.constant 0 : index
    %c0_177 = arith.constant 0 : index
    %398 = vector.load %arg11[%c0_176, %c0_177] : memref<8x64xf32, #tpu.memory_space<vmem>>, vector<8x32xf32>
    tpu.vector_store %arg11[%c0_176, %c0_177], %397 {strides = array<i32>} : memref<8x64xf32, #tpu.memory_space<vmem>>, vector<8x32xf32>,
    %cst_178 = arith.constant 0.000000e+00 : f32
    %399 = vector.shape_cast %388 : vector<8x1xi1> to vector<8x1xi1>
    %400 = vector.broadcast %399 : vector<8x1xi1> to vector<8x32xi1>
    %401 = vector.broadcast %cst_178 : f32 to vector<8x32xf32>
    %402 = arith.select %400, %386, %401 : vector<8x32xi1>, vector<8x32xf32>
    %403 = arith.index_cast %360 : i32 to index
    %c0_179 = arith.constant 0 : index
    %404 = vector.load %arg10[%403, %c0_179] : memref<64x64xf32, #tpu.memory_space<vmem>>, vector<8x32xf32>
    tpu.vector_store %arg10[%403, %c0_179], %402 {strides = array<i32>} : memref<64x64xf32, #tpu.memory_space<vmem>>, vector<8x32xf32>,
    %405 = arith.index_cast %362 : i32 to index
    %c128_180 = arith.constant 128 : index
    %406 = vector.load %arg9[%405, %c128_180] : memref<64x256xf32, #tpu.memory_space<vmem>>, vector<8x128xf32>
    %407 = vector.extract_strided_slice %365 {offsets = [0, 128], sizes = [8, 128], strides = [1, 1]} : vector<8x256xf32> to vector<8x128xf32>
    %408 = arith.addf %406, %407 : vector<8x128xf32>
    %409 = vector.extract_strided_slice %408 {offsets = [0, 0], sizes = [8, 96], strides = [1, 1]} : vector<8x128xf32> to vector<8x96xf32>
    %410 = arith.negf %409 : vector<8x96xf32>
    %411 = math.exp %410 : vector<8x96xf32>
    %cst_181 = arith.constant 1.000000e+00 : f32
    %412 = vector.broadcast %cst_181 : f32 to vector<8x96xf32>
    %413 = arith.addf %412, %411 : vector<8x96xf32>
    %414 = arith.divf %412, %413 : vector<8x96xf32>
    %415 = vector.extract_strided_slice %408 {offsets = [0, 96], sizes = [8, 32], strides = [1, 1]} : vector<8x128xf32> to vector<8x32xf32>
    %416 = math.tanh %415 : vector<8x32xf32>
    %417 = vector.extract_strided_slice %414 {offsets = [0, 32], sizes = [8, 32], strides = [1, 1]} : vector<8x96xf32> to vector<8x32xf32>
    %c0_182 = arith.constant 0 : index
    %c0_183 = arith.constant 0 : index
    %418 = vector.load %arg13[%c0_182, %c0_183] : memref<8x32xf32, #tpu.memory_space<vmem>>, vector<8x32xf32>
    %419 = arith.mulf %417, %418 : vector<8x32xf32>
    %420 = vector.extract_strided_slice %414 {offsets = [0, 0], sizes = [8, 32], strides = [1, 1]} : vector<8x96xf32> to vector<8x32xf32>
    %421 = arith.mulf %420, %416 : vector<8x32xf32>
    %422 = arith.addf %419, %421 : vector<8x32xf32>
    %423 = vector.extract_strided_slice %414 {offsets = [0, 64], sizes = [8, 32], strides = [1, 1]} : vector<8x96xf32> to vector<8x32xf32>
    %424 = math.tanh %422 : vector<8x32xf32>
    %425 = arith.mulf %423, %424 : vector<8x32xf32>
    %426 = vector.broadcast %358 : i32 to vector<8x1xi32>
    %427 = arith.cmpi slt, %426, %13 : vector<8x1xi32>
    %c0_184 = arith.constant 0 : index
    %c0_185 = arith.constant 0 : index
    %428 = vector.load %arg13[%c0_184, %c0_185] : memref<8x32xf32, #tpu.memory_space<vmem>>, vector<8x32xf32>
    %429 = vector.shape_cast %427 : vector<8x1xi1> to vector<8x1xi1>
    %430 = vector.broadcast %429 : vector<8x1xi1> to vector<8x32xi1>
    %431 = arith.select %430, %422, %428 : vector<8x32xi1>, vector<8x32xf32>
    %c0_186 = arith.constant 0 : index
    %c0_187 = arith.constant 0 : index
    %432 = vector.load %arg13[%c0_186, %c0_187] : memref<8x32xf32, #tpu.memory_space<vmem>>, vector<8x32xf32>
    tpu.vector_store %arg13[%c0_186, %c0_187], %431 {strides = array<i32>} : memref<8x32xf32, #tpu.memory_space<vmem>>, vector<8x32xf32>,
    %c0_188 = arith.constant 0 : index
    %c32_189 = arith.constant 32 : index
    %433 = vector.load %arg11[%c0_188, %c32_189] : memref<8x64xf32, #tpu.memory_space<vmem>>, vector<8x32xf32>
    %434 = vector.shape_cast %427 : vector<8x1xi1> to vector<8x1xi1>
    %435 = vector.broadcast %434 : vector<8x1xi1> to vector<8x32xi1>
    %436 = arith.select %435, %425, %433 : vector<8x32xi1>, vector<8x32xf32>
    %c0_190 = arith.constant 0 : index
    %c32_191 = arith.constant 32 : index
    %437 = vector.load %arg11[%c0_190, %c32_191] : memref<8x64xf32, #tpu.memory_space<vmem>>, vector<8x32xf32>
    tpu.vector_store %arg11[%c0_190, %c32_191], %436 {strides = array<i32>} : memref<8x64xf32, #tpu.memory_space<vmem>>, vector<8x32xf32>,
    %cst_192 = arith.constant 0.000000e+00 : f32
    %438 = vector.shape_cast %427 : vector<8x1xi1> to vector<8x1xi1>
    %439 = vector.broadcast %438 : vector<8x1xi1> to vector<8x32xi1>
    %440 = vector.broadcast %cst_192 : f32 to vector<8x32xf32>
    %441 = arith.select %439, %425, %440 : vector<8x32xi1>, vector<8x32xf32>
    %442 = arith.index_cast %362 : i32 to index
    %c32_193 = arith.constant 32 : index
    %443 = vector.load %arg10[%442, %c32_193] : memref<64x64xf32, #tpu.memory_space<vmem>>, vector<8x32xf32>
    tpu.vector_store %arg10[%442, %c32_193], %441 {strides = array<i32>} : memref<64x64xf32, #tpu.memory_space<vmem>>, vector<8x32xf32>,
    %c5_i32 = arith.constant 5 : i32
    %c7_i32_194 = arith.constant 7 : i32
    %444 = arith.subi %c7_i32_194, %c5_i32 : i32
    %c8_i32_195 = arith.constant 8 : i32
    %445 = arith.muli %c5_i32, %c8_i32_195 : i32
    %446 = tpu.assume_multiple %445, 8 : i32
    %c8_i32_196 = arith.constant 8 : i32
    %447 = arith.muli %444, %c8_i32_196 : i32
    %448 = tpu.assume_multiple %447, 8 : i32
    %c0_197 = arith.constant 0 : index
    %c0_198 = arith.constant 0 : index
    %449 = vector.load %arg11[%c0_197, %c0_198] : memref<8x64xf32, #tpu.memory_space<vmem>>, vector<8x64xf32>
    %c0_199 = arith.constant 0 : index
    %c0_200 = arith.constant 0 : index
    %450 = vector.load %arg5[%c0_199, %c0_200] : memref<64x256xf32, #tpu.memory_space<vmem>>, vector<64x256xf32>
    %cst_201 = arith.constant dense<0.000000e+00> : vector<8x256xf32>
    %451 = tpu.matmul %449, %450, %cst_201 {dimension_numbers = #tpu.dot_dimension_numbers<[1], [0], [0], [1], [0, 0, 1, 1], [], []>} : vector<8x64xf32>, vector<64x256xf32>, vector<8x256xf32> -> vector<8x256xf32>
    %452 = arith.index_cast %446 : i32 to index
    %c0_202 = arith.constant 0 : index
    %453 = vector.load %arg9[%452, %c0_202] : memref<64x256xf32, #tpu.memory_space<vmem>>, vector<8x128xf32>
    %454 = vector.extract_strided_slice %451 {offsets = [0, 0], sizes = [8, 128], strides = [1, 1]} : vector<8x256xf32> to vector<8x128xf32>
    %455 = arith.addf %453, %454 : vector<8x128xf32>
    %456 = vector.extract_strided_slice %455 {offsets = [0, 0], sizes = [8, 96], strides = [1, 1]} : vector<8x128xf32> to vector<8x96xf32>
    %457 = arith.negf %456 : vector<8x96xf32>
    %458 = math.exp %457 : vector<8x96xf32>
    %cst_203 = arith.constant 1.000000e+00 : f32
    %459 = vector.broadcast %cst_203 : f32 to vector<8x96xf32>
    %460 = arith.addf %459, %458 : vector<8x96xf32>
    %461 = arith.divf %459, %460 : vector<8x96xf32>
    %462 = vector.extract_strided_slice %455 {offsets = [0, 96], sizes = [8, 32], strides = [1, 1]} : vector<8x128xf32> to vector<8x32xf32>
    %463 = math.tanh %462 : vector<8x32xf32>
    %464 = vector.extract_strided_slice %461 {offsets = [0, 32], sizes = [8, 32], strides = [1, 1]} : vector<8x96xf32> to vector<8x32xf32>
    %c0_204 = arith.constant 0 : index
    %c0_205 = arith.constant 0 : index
    %465 = vector.load %arg12[%c0_204, %c0_205] : memref<8x32xf32, #tpu.memory_space<vmem>>, vector<8x32xf32>
    %466 = arith.mulf %464, %465 : vector<8x32xf32>
    %467 = vector.extract_strided_slice %461 {offsets = [0, 0], sizes = [8, 32], strides = [1, 1]} : vector<8x96xf32> to vector<8x32xf32>
    %468 = arith.mulf %467, %463 : vector<8x32xf32>
    %469 = arith.addf %466, %468 : vector<8x32xf32>
    %470 = vector.extract_strided_slice %461 {offsets = [0, 64], sizes = [8, 32], strides = [1, 1]} : vector<8x96xf32> to vector<8x32xf32>
    %471 = math.tanh %469 : vector<8x32xf32>
    %472 = arith.mulf %470, %471 : vector<8x32xf32>
    %473 = vector.broadcast %c5_i32 : i32 to vector<8x1xi32>
    %474 = arith.cmpi slt, %473, %13 : vector<8x1xi32>
    %c0_206 = arith.constant 0 : index
    %c0_207 = arith.constant 0 : index
    %475 = vector.load %arg12[%c0_206, %c0_207] : memref<8x32xf32, #tpu.memory_space<vmem>>, vector<8x32xf32>
    %476 = vector.shape_cast %474 : vector<8x1xi1> to vector<8x1xi1>
    %477 = vector.broadcast %476 : vector<8x1xi1> to vector<8x32xi1>
    %478 = arith.select %477, %469, %475 : vector<8x32xi1>, vector<8x32xf32>
    %c0_208 = arith.constant 0 : index
    %c0_209 = arith.constant 0 : index
    %479 = vector.load %arg12[%c0_208, %c0_209] : memref<8x32xf32, #tpu.memory_space<vmem>>, vector<8x32xf32>
    tpu.vector_store %arg12[%c0_208, %c0_209], %478 {strides = array<i32>} : memref<8x32xf32, #tpu.memory_space<vmem>>, vector<8x32xf32>,
    %c0_210 = arith.constant 0 : index
    %c0_211 = arith.constant 0 : index
    %480 = vector.load %arg11[%c0_210, %c0_211] : memref<8x64xf32, #tpu.memory_space<vmem>>, vector<8x32xf32>
    %481 = vector.shape_cast %474 : vector<8x1xi1> to vector<8x1xi1>
    %482 = vector.broadcast %481 : vector<8x1xi1> to vector<8x32xi1>
    %483 = arith.select %482, %472, %480 : vector<8x32xi1>, vector<8x32xf32>
    %c0_212 = arith.constant 0 : index
    %c0_213 = arith.constant 0 : index
    %484 = vector.load %arg11[%c0_212, %c0_213] : memref<8x64xf32, #tpu.memory_space<vmem>>, vector<8x32xf32>
    tpu.vector_store %arg11[%c0_212, %c0_213], %483 {strides = array<i32>} : memref<8x64xf32, #tpu.memory_space<vmem>>, vector<8x32xf32>,
    %cst_214 = arith.constant 0.000000e+00 : f32
    %485 = vector.shape_cast %474 : vector<8x1xi1> to vector<8x1xi1>
    %486 = vector.broadcast %485 : vector<8x1xi1> to vector<8x32xi1>
    %487 = vector.broadcast %cst_214 : f32 to vector<8x32xf32>
    %488 = arith.select %486, %472, %487 : vector<8x32xi1>, vector<8x32xf32>
    %489 = arith.index_cast %446 : i32 to index
    %c0_215 = arith.constant 0 : index
    %490 = vector.load %arg10[%489, %c0_215] : memref<64x64xf32, #tpu.memory_space<vmem>>, vector<8x32xf32>
    tpu.vector_store %arg10[%489, %c0_215], %488 {strides = array<i32>} : memref<64x64xf32, #tpu.memory_space<vmem>>, vector<8x32xf32>,
    %491 = arith.index_cast %448 : i32 to index
    %c128_216 = arith.constant 128 : index
    %492 = vector.load %arg9[%491, %c128_216] : memref<64x256xf32, #tpu.memory_space<vmem>>, vector<8x128xf32>
    %493 = vector.extract_strided_slice %451 {offsets = [0, 128], sizes = [8, 128], strides = [1, 1]} : vector<8x256xf32> to vector<8x128xf32>
    %494 = arith.addf %492, %493 : vector<8x128xf32>
    %495 = vector.extract_strided_slice %494 {offsets = [0, 0], sizes = [8, 96], strides = [1, 1]} : vector<8x128xf32> to vector<8x96xf32>
    %496 = arith.negf %495 : vector<8x96xf32>
    %497 = math.exp %496 : vector<8x96xf32>
    %cst_217 = arith.constant 1.000000e+00 : f32
    %498 = vector.broadcast %cst_217 : f32 to vector<8x96xf32>
    %499 = arith.addf %498, %497 : vector<8x96xf32>
    %500 = arith.divf %498, %499 : vector<8x96xf32>
    %501 = vector.extract_strided_slice %494 {offsets = [0, 96], sizes = [8, 32], strides = [1, 1]} : vector<8x128xf32> to vector<8x32xf32>
    %502 = math.tanh %501 : vector<8x32xf32>
    %503 = vector.extract_strided_slice %500 {offsets = [0, 32], sizes = [8, 32], strides = [1, 1]} : vector<8x96xf32> to vector<8x32xf32>
    %c0_218 = arith.constant 0 : index
    %c0_219 = arith.constant 0 : index
    %504 = vector.load %arg13[%c0_218, %c0_219] : memref<8x32xf32, #tpu.memory_space<vmem>>, vector<8x32xf32>
    %505 = arith.mulf %503, %504 : vector<8x32xf32>
    %506 = vector.extract_strided_slice %500 {offsets = [0, 0], sizes = [8, 32], strides = [1, 1]} : vector<8x96xf32> to vector<8x32xf32>
    %507 = arith.mulf %506, %502 : vector<8x32xf32>
    %508 = arith.addf %505, %507 : vector<8x32xf32>
    %509 = vector.extract_strided_slice %500 {offsets = [0, 64], sizes = [8, 32], strides = [1, 1]} : vector<8x96xf32> to vector<8x32xf32>
    %510 = math.tanh %508 : vector<8x32xf32>
    %511 = arith.mulf %509, %510 : vector<8x32xf32>
    %512 = vector.broadcast %444 : i32 to vector<8x1xi32>
    %513 = arith.cmpi slt, %512, %13 : vector<8x1xi32>
    %c0_220 = arith.constant 0 : index
    %c0_221 = arith.constant 0 : index
    %514 = vector.load %arg13[%c0_220, %c0_221] : memref<8x32xf32, #tpu.memory_space<vmem>>, vector<8x32xf32>
    %515 = vector.shape_cast %513 : vector<8x1xi1> to vector<8x1xi1>
    %516 = vector.broadcast %515 : vector<8x1xi1> to vector<8x32xi1>
    %517 = arith.select %516, %508, %514 : vector<8x32xi1>, vector<8x32xf32>
    %c0_222 = arith.constant 0 : index
    %c0_223 = arith.constant 0 : index
    %518 = vector.load %arg13[%c0_222, %c0_223] : memref<8x32xf32, #tpu.memory_space<vmem>>, vector<8x32xf32>
    tpu.vector_store %arg13[%c0_222, %c0_223], %517 {strides = array<i32>} : memref<8x32xf32, #tpu.memory_space<vmem>>, vector<8x32xf32>,
    %c0_224 = arith.constant 0 : index
    %c32_225 = arith.constant 32 : index
    %519 = vector.load %arg11[%c0_224, %c32_225] : memref<8x64xf32, #tpu.memory_space<vmem>>, vector<8x32xf32>
    %520 = vector.shape_cast %513 : vector<8x1xi1> to vector<8x1xi1>
    %521 = vector.broadcast %520 : vector<8x1xi1> to vector<8x32xi1>
    %522 = arith.select %521, %511, %519 : vector<8x32xi1>, vector<8x32xf32>
    %c0_226 = arith.constant 0 : index
    %c32_227 = arith.constant 32 : index
    %523 = vector.load %arg11[%c0_226, %c32_227] : memref<8x64xf32, #tpu.memory_space<vmem>>, vector<8x32xf32>
    tpu.vector_store %arg11[%c0_226, %c32_227], %522 {strides = array<i32>} : memref<8x64xf32, #tpu.memory_space<vmem>>, vector<8x32xf32>,
    %cst_228 = arith.constant 0.000000e+00 : f32
    %524 = vector.shape_cast %513 : vector<8x1xi1> to vector<8x1xi1>
    %525 = vector.broadcast %524 : vector<8x1xi1> to vector<8x32xi1>
    %526 = vector.broadcast %cst_228 : f32 to vector<8x32xf32>
    %527 = arith.select %525, %511, %526 : vector<8x32xi1>, vector<8x32xf32>
    %528 = arith.index_cast %448 : i32 to index
    %c32_229 = arith.constant 32 : index
    %529 = vector.load %arg10[%528, %c32_229] : memref<64x64xf32, #tpu.memory_space<vmem>>, vector<8x32xf32>
    tpu.vector_store %arg10[%528, %c32_229], %527 {strides = array<i32>} : memref<64x64xf32, #tpu.memory_space<vmem>>, vector<8x32xf32>,
    %c6_i32 = arith.constant 6 : i32
    %c7_i32_230 = arith.constant 7 : i32
    %530 = arith.subi %c7_i32_230, %c6_i32 : i32
    %c8_i32_231 = arith.constant 8 : i32
    %531 = arith.muli %c6_i32, %c8_i32_231 : i32
    %532 = tpu.assume_multiple %531, 8 : i32
    %c8_i32_232 = arith.constant 8 : i32
    %533 = arith.muli %530, %c8_i32_232 : i32
    %534 = tpu.assume_multiple %533, 8 : i32
    %c0_233 = arith.constant 0 : index
    %c0_234 = arith.constant 0 : index
    %535 = vector.load %arg11[%c0_233, %c0_234] : memref<8x64xf32, #tpu.memory_space<vmem>>, vector<8x64xf32>
    %c0_235 = arith.constant 0 : index
    %c0_236 = arith.constant 0 : index
    %536 = vector.load %arg5[%c0_235, %c0_236] : memref<64x256xf32, #tpu.memory_space<vmem>>, vector<64x256xf32>
    %cst_237 = arith.constant dense<0.000000e+00> : vector<8x256xf32>
    %537 = tpu.matmul %535, %536, %cst_237 {dimension_numbers = #tpu.dot_dimension_numbers<[1], [0], [0], [1], [0, 0, 1, 1], [], []>} : vector<8x64xf32>, vector<64x256xf32>, vector<8x256xf32> -> vector<8x256xf32>
    %538 = arith.index_cast %532 : i32 to index
    %c0_238 = arith.constant 0 : index
    %539 = vector.load %arg9[%538, %c0_238] : memref<64x256xf32, #tpu.memory_space<vmem>>, vector<8x128xf32>
    %540 = vector.extract_strided_slice %537 {offsets = [0, 0], sizes = [8, 128], strides = [1, 1]} : vector<8x256xf32> to vector<8x128xf32>
    %541 = arith.addf %539, %540 : vector<8x128xf32>
    %542 = vector.extract_strided_slice %541 {offsets = [0, 0], sizes = [8, 96], strides = [1, 1]} : vector<8x128xf32> to vector<8x96xf32>
    %543 = arith.negf %542 : vector<8x96xf32>
    %544 = math.exp %543 : vector<8x96xf32>
    %cst_239 = arith.constant 1.000000e+00 : f32
    %545 = vector.broadcast %cst_239 : f32 to vector<8x96xf32>
    %546 = arith.addf %545, %544 : vector<8x96xf32>
    %547 = arith.divf %545, %546 : vector<8x96xf32>
    %548 = vector.extract_strided_slice %541 {offsets = [0, 96], sizes = [8, 32], strides = [1, 1]} : vector<8x128xf32> to vector<8x32xf32>
    %549 = math.tanh %548 : vector<8x32xf32>
    %550 = vector.extract_strided_slice %547 {offsets = [0, 32], sizes = [8, 32], strides = [1, 1]} : vector<8x96xf32> to vector<8x32xf32>
    %c0_240 = arith.constant 0 : index
    %c0_241 = arith.constant 0 : index
    %551 = vector.load %arg12[%c0_240, %c0_241] : memref<8x32xf32, #tpu.memory_space<vmem>>, vector<8x32xf32>
    %552 = arith.mulf %550, %551 : vector<8x32xf32>
    %553 = vector.extract_strided_slice %547 {offsets = [0, 0], sizes = [8, 32], strides = [1, 1]} : vector<8x96xf32> to vector<8x32xf32>
    %554 = arith.mulf %553, %549 : vector<8x32xf32>
    %555 = arith.addf %552, %554 : vector<8x32xf32>
    %556 = vector.extract_strided_slice %547 {offsets = [0, 64], sizes = [8, 32], strides = [1, 1]} : vector<8x96xf32> to vector<8x32xf32>
    %557 = math.tanh %555 : vector<8x32xf32>
    %558 = arith.mulf %556, %557 : vector<8x32xf32>
    %559 = vector.broadcast %c6_i32 : i32 to vector<8x1xi32>
    %560 = arith.cmpi slt, %559, %13 : vector<8x1xi32>
    %c0_242 = arith.constant 0 : index
    %c0_243 = arith.constant 0 : index
    %561 = vector.load %arg12[%c0_242, %c0_243] : memref<8x32xf32, #tpu.memory_space<vmem>>, vector<8x32xf32>
    %562 = vector.shape_cast %560 : vector<8x1xi1> to vector<8x1xi1>
    %563 = vector.broadcast %562 : vector<8x1xi1> to vector<8x32xi1>
    %564 = arith.select %563, %555, %561 : vector<8x32xi1>, vector<8x32xf32>
    %c0_244 = arith.constant 0 : index
    %c0_245 = arith.constant 0 : index
    %565 = vector.load %arg12[%c0_244, %c0_245] : memref<8x32xf32, #tpu.memory_space<vmem>>, vector<8x32xf32>
    tpu.vector_store %arg12[%c0_244, %c0_245], %564 {strides = array<i32>} : memref<8x32xf32, #tpu.memory_space<vmem>>, vector<8x32xf32>,
    %c0_246 = arith.constant 0 : index
    %c0_247 = arith.constant 0 : index
    %566 = vector.load %arg11[%c0_246, %c0_247] : memref<8x64xf32, #tpu.memory_space<vmem>>, vector<8x32xf32>
    %567 = vector.shape_cast %560 : vector<8x1xi1> to vector<8x1xi1>
    %568 = vector.broadcast %567 : vector<8x1xi1> to vector<8x32xi1>
    %569 = arith.select %568, %558, %566 : vector<8x32xi1>, vector<8x32xf32>
    %c0_248 = arith.constant 0 : index
    %c0_249 = arith.constant 0 : index
    %570 = vector.load %arg11[%c0_248, %c0_249] : memref<8x64xf32, #tpu.memory_space<vmem>>, vector<8x32xf32>
    tpu.vector_store %arg11[%c0_248, %c0_249], %569 {strides = array<i32>} : memref<8x64xf32, #tpu.memory_space<vmem>>, vector<8x32xf32>,
    %cst_250 = arith.constant 0.000000e+00 : f32
    %571 = vector.shape_cast %560 : vector<8x1xi1> to vector<8x1xi1>
    %572 = vector.broadcast %571 : vector<8x1xi1> to vector<8x32xi1>
    %573 = vector.broadcast %cst_250 : f32 to vector<8x32xf32>
    %574 = arith.select %572, %558, %573 : vector<8x32xi1>, vector<8x32xf32>
    %575 = arith.index_cast %532 : i32 to index
    %c0_251 = arith.constant 0 : index
    %576 = vector.load %arg10[%575, %c0_251] : memref<64x64xf32, #tpu.memory_space<vmem>>, vector<8x32xf32>
    tpu.vector_store %arg10[%575, %c0_251], %574 {strides = array<i32>} : memref<64x64xf32, #tpu.memory_space<vmem>>, vector<8x32xf32>,
    %577 = arith.index_cast %534 : i32 to index
    %c128_252 = arith.constant 128 : index
    %578 = vector.load %arg9[%577, %c128_252] : memref<64x256xf32, #tpu.memory_space<vmem>>, vector<8x128xf32>
    %579 = vector.extract_strided_slice %537 {offsets = [0, 128], sizes = [8, 128], strides = [1, 1]} : vector<8x256xf32> to vector<8x128xf32>
    %580 = arith.addf %578, %579 : vector<8x128xf32>
    %581 = vector.extract_strided_slice %580 {offsets = [0, 0], sizes = [8, 96], strides = [1, 1]} : vector<8x128xf32> to vector<8x96xf32>
    %582 = arith.negf %581 : vector<8x96xf32>
    %583 = math.exp %582 : vector<8x96xf32>
    %cst_253 = arith.constant 1.000000e+00 : f32
    %584 = vector.broadcast %cst_253 : f32 to vector<8x96xf32>
    %585 = arith.addf %584, %583 : vector<8x96xf32>
    %586 = arith.divf %584, %585 : vector<8x96xf32>
    %587 = vector.extract_strided_slice %580 {offsets = [0, 96], sizes = [8, 32], strides = [1, 1]} : vector<8x128xf32> to vector<8x32xf32>
    %588 = math.tanh %587 : vector<8x32xf32>
    %589 = vector.extract_strided_slice %586 {offsets = [0, 32], sizes = [8, 32], strides = [1, 1]} : vector<8x96xf32> to vector<8x32xf32>
    %c0_254 = arith.constant 0 : index
    %c0_255 = arith.constant 0 : index
    %590 = vector.load %arg13[%c0_254, %c0_255] : memref<8x32xf32, #tpu.memory_space<vmem>>, vector<8x32xf32>
    %591 = arith.mulf %589, %590 : vector<8x32xf32>
    %592 = vector.extract_strided_slice %586 {offsets = [0, 0], sizes = [8, 32], strides = [1, 1]} : vector<8x96xf32> to vector<8x32xf32>
    %593 = arith.mulf %592, %588 : vector<8x32xf32>
    %594 = arith.addf %591, %593 : vector<8x32xf32>
    %595 = vector.extract_strided_slice %586 {offsets = [0, 64], sizes = [8, 32], strides = [1, 1]} : vector<8x96xf32> to vector<8x32xf32>
    %596 = math.tanh %594 : vector<8x32xf32>
    %597 = arith.mulf %595, %596 : vector<8x32xf32>
    %598 = vector.broadcast %530 : i32 to vector<8x1xi32>
    %599 = arith.cmpi slt, %598, %13 : vector<8x1xi32>
    %c0_256 = arith.constant 0 : index
    %c0_257 = arith.constant 0 : index
    %600 = vector.load %arg13[%c0_256, %c0_257] : memref<8x32xf32, #tpu.memory_space<vmem>>, vector<8x32xf32>
    %601 = vector.shape_cast %599 : vector<8x1xi1> to vector<8x1xi1>
    %602 = vector.broadcast %601 : vector<8x1xi1> to vector<8x32xi1>
    %603 = arith.select %602, %594, %600 : vector<8x32xi1>, vector<8x32xf32>
    %c0_258 = arith.constant 0 : index
    %c0_259 = arith.constant 0 : index
    %604 = vector.load %arg13[%c0_258, %c0_259] : memref<8x32xf32, #tpu.memory_space<vmem>>, vector<8x32xf32>
    tpu.vector_store %arg13[%c0_258, %c0_259], %603 {strides = array<i32>} : memref<8x32xf32, #tpu.memory_space<vmem>>, vector<8x32xf32>,
    %c0_260 = arith.constant 0 : index
    %c32_261 = arith.constant 32 : index
    %605 = vector.load %arg11[%c0_260, %c32_261] : memref<8x64xf32, #tpu.memory_space<vmem>>, vector<8x32xf32>
    %606 = vector.shape_cast %599 : vector<8x1xi1> to vector<8x1xi1>
    %607 = vector.broadcast %606 : vector<8x1xi1> to vector<8x32xi1>
    %608 = arith.select %607, %597, %605 : vector<8x32xi1>, vector<8x32xf32>
    %c0_262 = arith.constant 0 : index
    %c32_263 = arith.constant 32 : index
    %609 = vector.load %arg11[%c0_262, %c32_263] : memref<8x64xf32, #tpu.memory_space<vmem>>, vector<8x32xf32>
    tpu.vector_store %arg11[%c0_262, %c32_263], %608 {strides = array<i32>} : memref<8x64xf32, #tpu.memory_space<vmem>>, vector<8x32xf32>,
    %cst_264 = arith.constant 0.000000e+00 : f32
    %610 = vector.shape_cast %599 : vector<8x1xi1> to vector<8x1xi1>
    %611 = vector.broadcast %610 : vector<8x1xi1> to vector<8x32xi1>
    %612 = vector.broadcast %cst_264 : f32 to vector<8x32xf32>
    %613 = arith.select %611, %597, %612 : vector<8x32xi1>, vector<8x32xf32>
    %614 = arith.index_cast %534 : i32 to index
    %c32_265 = arith.constant 32 : index
    %615 = vector.load %arg10[%614, %c32_265] : memref<64x64xf32, #tpu.memory_space<vmem>>, vector<8x32xf32>
    tpu.vector_store %arg10[%614, %c32_265], %613 {strides = array<i32>} : memref<64x64xf32, #tpu.memory_space<vmem>>, vector<8x32xf32>,
    %c7_i32_266 = arith.constant 7 : i32
    %c7_i32_267 = arith.constant 7 : i32
    %616 = arith.subi %c7_i32_267, %c7_i32_266 : i32
    %c8_i32_268 = arith.constant 8 : i32
    %617 = arith.muli %c7_i32_266, %c8_i32_268 : i32
    %618 = tpu.assume_multiple %617, 8 : i32
    %c8_i32_269 = arith.constant 8 : i32
    %619 = arith.muli %616, %c8_i32_269 : i32
    %620 = tpu.assume_multiple %619, 8 : i32
    %c0_270 = arith.constant 0 : index
    %c0_271 = arith.constant 0 : index
    %621 = vector.load %arg11[%c0_270, %c0_271] : memref<8x64xf32, #tpu.memory_space<vmem>>, vector<8x64xf32>
    %c0_272 = arith.constant 0 : index
    %c0_273 = arith.constant 0 : index
    %622 = vector.load %arg5[%c0_272, %c0_273] : memref<64x256xf32, #tpu.memory_space<vmem>>, vector<64x256xf32>
    %cst_274 = arith.constant dense<0.000000e+00> : vector<8x256xf32>
    %623 = tpu.matmul %621, %622, %cst_274 {dimension_numbers = #tpu.dot_dimension_numbers<[1], [0], [0], [1], [0, 0, 1, 1], [], []>} : vector<8x64xf32>, vector<64x256xf32>, vector<8x256xf32> -> vector<8x256xf32>
    %624 = arith.index_cast %618 : i32 to index
    %c0_275 = arith.constant 0 : index
    %625 = vector.load %arg9[%624, %c0_275] : memref<64x256xf32, #tpu.memory_space<vmem>>, vector<8x128xf32>
    %626 = vector.extract_strided_slice %623 {offsets = [0, 0], sizes = [8, 128], strides = [1, 1]} : vector<8x256xf32> to vector<8x128xf32>
    %627 = arith.addf %625, %626 : vector<8x128xf32>
    %628 = vector.extract_strided_slice %627 {offsets = [0, 0], sizes = [8, 96], strides = [1, 1]} : vector<8x128xf32> to vector<8x96xf32>
    %629 = arith.negf %628 : vector<8x96xf32>
    %630 = math.exp %629 : vector<8x96xf32>
    %cst_276 = arith.constant 1.000000e+00 : f32
    %631 = vector.broadcast %cst_276 : f32 to vector<8x96xf32>
    %632 = arith.addf %631, %630 : vector<8x96xf32>
    %633 = arith.divf %631, %632 : vector<8x96xf32>
    %634 = vector.extract_strided_slice %627 {offsets = [0, 96], sizes = [8, 32], strides = [1, 1]} : vector<8x128xf32> to vector<8x32xf32>
    %635 = math.tanh %634 : vector<8x32xf32>
    %636 = vector.extract_strided_slice %633 {offsets = [0, 32], sizes = [8, 32], strides = [1, 1]} : vector<8x96xf32> to vector<8x32xf32>
    %c0_277 = arith.constant 0 : index
    %c0_278 = arith.constant 0 : index
    %637 = vector.load %arg12[%c0_277, %c0_278] : memref<8x32xf32, #tpu.memory_space<vmem>>, vector<8x32xf32>
    %638 = arith.mulf %636, %637 : vector<8x32xf32>
    %639 = vector.extract_strided_slice %633 {offsets = [0, 0], sizes = [8, 32], strides = [1, 1]} : vector<8x96xf32> to vector<8x32xf32>
    %640 = arith.mulf %639, %635 : vector<8x32xf32>
    %641 = arith.addf %638, %640 : vector<8x32xf32>
    %642 = vector.extract_strided_slice %633 {offsets = [0, 64], sizes = [8, 32], strides = [1, 1]} : vector<8x96xf32> to vector<8x32xf32>
    %643 = math.tanh %641 : vector<8x32xf32>
    %644 = arith.mulf %642, %643 : vector<8x32xf32>
    %645 = vector.broadcast %c7_i32_266 : i32 to vector<8x1xi32>
    %646 = arith.cmpi slt, %645, %13 : vector<8x1xi32>
    %c0_279 = arith.constant 0 : index
    %c0_280 = arith.constant 0 : index
    %647 = vector.load %arg12[%c0_279, %c0_280] : memref<8x32xf32, #tpu.memory_space<vmem>>, vector<8x32xf32>
    %648 = vector.shape_cast %646 : vector<8x1xi1> to vector<8x1xi1>
    %649 = vector.broadcast %648 : vector<8x1xi1> to vector<8x32xi1>
    %650 = arith.select %649, %641, %647 : vector<8x32xi1>, vector<8x32xf32>
    %c0_281 = arith.constant 0 : index
    %c0_282 = arith.constant 0 : index
    %651 = vector.load %arg12[%c0_281, %c0_282] : memref<8x32xf32, #tpu.memory_space<vmem>>, vector<8x32xf32>
    tpu.vector_store %arg12[%c0_281, %c0_282], %650 {strides = array<i32>} : memref<8x32xf32, #tpu.memory_space<vmem>>, vector<8x32xf32>,
    %c0_283 = arith.constant 0 : index
    %c0_284 = arith.constant 0 : index
    %652 = vector.load %arg11[%c0_283, %c0_284] : memref<8x64xf32, #tpu.memory_space<vmem>>, vector<8x32xf32>
    %653 = vector.shape_cast %646 : vector<8x1xi1> to vector<8x1xi1>
    %654 = vector.broadcast %653 : vector<8x1xi1> to vector<8x32xi1>
    %655 = arith.select %654, %644, %652 : vector<8x32xi1>, vector<8x32xf32>
    %c0_285 = arith.constant 0 : index
    %c0_286 = arith.constant 0 : index
    %656 = vector.load %arg11[%c0_285, %c0_286] : memref<8x64xf32, #tpu.memory_space<vmem>>, vector<8x32xf32>
    tpu.vector_store %arg11[%c0_285, %c0_286], %655 {strides = array<i32>} : memref<8x64xf32, #tpu.memory_space<vmem>>, vector<8x32xf32>,
    %cst_287 = arith.constant 0.000000e+00 : f32
    %657 = vector.shape_cast %646 : vector<8x1xi1> to vector<8x1xi1>
    %658 = vector.broadcast %657 : vector<8x1xi1> to vector<8x32xi1>
    %659 = vector.broadcast %cst_287 : f32 to vector<8x32xf32>
    %660 = arith.select %658, %644, %659 : vector<8x32xi1>, vector<8x32xf32>
    %661 = arith.index_cast %618 : i32 to index
    %c0_288 = arith.constant 0 : index
    %662 = vector.load %arg10[%661, %c0_288] : memref<64x64xf32, #tpu.memory_space<vmem>>, vector<8x32xf32>
    tpu.vector_store %arg10[%661, %c0_288], %660 {strides = array<i32>} : memref<64x64xf32, #tpu.memory_space<vmem>>, vector<8x32xf32>,
    %663 = arith.index_cast %620 : i32 to index
    %c128_289 = arith.constant 128 : index
    %664 = vector.load %arg9[%663, %c128_289] : memref<64x256xf32, #tpu.memory_space<vmem>>, vector<8x128xf32>
    %665 = vector.extract_strided_slice %623 {offsets = [0, 128], sizes = [8, 128], strides = [1, 1]} : vector<8x256xf32> to vector<8x128xf32>
    %666 = arith.addf %664, %665 : vector<8x128xf32>
    %667 = vector.extract_strided_slice %666 {offsets = [0, 0], sizes = [8, 96], strides = [1, 1]} : vector<8x128xf32> to vector<8x96xf32>
    %668 = arith.negf %667 : vector<8x96xf32>
    %669 = math.exp %668 : vector<8x96xf32>
    %cst_290 = arith.constant 1.000000e+00 : f32
    %670 = vector.broadcast %cst_290 : f32 to vector<8x96xf32>
    %671 = arith.addf %670, %669 : vector<8x96xf32>
    %672 = arith.divf %670, %671 : vector<8x96xf32>
    %673 = vector.extract_strided_slice %666 {offsets = [0, 96], sizes = [8, 32], strides = [1, 1]} : vector<8x128xf32> to vector<8x32xf32>
    %674 = math.tanh %673 : vector<8x32xf32>
    %675 = vector.extract_strided_slice %672 {offsets = [0, 32], sizes = [8, 32], strides = [1, 1]} : vector<8x96xf32> to vector<8x32xf32>
    %c0_291 = arith.constant 0 : index
    %c0_292 = arith.constant 0 : index
    %676 = vector.load %arg13[%c0_291, %c0_292] : memref<8x32xf32, #tpu.memory_space<vmem>>, vector<8x32xf32>
    %677 = arith.mulf %675, %676 : vector<8x32xf32>
    %678 = vector.extract_strided_slice %672 {offsets = [0, 0], sizes = [8, 32], strides = [1, 1]} : vector<8x96xf32> to vector<8x32xf32>
    %679 = arith.mulf %678, %674 : vector<8x32xf32>
    %680 = arith.addf %677, %679 : vector<8x32xf32>
    %681 = vector.extract_strided_slice %672 {offsets = [0, 64], sizes = [8, 32], strides = [1, 1]} : vector<8x96xf32> to vector<8x32xf32>
    %682 = math.tanh %680 : vector<8x32xf32>
    %683 = arith.mulf %681, %682 : vector<8x32xf32>
    %684 = vector.broadcast %616 : i32 to vector<8x1xi32>
    %685 = arith.cmpi slt, %684, %13 : vector<8x1xi32>
    %c0_293 = arith.constant 0 : index
    %c0_294 = arith.constant 0 : index
    %686 = vector.load %arg13[%c0_293, %c0_294] : memref<8x32xf32, #tpu.memory_space<vmem>>, vector<8x32xf32>
    %687 = vector.shape_cast %685 : vector<8x1xi1> to vector<8x1xi1>
    %688 = vector.broadcast %687 : vector<8x1xi1> to vector<8x32xi1>
    %689 = arith.select %688, %680, %686 : vector<8x32xi1>, vector<8x32xf32>
    %c0_295 = arith.constant 0 : index
    %c0_296 = arith.constant 0 : index
    %690 = vector.load %arg13[%c0_295, %c0_296] : memref<8x32xf32, #tpu.memory_space<vmem>>, vector<8x32xf32>
    tpu.vector_store %arg13[%c0_295, %c0_296], %689 {strides = array<i32>} : memref<8x32xf32, #tpu.memory_space<vmem>>, vector<8x32xf32>,
    %c0_297 = arith.constant 0 : index
    %c32_298 = arith.constant 32 : index
    %691 = vector.load %arg11[%c0_297, %c32_298] : memref<8x64xf32, #tpu.memory_space<vmem>>, vector<8x32xf32>
    %692 = vector.shape_cast %685 : vector<8x1xi1> to vector<8x1xi1>
    %693 = vector.broadcast %692 : vector<8x1xi1> to vector<8x32xi1>
    %694 = arith.select %693, %683, %691 : vector<8x32xi1>, vector<8x32xf32>
    %c0_299 = arith.constant 0 : index
    %c32_300 = arith.constant 32 : index
    %695 = vector.load %arg11[%c0_299, %c32_300] : memref<8x64xf32, #tpu.memory_space<vmem>>, vector<8x32xf32>
    tpu.vector_store %arg11[%c0_299, %c32_300], %694 {strides = array<i32>} : memref<8x64xf32, #tpu.memory_space<vmem>>, vector<8x32xf32>,
    %cst_301 = arith.constant 0.000000e+00 : f32
    %696 = vector.shape_cast %685 : vector<8x1xi1> to vector<8x1xi1>
    %697 = vector.broadcast %696 : vector<8x1xi1> to vector<8x32xi1>
    %698 = vector.broadcast %cst_301 : f32 to vector<8x32xf32>
    %699 = arith.select %697, %683, %698 : vector<8x32xi1>, vector<8x32xf32>
    %700 = arith.index_cast %620 : i32 to index
    %c32_302 = arith.constant 32 : index
    %701 = vector.load %arg10[%700, %c32_302] : memref<64x64xf32, #tpu.memory_space<vmem>>, vector<8x32xf32>
    tpu.vector_store %arg10[%700, %c32_302], %699 {strides = array<i32>} : memref<64x64xf32, #tpu.memory_space<vmem>>, vector<8x32xf32>,
    %c8_i32_303 = arith.constant 8 : i32
    %c0_304 = arith.constant 0 : index
    %c0_305 = arith.constant 0 : index
    %702 = vector.load %arg10[%c0_304, %c0_305] : memref<64x64xf32, #tpu.memory_space<vmem>>, vector<64x64xf32>
    %c0_306 = arith.constant 0 : index
    %c0_307 = arith.constant 0 : index
    %703 = vector.load %arg6[%c0_306, %c0_307] : memref<64x128xf32, #tpu.memory_space<vmem>>, vector<64x128xf32>
    %cst_308 = arith.constant dense<0.000000e+00> : vector<64x128xf32>
    %704 = tpu.matmul %702, %703, %cst_308 {dimension_numbers = #tpu.dot_dimension_numbers<[1], [0], [0], [1], [0, 0, 1, 1], [], []>} : vector<64x64xf32>, vector<64x128xf32>, vector<64x128xf32> -> vector<64x128xf32>
    %c0_309 = arith.constant 0 : index
    %c0_310 = arith.constant 0 : index
    %705 = vector.load %arg7[%c0_309, %c0_310] : memref<1x128xf32, #tpu.memory_space<vmem>>, vector<1x128xf32>
    %706 = vector.broadcast %705 : vector<1x128xf32> to vector<64x128xf32>
    %707 = arith.addf %704, %706 : vector<64x128xf32>
    %c0_311 = arith.constant 0 : index
    %c0_312 = arith.constant 0 : index
    %708 = vector.load %arg8[%c0_311, %c0_312] : memref<64x128xf32, #tpu.memory_space<vmem>>, vector<64x128xf32>
    tpu.vector_store %arg8[%c0_311, %c0_312], %707 {strides = array<i32>} : memref<64x128xf32, #tpu.memory_space<vmem>>, vector<64x128xf32>,
    return
  }
  func.func @transform_0(%arg0: i32) -> (i32, i32) {
    %c0_i32 = arith.constant 0 : i32
    %c0_i32_0 = arith.constant 0 : i32
    %c0_i32_1 = arith.constant 0 : i32
    return %c0_i32, %c0_i32_0 : i32, i32
  }
  func.func @transform_1(%arg0: i32) -> (i32, i32) {
    %c0_i32 = arith.constant 0 : i32
    %c0_i32_0 = arith.constant 0 : i32
    %c0_i32_1 = arith.constant 0 : i32
    return %c0_i32, %c0_i32_0 : i32, i32
  }
  func.func @transform_2(%arg0: i32) -> (i32, i32) {
    %c0_i32 = arith.constant 0 : i32
    %c0_i32_0 = arith.constant 0 : i32
    %c0_i32_1 = arith.constant 0 : i32
    return %c0_i32, %c0_i32_0 : i32, i32
  }
  func.func @transform_3(%arg0: i32) -> (i32, i32) {
    %c0_i32 = arith.constant 0 : i32
    %c0_i32_0 = arith.constant 0 : i32
    %c0_i32_1 = arith.constant 0 : i32
    return %c0_i32, %c0_i32_0 : i32, i32
  }
  func.func @transform_4(%arg0: i32) -> (i32, i32) {
    %c0_i32 = arith.constant 0 : i32
    %c0_i32_0 = arith.constant 0 : i32
    %c0_i32_1 = arith.constant 0 : i32
    return %c0_i32, %c0_i32_0 : i32, i32
  }
  func.func @transform_5(%arg0: i32) -> (i32, i32) {
    %c0_i32 = arith.constant 0 : i32
    %c0_i32_0 = arith.constant 0 : i32
    %c0_i32_1 = arith.constant 0 : i32
    return %c0_i32, %c0_i32_0 : i32, i32
  }
  func.func @transform_6(%arg0: i32) -> (i32, i32) {
    %c0_i32 = arith.constant 0 : i32
    %c0_i32_0 = arith.constant 0 : i32
    %c0_i32_1 = arith.constant 0 : i32
    return %c0_i32, %c0_i32_0 : i32, i32
  }
  func.func @transform_7(%arg0: i32) -> (i32, i32) {
    %c0_i32 = arith.constant 0 : i32
    %c0_i32_0 = arith.constant 0 : i32
    %c0_i32_1 = arith.constant 0 : i32
    return %c0_i32, %c0_i32_0 : i32, i32
  }
}

</mosaic_0001>

<bundles_post_ra>
// kernel: bilstm_crf_forward.1
= control target key start
LH: loop header
LB: loop body
LE: loop exit
PB: predicated region body
PF: predicated region fallthrough
CT: control target
= control target key end

     0   :  { %vm204_vm0 = vcmask 523264   ;;  %v2277_v3 = vmov 0.0   ;;  %vm50_vm1 = vcmask 130048   ;;  %vm206_vm2 = vcmask 261120   ;;  %s2281_s30 = smov 96   ;;  %s3195_s2 = inlined_call_operand.vmem [shape: f32[16,256], index: 2, kind: input, shape index: {}]   ;;  %s3196_s0 = inlined_call_operand.vmem [shape: f32[64,16], index: 0, kind: input, shape index: {}]   ;;  %s3197_s4 = inlined_call_operand.vmem [shape: f32[64,256], index: 4, kind: input, shape index: {}]   ;;  %s3198_s3 = inlined_call_operand.vmem [shape: f32[1,256], index: 3, kind: input, shape index: {}]   ;;  %s3199_s1 = inlined_call_operand.vmem [shape: s32[8,1], index: 1, kind: input, shape index: {}]   ;;  %s3200_s5 = inlined_call_operand.vmem [shape: f32[64,128], index: 5, kind: input, shape index: {}]   ;;  %s3201_s6 = inlined_call_operand.vmem [shape: f32[1,128], index: 6, kind: input, shape index: {}]   ;;  %s3202_s7 = inlined_call_operand.vmem [shape: f32[64,128], index: 7, kind: output, shape index: {}]  }
   0x1   :  { %v37_v0 = vld [vmem:[%s3195_s2 + $0x18] sm:$0xff]  ;;  %v36_v1 = vld [vmem:[%s3195_s2 + $0x10] sm:$0xff]  ;;  %v35_v2 = vld [vmem:[%s3195_s2 + $0x8] sm:$0xff]  ;;  %163 = vmatprep.mubr.f32.mxu1 %v2277_v3  ;;  %139 = vmatprep.mubr.f32.mxu0 %v2277_v3  ;;  %205 = vst.msk [vmem:[#allocation4] sm:$0xff] %vm204_vm0, %v2277_v3  ;;  %v2278_v27 = vmov 0   ;;  %v40_v28 = vlaneseq  ;;  %vm420_vm8 = vcmask 523520  }
   0x2   :  { %2138 = vmatprep.subr.mxu1 %v37_v0  ;;  %v34_v4 = vld [vmem:[%s3195_s2] sm:$0xff]  ;;  %103 = vmatprep.subr.mxu0 %v37_v0  ;;  %v2344_v6 = vld [vmem:[%s3197_s4 + $0x78] sm:$0xff]  ;;  %v2349_v7 = vld [vmem:[%s3197_s4 + $0x70] sm:$0xff]  ;;  %207 = vst.msk [vmem:[#allocation5] sm:$0xff] %vm206_vm2, %v2277_v3 }
   0x3   :  { %2140 = vmatpush1.msra.mxu1 %v36_v1  ;;  %v30_v5 = vld [vmem:[%s3196_s0 + $0x20] sm:$0xff]  ;;  %104 = vmatpush1.msra.mxu0 %v36_v1  ;;  %v2354_v8 = vld [vmem:[%s3197_s4 + $0x68] sm:$0xff]  ;;  %v2371_v11 = vld [vmem:[%s3197_s4 + $0x58] sm:$0xff]  ;;  %208 = vst.msk [vmem:[#allocation6] sm:$0xff] %vm206_vm2, %v2277_v3  ;;  %v41_v31 = vshrl.u32 %v40_v28, 7 }
   0x4   :  { %2139 = vmatprep.subr.mxu1 %v35_v2  ;;  %105 = vmatprep.subr.mxu0 %v35_v2  ;;  %v2361_v9 = vld [vmem:[%s3197_s4 + $0x60] sm:$0xff]  ;;  %v31_v10 = vld [vmem:[%s3196_s0 + $0x28] sm:$0xff]  ;;  %v2377_v12 = vld [vmem:[%s3197_s4 + $0x50] sm:$0xff] }
   0x5   :  { %2141 = vmatpush1.msra.mxu1 %v34_v4  ;;  %106 = vmatpush1.msra.mxu0 %v34_v4  ;;  %v26_v13 = vld [vmem:[%s3196_s0] sm:$0xff]  ;;  %v2387_v14 = vld [vmem:[%s3197_s4 + $0x48] sm:$0xff]  ;;  %v32_v16 = vld [vmem:[%s3196_s0 + $0x30] sm:$0xff]  ;;  %v42_v34 = vsub.s32 0, %v41_v31  ;;  %v46_v52 = vsub.s32 1, %v41_v31 }
   0x6   :  { %2057 = vmatmul.mubr.msk.f32.vlgmr.msra.gmra.mxu1 %vm50_vm1, %v30_v5  ;;  %246 = vmatprep.subr.mxu1 %v2344_v6  ;;  %v2395_v15 = vld [vmem:[%s3197_s4 + $0x40] sm:$0xff]  ;;  %v2405_v17 = vld [vmem:[%s3197_s4 + $0x38] sm:$0xff]  ;;  %v2411_v18 = vld [vmem:[%s3197_s4 + $0x30] sm:$0xff] }
   0x7   :  { %247 = vmatpush1.msra.mxu1 %v2349_v7  ;;  %169 = vmatprep.mubr.f32.mxu1 %v2277_v3  ;;  %v2418_v19 = vld [vmem:[%s3197_s4 + $0x28] sm:$0xff]  ;;  %v2426_v20 = vld [vmem:[%s3197_s4 + $0x20] sm:$0xff]  ;;  %v33_v21 = vld [vmem:[%s3196_s0 + $0x38] sm:$0xff] }
   0x8   :  { %248 = vmatprep.subr.mxu1 %v2354_v8  ;;  %684 = vmatprep.subr.mxu0 %v2344_v6  ;;  %v2436_v22 = vld [vmem:[%s3197_s4 + $0x18] sm:$0xff]  ;;  %v2442_v23 = vld [vmem:[%s3197_s4 + $0x10] sm:$0xff]  ;;  %v2449_v24 = vld [vmem:[%s3197_s4 + $0x8] sm:$0xff] }
   0x9   :  { %249 = vmatpush1.msra.mxu1 %v2361_v9  ;;  %2053 = vmatmul.mubr.msk.f32.vlgmr.msra.gmra.mxu0 %vm50_vm1, %v26_v13  ;;  %v2457_v25 = vld [vmem:[%s3197_s4] sm:$0xff]  ;;  %v313_v47 = vld [vmem:[#allocation5] sm:$0xff] }
   0xa   :  { %2058 = vmatmul.mubr.msk.f32.gmra.mxu1 %vm50_vm1, %v31_v10  ;;  %250 = vmatprep.subr.mxu1 %v2371_v11  ;;  %v2461_v26 = vld [vmem:[#allocation4] sm:$0xff]  ;;  %v376_v49 = vld [vmem:[#allocation6] sm:$0xff] }
   0xb   :  { %251 = vmatpush1.msra.mxu1 %v2377_v12  ;;  %175 = vmatprep.mubr.f32.mxu1 %v2277_v3  ;;  %v38_v35 = vld [vmem:[%s3198_s3] sm:$0x3]  ;;  %s2279_s3 = smov 32  }
   0xc   :  { %252 = vmatprep.subr.mxu1 %v2387_v14  ;;  %145 = vmatprep.mubr.f32.mxu0 %v2277_v3  ;;  %v2518_v38 = vrot.slane %v38_v35, %v42_v34  ;;  %v2526_v46 = vld [vmem:[%s3199_s1] sm:$0xff]  ;;  %v2533_v54 = vrot.slane %v38_v35, %v46_v52  ;;  %s2280_s1 = smov 64  }
   0xd   :  { %253 = vmatpush1.msra.mxu1 %v2395_v15  ;;  %685 = vmatpush1.msra.mxu0 %v2349_v7  ;;  %vm335_vm3 = vcmp.gt.s32.totalorder %v2526_v46, 0  ;;  %vm398_vm4 = vcmp.gt.s32.totalorder %v2526_v46, 7  ;;  %vm554_vm7 = vcmp.gt.s32.totalorder %v2526_v46, 1  ;;  %vm618_vm9 = vcmp.gt.s32.totalorder %v2526_v46, 6 }
   0xe   :  { %2059 = vmatmul.mubr.msk.f32.gmra.mxu1 %vm50_vm1, %v32_v16  ;;  %254 = vmatprep.subr.mxu1 %v2405_v17  ;;  %v336_v48 = vsel %vm335_vm3, 1, %v2278_v27  ;;  %vm773_vm12 = vcmp.gt.s32.totalorder %v2526_v46, 2  ;;  %vm837_vm13 = vcmp.gt.s32.totalorder %v2526_v46, 5  ;;  %vm1056_vm3 = vcmp.gt.s32.totalorder %v2526_v46, 4 }
   0xf   :  { %255 = vmatpush1.msra.mxu1 %v2411_v18  ;;  %181 = vmatprep.mubr.f32.mxu1 %v2277_v3 }
  0x10   :  { %256 = vmatprep.subr.mxu1 %v2418_v19  ;;  %686 = vmatprep.subr.mxu0 %v2354_v8 }
  0x11   :  { %257 = vmatpush1.msra.mxu1 %v2426_v20  ;;  %687 = vmatpush1.msra.mxu0 %v2361_v9 }
  0x12   :  { %2060 = vmatmul.mubr.msk.f32.gmra.mxu1 %vm50_vm1, %v33_v21  ;;  %258 = vmatprep.subr.mxu1 %v2436_v22  ;;  %v399_v21 = vsel %vm398_vm4, 1, %v2278_v27 }
  0x13   :  { %259 = vmatpush1.msra.mxu1 %v2442_v23  ;;  %294 = vmatprep.mubr.f32.mxu1 %v2277_v3 }
  0x14   :  { %260 = vmatprep.subr.mxu1 %v2449_v24  ;;  %688 = vmatprep.subr.mxu0 %v2371_v11 }
  0x15   :  { %261 = vmatpush1.msra.mxu1 %v2457_v25  ;;  %689 = vmatpush1.msra.mxu0 %v2377_v12 }
  0x16   :  { %2061 = vmatmul.mubr.msk.f32.vlgmr.msra.gmra.mxu1 %vm204_vm0, %v2461_v26  ;;  %465 = vmatprep.subr.mxu1 %v2344_v6 }
  0x17   :  { %466 = vmatpush1.msra.mxu1 %v2349_v7  ;;  %513 = vmatprep.mubr.f32.mxu1 %v2277_v3 }
  0x18   :  { %467 = vmatprep.subr.mxu1 %v2354_v8  ;;  %690 = vmatprep.subr.mxu0 %v2387_v14 }
  0x19   :  { %468 = vmatpush1.msra.mxu1 %v2361_v9  ;;  %691 = vmatpush1.msra.mxu0 %v2395_v15 }
  0x1a   :  { %469 = vmatprep.subr.mxu1 %v2371_v11  ;;  %692 = vmatprep.subr.mxu0 %v2405_v17 }
  0x1b   :  { %470 = vmatpush1.msra.mxu1 %v2377_v12  ;;  %693 = vmatpush1.msra.mxu0 %v2411_v18 }
  0x1c   :  { %471 = vmatprep.subr.mxu1 %v2387_v14  ;;  %694 = vmatprep.subr.mxu0 %v2418_v19 }
  0x1d   :  { %472 = vmatpush1.msra.mxu1 %v2395_v15  ;;  %695 = vmatpush1.msra.mxu0 %v2426_v20 }
  0x1e   :  { %473 = vmatprep.subr.mxu1 %v2405_v17  ;;  %696 = vmatprep.subr.mxu0 %v2436_v22 }
  0x1f   :  { %474 = vmatpush1.msra.mxu1 %v2411_v18  ;;  %697 = vmatpush1.msra.mxu0 %v2442_v23 }
  0x20   :  { %475 = vmatprep.subr.mxu1 %v2418_v19  ;;  %698 = vmatprep.subr.mxu0 %v2449_v24 }
  0x21   :  { %476 = vmatpush1.msra.mxu1 %v2426_v20  ;;  %699 = vmatpush1.msra.mxu0 %v2457_v25 }
  0x22   :  { %477 = vmatprep.subr.mxu1 %v2436_v22  ;;  %2147 = vset.pattern.permute.xlu0 %v2278_v27 }
  0x23   :  { %478 = vmatpush1.msra.mxu1 %v2442_v23  ;;  %2148 = vset.pattern.permute.xlu1 %v2278_v27 }
  0x24   :  { %479 = vmatprep.subr.mxu1 %v2449_v24 }
  0x25   :  { %480 = vmatpush1.msra.mxu1 %v2457_v25 }
  0x26   :  { %903 = vmatprep.subr.mxu1 %v2344_v6 }
  0xc6   :  { %v2503_v29 = vpop.f32.mrf.mxu1 }
  0xc8   :  { %v2505_v30 = vpop.f32.mrf.mxu1 }
  0xc9   :  { %v141_v40 = vpop.f32.mrf.mxu0 }
  0xca   :  { %v2507_v32 = vpop.f32.mrf.mxu1  ;;  %v142_v41 = vadd.f32 %v141_v40, %v2518_v38 }
  0xcc   :  { %v2509_v33 = vpop.f32.mrf.mxu1 }
  0xce   :  { %v2514_v36 = vpop.f32.mrf.mxu1 }
  0xd0   :  { %v2516_v37 = vpop.f32.mrf.mxu1 }
  0xd2   :  { %v2520_v39 = vpop.f32.mrf.mxu1 }
  0xd4   :  { %v185_v42 = vpop.f32.mrf.mxu1 }
  0xd5   :  { %v186_v56 = vadd.f32 %v185_v42, %v2533_v54 }
  0xd6   :  { %v296_v43 = vpop.f32.mrf.mxu1 }
  0xd7   :  { %v305_v44 = vadd.f32 %v296_v43, %v142_v41 }
  0xd8   :  { %v298_v55 = vpop.f32.mrf.mxu1 }
  0xd9   :  { %2149 = vtanh.f32 %v305_v44  ;;  %v2062_v50 = vmul.f32 -1.442695, %v305_v44  ;;  %v368_v57 = vadd.f32 %v298_v55, %v186_v56 }
  0xdb   :  { %2151 = vpow2.f32 %v2062_v50  ;;  %v2063_v62 = vmul.f32 -1.442695, %v368_v57 }
  0xe6   :  { %v2150_v45 = vpop.eup %2149 }
  0xe7   :  { %320 = vrot.lane.b32.xlu0 %v2150_v45, %s2279_s3 }
  0xe8   :  { %v2152_v51 = vpop.eup %2151 }
  0xe9   :  { %v309_v53 = vadd.f32 1.0, %v2152_v51 }
  0xeb   :  { %315 = vrot.lane.b32.xlu0 %v313_v47, %s2279_s3  ;;  %2153 = vrcp.f32 %v309_v53 }
  0xec   :  { %2155 = vtanh.f32 %v368_v57 }
  0xed   :  { %2157 = vpow2.f32 %v2063_v62 }
  0xef   :  { %338 = vperm.xlu0 %2147, %v336_v48  }
  0xf3   :  { %378 = vrot.lane.b32.xlu0 %v376_v49, %s2279_s3  ;;  %v27_v49 = vld [vmem:[%s3196_s0 + $0x8] sm:$0xff] }
  0xf4   :  { %2054 = vmatmul.mubr.msk.f32.gmra.mxu0 %vm50_vm1, %v27_v49 }
  0xf5   :  { %151 = vmatprep.mubr.f32.mxu0 %v2277_v3 }
  0xf8   :  { %v2154_v58 = vpop.eup %2153 }
  0xf9   :  { %v2156_v61 = vpop.eup %2155 }
  0xfa   :  { %v2158_v4 = vpop.eup %2157 }
  0xfb   :  { %v372_v5 = vadd.f32 1.0, %v2158_v4 }
 0x159   :  { %v321_v59 = vpop.permute.xlu0 %320 }
 0x15a   :  { %v323_v60 = vmul.f32 %v2154_v58, %v321_v59  ;;  %v555_v59 = vsel %vm554_vm7, 1, %v2278_v27 }
 0x15c   :  { %325 = vrot.lane.b32.xlu1 %v323_v60, %s2279_s3 }
 0x15d   :  { %v316_v63 = vpop.permute.xlu0 %315 }
 0x15e   :  { %v318_v0 = vmul.f32 %v2154_v58, %v316_v63 }
 0x160   :  { %383 = vrot.lane.b32.xlu1 %v2156_v61, %s2279_s3 }
 0x16a   :  { %v2544_v28 = vpop.permute.xlu0 %338 }
 0x16b   :  { %vm340_vm5 = vcmp.eq.s32.totalorder %v2544_v28, 1 }
 0x16e   :  { %v379_v35 = vpop.permute.xlu0 %378 }
 0x1ce   :  { %v326_v1 = vpop.permute.xlu1 %325 }
 0x1cf   :  { %v328_v2 = vadd.f32 %v326_v1, %v318_v0 }
 0x1d1   :  { %2159 = vtanh.f32 %v328_v2  ;;  %v341_v48 = vsel %vm340_vm5, %v328_v2, %v316_v63 }
 0x1d2   :  { %2161 = vrcp.f32 %v372_v5  ;;  %v384_v10 = vpop.permute.xlu1 %383  ;;  %v180_v5 = vadd.f32 %v2516_v37, %v2533_v54 }
 0x1de   :  { %v2160_v6 = vpop.eup %2159 }
 0x1df   :  { %331 = vrot.lane.b32.xlu1 %v2160_v6, %s2279_s3  ;;  %v2162_v13 = vpop.eup %2161 }
 0x1e0   :  { %v386_v16 = vmul.f32 %v2162_v13, %v384_v10  ;;  %v381_v41 = vmul.f32 %v2162_v13, %v379_v35 }
 0x1e3   :  { %349 = vrot.lane.b32.xlu1 %v2461_v26, %s2280_s1 }
 0x1e7   :  { %388 = vrot.lane.b32.xlu1 %v386_v16, %s2279_s3 }
 0x1eb   :  { %401 = vperm.xlu1 %2148, %v399_v21  }
 0x251   :  { %v332_v31 = vpop.permute.xlu1 %331 }
 0x252   :  { %v2546_v34 = vmul.f32 %v2154_v58, %v332_v31 }
 0x255   :  { %v350_v40 = vpop.permute.xlu1 %349 }
 0x256   :  { %v352_v26 = vsel %vm340_vm5, %v2546_v34, %v350_v40 }
 0x257   :  { %354 = vrot.lane.b32.xlu0 %v352_v26, %s2280_s1 }
 0x259   :  { %v389_v42 = vpop.permute.xlu1 %388 }
 0x25a   :  { %v391_v43 = vadd.f32 %v389_v42, %v381_v41 }
 0x25c   :  { %2163 = vtanh.f32 %v391_v43 }
 0x266   :  { %v2564_v50 = vpop.permute.xlu1 %401 }
 0x267   :  { %vm403_vm6 = vcmp.eq.s32.totalorder %v2564_v50, 1  ;;  %v2085_v50 = vld [vmem:[%s3201_s6] ss:$0 sm:$0xff] }
 0x268   :  { %v404_v58 = vsel %vm403_vm6, %v391_v43, %v379_v35 }
 0x269   :  { %v2164_v44 = vpop.eup %2163 }
 0x26a   :  { %394 = vrot.lane.b32.xlu0 %v2164_v44, %s2279_s3 }
 0x2c9   :  { %v355_v45 = vpop.permute.xlu0 %354 }
 0x2ca   :  { %357 = vst.msk [vmem:[#allocation4] sm:$0xff] %vm206_vm2, %v355_v45  ;;  %v619_v45 = vsel %vm618_vm9, 1, %v2278_v27 }
 0x2d1   :  { %v410_v47 = vld [vmem:[#allocation4] sm:$0xff] }
 0x2d2   :  { %412 = vrot.lane.b32.xlu1 %v410_v47, %s2279_s3 }
 0x2d6   :  { %343 = vrot.lane.b32.xlu1 %v341_v48, %s2281_s30 }
 0x2dc   :  { %v395_v51 = vpop.permute.xlu0 %394 }
 0x2dd   :  { %v2566_v52 = vmul.f32 %v2162_v13, %v395_v51 }
 0x344   :  { %v413_v53 = vpop.permute.xlu1 %412 }
 0x345   :  { %v415_v55 = vsel %vm403_vm6, %v2566_v52, %v413_v53 }
 0x346   :  { %417 = vrot.lane.b32.xlu0 %v415_v55, %s2281_s30 }
 0x348   :  { %v344_v56 = vpop.permute.xlu1 %343 }
 0x349   :  { %346 = vst.msk [vmem:[#allocation5] sm:$0xff] %vm206_vm2, %v344_v56 }
 0x350   :  { %v532_v57 = vld [vmem:[#allocation5] sm:$0xff] }
 0x351   :  { %534 = vrot.lane.b32.xlu1 %v532_v57, %s2279_s3 }
 0x355   :  { %406 = vrot.lane.b32.xlu1 %v404_v58, %s2281_s30 }
 0x359   :  { %557 = vperm.xlu1 %2148, %v555_v59  }
 0x3b8   :  { %v418_v60 = vpop.permute.xlu0 %417 }
 0x3b9   :  { %421 = vst.msk [vmem:[#allocation4] sm:$0xff] %vm420_vm8, %v418_v60 }
 0x3c0   :  { %v429_v61 = vld [vmem:[#allocation4] sm:$0xff] }
 0x3c1   :  { %2064 = vmatmul.mubr.msk.f32.vlgmr.msra.gmra.mxu1 %vm204_vm0, %v429_v61  ;;  %568 = vrot.lane.b32.xlu1 %v429_v61, %s2280_s1 }
 0x3c2   :  { %904 = vmatpush1.msra.mxu1 %v2349_v7  ;;  %951 = vmatprep.mubr.f32.mxu1 %v2277_v3  ;;  %v2602_v7 = vpop.f32.mrf.mxu0 }
 0x3c3   :  { %v2585_v62 = vpop.permute.xlu1 %534  ;;  %905 = vmatprep.subr.mxu1 %v2354_v8 }
 0x3c4   :  { %906 = vmatpush1.msra.mxu1 %v2361_v9  ;;  %v147_v8 = vpop.f32.mrf.mxu0 }
 0x3c5   :  { %907 = vmatprep.subr.mxu1 %v2371_v11  ;;  %v148_v9 = vadd.f32 %v147_v8, %v2518_v38 }
 0x3c6   :  { %908 = vmatpush1.msra.mxu1 %v2377_v12 }
 0x3c7   :  { %v407_v63 = vpop.permute.xlu1 %406  ;;  %909 = vmatprep.subr.mxu1 %v2387_v14 }
 0x3c8   :  { %409 = vst.msk [vmem:[#allocation6] sm:$0xff] %vm206_vm2, %v407_v63  ;;  %910 = vmatpush1.msra.mxu1 %v2395_v15 }
 0x3c9   :  { %911 = vmatprep.subr.mxu1 %v2405_v17 }
 0x3ca   :  { %912 = vmatpush1.msra.mxu1 %v2411_v18 }
 0x3cb   :  { %913 = vmatprep.subr.mxu1 %v2418_v19 }
 0x3cc   :  { %914 = vmatpush1.msra.mxu1 %v2426_v20 }
 0x3cd   :  { %915 = vmatprep.subr.mxu1 %v2436_v22 }
 0x3ce   :  { %916 = vmatpush1.msra.mxu1 %v2442_v23 }
 0x3cf   :  { %917 = vmatprep.subr.mxu1 %v2449_v24  ;;  %v596_v48 = vld [vmem:[#allocation6] sm:$0xff] }
 0x3d0   :  { %918 = vmatpush1.msra.mxu1 %v2457_v25 }
 0x3d4   :  { %v2616_v49 = vpop.permute.xlu1 %557 }
 0x3d5   :  { %vm559_vm10 = vcmp.eq.s32.totalorder %v2616_v49, 1 }
 0x433   :  { %v569_v55 = vpop.permute.xlu1 %568 }
 0x481   :  { %v515_v11 = vpop.f32.mrf.mxu1 }
 0x482   :  { %v524_v12 = vadd.f32 %v515_v11, %v148_v9  ;;  %v28_v11 = vld [vmem:[%s3196_s0 + $0x10] sm:$0xff] }
 0x483   :  { %v517_v4 = vpop.f32.mrf.mxu1  ;;  %2055 = vmatmul.mubr.msk.f32.gmra.mxu0 %vm50_vm1, %v28_v11 }
 0x484   :  { %2165 = vtanh.f32 %v524_v12  ;;  %v2065_v0 = vmul.f32 -1.442695, %v524_v12  ;;  %v588_v6 = vadd.f32 %v517_v4, %v180_v5  ;;  %157 = vmatprep.mubr.f32.mxu0 %v2277_v3  ;;  %v29_v12 = vld [vmem:[%s3196_s0 + $0x18] sm:$0xff] }
 0x486   :  { %2167 = vpow2.f32 %v2065_v0  ;;  %v2066_v31 = vmul.f32 -1.442695, %v588_v6 }
 0x487   :  { %2056 = vmatmul.mubr.msk.f32.gmra.mxu0 %vm50_vm1, %v29_v12  ;;  %vm992_vm1 = vcmp.gt.s32.totalorder %v2526_v46, 3 }
 0x488   :  { %732 = vmatprep.mubr.f32.mxu0 %v2277_v3 }
 0x491   :  { %v2166_v14 = vpop.eup %2165 }
 0x492   :  { %539 = vrot.lane.b32.xlu0 %v2166_v14, %s2279_s3 }
 0x493   :  { %v2168_v1 = vpop.eup %2167 }
 0x494   :  { %v528_v2 = vadd.f32 1.0, %v2168_v1 }
 0x496   :  { %2169 = vrcp.f32 %v528_v2 }
 0x497   :  { %2171 = vtanh.f32 %v588_v6 }
 0x498   :  { %2173 = vpow2.f32 %v2066_v31 }
 0x4a3   :  { %v2170_v10 = vpop.eup %2169 }
 0x4a4   :  { %v2172_v21 = vpop.eup %2171  ;;  %v537_v26 = vmul.f32 %v2170_v10, %v2585_v62 }
 0x4a5   :  { %v2174_v35 = vpop.eup %2173 }
 0x4a6   :  { %v592_v40 = vadd.f32 1.0, %v2174_v35  ;;  %v2665_v35 = vpop.f32.mrf.mxu0 }
 0x4a8   :  { %2175 = vrcp.f32 %v592_v40 }
 0x4b5   :  { %v2176_v42 = vpop.eup %2175 }
 0x504   :  { %v540_v13 = vpop.permute.xlu0 %539 }
 0x505   :  { %v542_v16 = vmul.f32 %v2170_v10, %v540_v13 }
 0x507   :  { %544 = vrot.lane.b32.xlu0 %v542_v16, %s2279_s3 }
 0x50b   :  { %603 = vrot.lane.b32.xlu0 %v2172_v21, %s2279_s3 }
 0x543   :  { %v153_v40 = vpop.f32.mrf.mxu0 }
 0x579   :  { %v545_v41 = vpop.permute.xlu0 %544 }
 0x57a   :  { %v547_v37 = vadd.f32 %v545_v41, %v537_v26  ;;  %v2667_v26 = vpop.f32.mrf.mxu0 }
 0x57c   :  { %2177 = vtanh.f32 %v547_v37  ;;  %v560_v9 = vsel %vm559_vm10, %v547_v37, %v2585_v62  ;;  %v2669_v41 = vpop.f32.mrf.mxu0 }
 0x57d   :  { %v604_v43 = vpop.permute.xlu0 %603 }
 0x57e   :  { %v606_v44 = vmul.f32 %v2176_v42, %v604_v43  ;;  %v2671_v37 = vpop.f32.mrf.mxu0 }
 0x580   :  { %608 = vrot.lane.b32.xlu1 %v606_v44, %s2279_s3 }
 0x584   :  { %621 = vperm.xlu1 %2148, %v619_v45  }
 0x589   :  { %v2178_v47 = vpop.eup %2177 }
 0x58a   :  { %550 = vrot.lane.b32.xlu0 %v2178_v47, %s2279_s3 }
 0x58e   :  { %598 = vrot.lane.b32.xlu0 %v596_v48, %s2279_s3 }
 0x5f2   :  { %v609_v59 = vpop.permute.xlu1 %608 }
 0x5fc   :  { %v551_v51 = vpop.permute.xlu0 %550 }
 0x5fd   :  { %v2618_v53 = vmul.f32 %v2170_v10, %v551_v51  ;;  %v774_v10 = vsel %vm773_vm12, 1, %v2278_v27 }
 0x5ff   :  { %v571_v56 = vsel %vm559_vm10, %v2618_v53, %v569_v55  ;;  %v2642_v14 = vpop.permute.xlu1 %621 }
 0x600   :  { %v599_v57 = vpop.permute.xlu0 %598  ;;  %573 = vrot.lane.b32.xlu0 %v571_v56, %s2280_s1  ;;  %vm623_vm11 = vcmp.eq.s32.totalorder %v2642_v14, 1  ;;  %v174_v56 = vadd.f32 %v2509_v33, %v2533_v54 }
 0x601   :  { %v601_v58 = vmul.f32 %v2176_v42, %v599_v57 }
 0x603   :  { %v611_v60 = vadd.f32 %v609_v59, %v601_v58 }
 0x605   :  { %2179 = vtanh.f32 %v611_v60  ;;  %v624_v6 = vsel %vm623_vm11, %v611_v60, %v599_v57 }
 0x612   :  { %v2180_v61 = vpop.eup %2179 }
 0x613   :  { %614 = vrot.lane.b32.xlu0 %v2180_v61, %s2279_s3 }
 0x672   :  { %v574_v63 = vpop.permute.xlu0 %573 }
 0x673   :  { %576 = vst.msk [vmem:[#allocation4] sm:$0xff] %vm206_vm2, %v574_v63 }
 0x67a   :  { %v630_v8 = vld [vmem:[#allocation4] sm:$0xff] }
 0x67b   :  { %632 = vrot.lane.b32.xlu1 %v630_v8, %s2279_s3 }
 0x67f   :  { %562 = vrot.lane.b32.xlu1 %v560_v9, %s2281_s30 }
 0x685   :  { %v615_v62 = vpop.permute.xlu0 %614 }
 0x686   :  { %v2644_v0 = vmul.f32 %v2176_v42, %v615_v62  ;;  %v154_v42 = vadd.f32 %v153_v40, %v2518_v38 }
 0x6ed   :  { %v633_v1 = vpop.permute.xlu1 %632 }
 0x6ee   :  { %v635_v2 = vsel %vm623_vm11, %v2644_v0, %v633_v1 }
 0x6ef   :  { %637 = vrot.lane.b32.xlu0 %v635_v2, %s2281_s30 }
 0x6f1   :  { %v563_v4 = vpop.permute.xlu1 %562 }
 0x6f2   :  { %565 = vst.msk [vmem:[#allocation5] sm:$0xff] %vm206_vm2, %v563_v4  ;;  %v838_v4 = vsel %vm837_vm13, 1, %v2278_v27 }
 0x6f9   :  { %v751_v5 = vld [vmem:[#allocation5] sm:$0xff] }
 0x6fa   :  { %753 = vrot.lane.b32.xlu1 %v751_v5, %s2279_s3 }
 0x6fe   :  { %626 = vrot.lane.b32.xlu1 %v624_v6, %s2281_s30 }
 0x702   :  { %776 = vperm.xlu1 %2148, %v774_v10  }
 0x761   :  { %v638_v13 = vpop.permute.xlu0 %637 }
 0x762   :  { %640 = vst.msk [vmem:[#allocation4] sm:$0xff] %vm420_vm8, %v638_v13 }
 0x769   :  { %v648_v16 = vld [vmem:[#allocation4] sm:$0xff] }
 0x76a   :  { %2067 = vmatmul.mubr.msk.f32.vlgmr.msra.gmra.mxu0 %vm204_vm0, %v648_v16  ;;  %787 = vrot.lane.b32.xlu1 %v648_v16, %s2280_s1 }
 0x76b   :  { %1170 = vmatprep.mubr.f32.mxu0 %v2277_v3 }
 0x76c   :  { %v2662_v21 = vpop.permute.xlu1 %753 }
 0x770   :  { %v627_v31 = vpop.permute.xlu1 %626 }
 0x771   :  { %629 = vst.msk [vmem:[#allocation6] sm:$0xff] %vm206_vm2, %v627_v31 }
 0x778   :  { %v815_v6 = vld [vmem:[#allocation6] sm:$0xff] }
 0x77d   :  { %v2685_v10 = vpop.permute.xlu1 %776 }
 0x77e   :  { %vm778_vm14 = vcmp.eq.s32.totalorder %v2685_v10, 1  ;;  %v1897_v10 = vld [vmem:[%s3200_s5 + $0x38] sm:$0xff] }
 0x7dc   :  { %v788_v31 = vpop.permute.xlu1 %787 }
 0x82a   :  { %v734_v43 = vpop.f32.mrf.mxu0 }
 0x82b   :  { %v743_v44 = vadd.f32 %v734_v43, %v154_v42 }
 0x82c   :  { %v736_v55 = vpop.f32.mrf.mxu0 }
 0x82d   :  { %2181 = vtanh.f32 %v743_v44  ;;  %v2068_v47 = vmul.f32 -1.442695, %v743_v44  ;;  %v807_v57 = vadd.f32 %v736_v55, %v174_v56 }
 0x82f   :  { %2183 = vpow2.f32 %v2068_v47  ;;  %v2069_v63 = vmul.f32 -1.442695, %v807_v57 }
 0x83a   :  { %v2182_v45 = vpop.eup %2181 }
 0x83b   :  { %758 = vrot.lane.b32.xlu0 %v2182_v45, %s2279_s3 }
 0x83c   :  { %v2184_v48 = vpop.eup %2183 }
 0x83d   :  { %v747_v51 = vadd.f32 1.0, %v2184_v48 }
 0x83f   :  { %2185 = vrcp.f32 %v747_v51 }
 0x840   :  { %2187 = vtanh.f32 %v807_v57 }
 0x841   :  { %2189 = vpow2.f32 %v2069_v63 }
 0x84c   :  { %v2186_v58 = vpop.eup %2185 }
 0x84d   :  { %v2188_v61 = vpop.eup %2187  ;;  %v756_v11 = vmul.f32 %v2186_v58, %v2662_v21 }
 0x84e   :  { %v2190_v8 = vpop.eup %2189 }
 0x84f   :  { %v811_v9 = vadd.f32 1.0, %v2190_v8  ;;  %v993_v8 = vsel %vm992_vm1, 1, %v2278_v27 }
 0x851   :  { %2191 = vrcp.f32 %v811_v9 }
 0x85e   :  { %v2192_v62 = vpop.eup %2191 }
 0x8ad   :  { %v759_v59 = vpop.permute.xlu0 %758 }
 0x8ae   :  { %v761_v60 = vmul.f32 %v2186_v58, %v759_v59 }
 0x8b0   :  { %763 = vrot.lane.b32.xlu0 %v761_v60, %s2279_s3 }
 0x8b4   :  { %822 = vrot.lane.b32.xlu0 %v2188_v61, %s2279_s3 }
 0x922   :  { %v764_v12 = vpop.permute.xlu0 %763 }
 0x923   :  { %v766_v33 = vadd.f32 %v764_v12, %v756_v11 }
 0x925   :  { %2193 = vtanh.f32 %v766_v33  ;;  %v779_v55 = vsel %vm778_vm14, %v766_v33, %v2662_v21 }
 0x926   :  { %v823_v1 = vpop.permute.xlu0 %822 }
 0x927   :  { %v825_v2 = vmul.f32 %v2192_v62, %v823_v1 }
 0x929   :  { %827 = vrot.lane.b32.xlu1 %v825_v2, %s2279_s3 }
 0x92d   :  { %840 = vperm.xlu1 %2148, %v838_v4  }
 0x932   :  { %v2194_v5 = vpop.eup %2193 }
 0x933   :  { %769 = vrot.lane.b32.xlu0 %v2194_v5, %s2279_s3 }
 0x937   :  { %817 = vrot.lane.b32.xlu0 %v815_v6, %s2279_s3 }
 0x99b   :  { %v828_v44 = vpop.permute.xlu1 %827 }
 0x9a5   :  { %v770_v13 = vpop.permute.xlu0 %769 }
 0x9a6   :  { %v2687_v16 = vmul.f32 %v2186_v58, %v770_v13 }
 0x9a8   :  { %v790_v40 = vsel %vm778_vm14, %v2687_v16, %v788_v31  ;;  %v2701_v56 = vpop.permute.xlu1 %840 }
 0x9a9   :  { %v818_v42 = vpop.permute.xlu0 %817  ;;  %792 = vrot.lane.b32.xlu0 %v790_v40, %s2280_s1  ;;  %vm842_vm15 = vcmp.eq.s32.totalorder %v2701_v56, 1  ;;  %v168_v40 = vadd.f32 %v2505_v30, %v2533_v54  ;;  %v1891_v56 = vld [vmem:[%s3200_s5 + $0x8] sm:$0xff] }
 0x9aa   :  { %v820_v43 = vmul.f32 %v2192_v62, %v818_v42 }
 0x9ac   :  { %v830_v45 = vadd.f32 %v828_v44, %v820_v43 }
 0x9ae   :  { %2195 = vtanh.f32 %v830_v45  ;;  %v843_v63 = vsel %vm842_vm15, %v830_v45, %v818_v42 }
 0x9bb   :  { %v2196_v47 = vpop.eup %2195 }
 0x9bc   :  { %833 = vrot.lane.b32.xlu0 %v2196_v47, %s2279_s3 }
 0xa1b   :  { %v793_v48 = vpop.permute.xlu0 %792 }
 0xa1c   :  { %795 = vst.msk [vmem:[#allocation4] sm:$0xff] %vm206_vm2, %v793_v48 }
 0xa23   :  { %v849_v51 = vld [vmem:[#allocation4] sm:$0xff] }
 0xa24   :  { %851 = vrot.lane.b32.xlu1 %v849_v51, %s2279_s3 }
 0xa28   :  { %781 = vrot.lane.b32.xlu1 %v779_v55, %s2281_s30 }
 0xa2e   :  { %v834_v57 = vpop.permute.xlu0 %833 }
 0xa2f   :  { %v2703_v58 = vmul.f32 %v2192_v62, %v834_v57  ;;  %v160_v62 = vadd.f32 %v2669_v41, %v2518_v38 }
 0xa96   :  { %v852_v59 = vpop.permute.xlu1 %851 }
 0xa97   :  { %v854_v60 = vsel %vm842_vm15, %v2703_v58, %v852_v59 }
 0xa98   :  { %856 = vrot.lane.b32.xlu0 %v854_v60, %s2281_s30 }
 0xa9a   :  { %v782_v61 = vpop.permute.xlu1 %781 }
 0xa9b   :  { %784 = vst.msk [vmem:[#allocation5] sm:$0xff] %vm206_vm2, %v782_v61 }
 0xaa2   :  { %v970_v21 = vld [vmem:[#allocation5] sm:$0xff] }
 0xaa3   :  { %972 = vrot.lane.b32.xlu1 %v970_v21, %s2279_s3  ;;  %v1057_v21 = vsel %vm1056_vm3, 1, %v2278_v27 }
 0xaa7   :  { %845 = vrot.lane.b32.xlu1 %v843_v63, %s2281_s30 }
 0xaab   :  { %995 = vperm.xlu1 %2148, %v993_v8  }
 0xb0a   :  { %v857_v9 = vpop.permute.xlu0 %856 }
 0xb0b   :  { %859 = vst.msk [vmem:[#allocation4] sm:$0xff] %vm420_vm8, %v857_v9 }
 0xb12   :  { %v867_v11 = vld [vmem:[#allocation4] sm:$0xff] }
 0xb13   :  { %2070 = vmatmul.mubr.msk.f32.vlgmr.msra.gmra.mxu1 %vm204_vm0, %v867_v11  ;;  %1006 = vrot.lane.b32.xlu1 %v867_v11, %s2280_s1 }
 0xb14   :  { %1369 = vmatprep.mubr.f32.mxu1 %v2277_v3 }
 0xb15   :  { %v2721_v12 = vpop.permute.xlu1 %972 }
 0xb19   :  { %v846_v33 = vpop.permute.xlu1 %845 }
 0xb1a   :  { %848 = vst.msk [vmem:[#allocation6] sm:$0xff] %vm206_vm2, %v846_v33 }
 0xb21   :  { %v1034_v8 = vld [vmem:[#allocation6] sm:$0xff] }
 0xb26   :  { %v2740_v9 = vpop.permute.xlu1 %995 }
 0xb27   :  { %vm997_vm4 = vcmp.eq.s32.totalorder %v2740_v9, 1  ;;  %v860_v9 = vsel %vm842_vm15, %v2703_v58, 0.0  ;;  %v422_v58 = vsel %vm403_vm6, %v2566_v52, 0.0  ;;  %v1890_v52 = vld [vmem:[%s3200_s5] sm:$0xff] }
 0xbd3   :  { %v953_v1 = vpop.f32.mrf.mxu1 }
 0xbd4   :  { %v962_v2 = vadd.f32 %v953_v1, %v160_v62  ;;  %v1007_v62 = vpop.permute.xlu1 %1006 }
 0xbd5   :  { %v955_v31 = vpop.f32.mrf.mxu1 }
 0xbd6   :  { %2197 = vtanh.f32 %v962_v2  ;;  %v2071_v5 = vmul.f32 -1.442695, %v962_v2  ;;  %v1026_v42 = vadd.f32 %v955_v31, %v168_v40  ;;  %v2759_v40 = vld [vmem:[%s3197_s4 + $0x78] sm:$0xff] }
 0xbd7   :  { %1122 = vmatprep.subr.mxu0 %v2759_v40  ;;  %1321 = vmatprep.subr.mxu1 %v2759_v40 }
 0xbd8   :  { %2199 = vpow2.f32 %v2071_v5  ;;  %v2072_v47 = vmul.f32 -1.442695, %v1026_v42 }
 0xbe3   :  { %v2198_v4 = vpop.eup %2197 }
 0xbe4   :  { %977 = vrot.lane.b32.xlu0 %v2198_v4, %s2279_s3 }
 0xbe5   :  { %v2200_v6 = vpop.eup %2199 }
 0xbe6   :  { %v966_v13 = vadd.f32 1.0, %v2200_v6 }
 0xbe8   :  { %2201 = vrcp.f32 %v966_v13 }
 0xbe9   :  { %2203 = vtanh.f32 %v1026_v42  ;;  %v2764_v42 = vld [vmem:[%s3197_s4 + $0x70] sm:$0xff] }
 0xbea   :  { %2205 = vpow2.f32 %v2072_v47  ;;  %1123 = vmatpush1.msra.mxu0 %v2764_v42  ;;  %1322 = vmatpush1.msra.mxu1 %v2764_v42 }
 0xbf5   :  { %v2202_v43 = vpop.eup %2201 }
 0xbf6   :  { %v2204_v45 = vpop.eup %2203  ;;  %v975_v55 = vmul.f32 %v2202_v43, %v2721_v12 }
 0xbf7   :  { %v2206_v48 = vpop.eup %2205 }
 0xbf8   :  { %v1030_v51 = vadd.f32 1.0, %v2206_v48 }
 0xbfa   :  { %2207 = vrcp.f32 %v1030_v51 }
 0xc07   :  { %v2732_v59 = vpop.eup %2207 }
 0xc56   :  { %v978_v44 = vpop.permute.xlu0 %977 }
 0xc57   :  { %v980_v41 = vmul.f32 %v2202_v43, %v978_v44  ;;  %v2782_v44 = vld [vmem:[%s3197_s4 + $0x58] sm:$0xff] }
 0xc59   :  { %982 = vrot.lane.b32.xlu0 %v980_v41, %s2279_s3  ;;  %v2789_v41 = vld [vmem:[%s3197_s4 + $0x50] sm:$0xff] }
 0xc5d   :  { %1041 = vrot.lane.b32.xlu0 %v2204_v45, %s2279_s3  ;;  %v2796_v45 = vld [vmem:[%s3197_s4 + $0x48] sm:$0xff] }
 0xccb   :  { %v983_v57 = vpop.permute.xlu0 %982 }
 0xccc   :  { %v985_v30 = vadd.f32 %v983_v57, %v975_v55  ;;  %v166_v55 = vadd.f32 %v2503_v29, %v2518_v38 }
 0xcce   :  { %2209 = vtanh.f32 %v985_v30  ;;  %v998_v31 = vsel %vm997_vm4, %v985_v30, %v2721_v12  ;;  %v2776_v12 = vld [vmem:[%s3197_s4 + $0x60] sm:$0xff] }
 0xccf   :  { %v1042_v60 = vpop.permute.xlu0 %1041 }
 0xcd0   :  { %v1044_v61 = vmul.f32 %v2732_v59, %v1042_v60 }
 0xcd2   :  { %1046 = vrot.lane.b32.xlu1 %v1044_v61, %s2279_s3 }
 0xcd6   :  { %1059 = vperm.xlu1 %2148, %v1057_v21  }
 0xcdb   :  { %v2210_v63 = vpop.eup %2209 }
 0xcdc   :  { %988 = vrot.lane.b32.xlu0 %v2210_v63, %s2279_s3 }
 0xce0   :  { %1036 = vrot.lane.b32.xlu0 %v1034_v8, %s2279_s3  ;;  %v162_v8 = vadd.f32 %v2671_v37, %v2533_v54 }
 0xd44   :  { %v1047_v2 = vpop.permute.xlu1 %1046 }
 0xd4e   :  { %v989_v11 = vpop.permute.xlu0 %988 }
 0xd4f   :  { %v2742_v33 = vmul.f32 %v2202_v43, %v989_v11  ;;  %v2769_v43 = vld [vmem:[%s3197_s4 + $0x68] sm:$0xff] }
 0xd50   :  { %1124 = vmatprep.subr.mxu0 %v2769_v43  ;;  %1323 = vmatprep.subr.mxu1 %v2769_v43 }
 0xd51   :  { %v1009_v46 = vsel %vm997_vm4, %v2742_v33, %v1007_v62  ;;  %1125 = vmatpush1.msra.mxu0 %v2776_v12  ;;  %1324 = vmatpush1.msra.mxu1 %v2776_v12 }
 0xd52   :  { %v1037_v27 = vpop.permute.xlu0 %1036  ;;  %1011 = vrot.lane.b32.xlu0 %v1009_v46, %s2280_s1  ;;  %1126 = vmatprep.subr.mxu0 %v2782_v44 }
 0xd53   :  { %v1039_v1 = vmul.f32 %v2732_v59, %v1037_v27  ;;  %1127 = vmatpush1.msra.mxu0 %v2789_v41  ;;  %1325 = vmatprep.subr.mxu1 %v2782_v44 }
 0xd54   :  { %1128 = vmatprep.subr.mxu0 %v2796_v45  ;;  %1326 = vmatpush1.msra.mxu1 %v2789_v41 }
 0xd55   :  { %v1049_v4 = vadd.f32 %v1047_v2, %v1039_v1  ;;  %1129 = vmatpush1.msra.mxu0 %v2395_v15  ;;  %1327 = vmatprep.subr.mxu1 %v2796_v45  ;;  %v2816_v15 = vpop.permute.xlu1 %1059 }
 0xd56   :  { %1130 = vmatprep.subr.mxu0 %v2405_v17  ;;  %vm1061_vm7 = vcmp.eq.s32.totalorder %v2816_v15, 1 }
 0xd57   :  { %2211 = vtanh.f32 %v1049_v4  ;;  %1131 = vmatpush1.msra.mxu0 %v2411_v18 }
 0xd58   :  { %1132 = vmatprep.subr.mxu0 %v2418_v19 }
 0xd59   :  { %1133 = vmatpush1.msra.mxu0 %v2426_v20 }
 0xd5a   :  { %1134 = vmatprep.subr.mxu0 %v2436_v22 }
 0xd5b   :  { %1135 = vmatpush1.msra.mxu0 %v2442_v23  ;;  %v1062_v23 = vsel %vm1061_vm7, %v1049_v4, %v1037_v27 }
 0xd5c   :  { %1136 = vmatprep.subr.mxu0 %v2449_v24 }
 0xd5d   :  { %1137 = vmatpush1.msra.mxu0 %v2457_v25 }
 0xd5e   :  { %1520 = vmatprep.subr.mxu0 %v2759_v40 }
 0xd64   :  { %v2212_v5 = vpop.eup %2211 }
 0xd65   :  { %1052 = vrot.lane.b32.xlu0 %v2212_v5, %s2279_s3 }
 0xdc4   :  { %v1012_v6 = vpop.permute.xlu0 %1011 }
 0xdc5   :  { %1014 = vst.msk [vmem:[#allocation4] sm:$0xff] %vm206_vm2, %v1012_v6 }
 0xdcc   :  { %v1068_v13 = vld [vmem:[#allocation4] sm:$0xff] }
 0xdcd   :  { %1070 = vrot.lane.b32.xlu1 %v1068_v13, %s2279_s3 }
 0xdd1   :  { %1000 = vrot.lane.b32.xlu1 %v998_v31, %s2281_s30 }
 0xdd7   :  { %v1053_v47 = vpop.permute.xlu0 %1052 }
 0xdd8   :  { %v2819_v17 = vmul.f32 %v2732_v59, %v1053_v47 }
 0xe3f   :  { %v1071_v18 = vpop.permute.xlu1 %1070 }
 0xe40   :  { %v1073_v19 = vsel %vm1061_vm7, %v2819_v17, %v1071_v18 }
 0xe41   :  { %1075 = vrot.lane.b32.xlu0 %v1073_v19, %s2281_s30 }
 0xe43   :  { %v1001_v20 = vpop.permute.xlu1 %1000 }
 0xe44   :  { %1003 = vst.msk [vmem:[#allocation5] sm:$0xff] %vm206_vm2, %v1001_v20 }
 0xe4b   :  { %v1186_v22 = vld [vmem:[#allocation5] sm:$0xff] }
 0xe4c   :  { %1188 = vrot.lane.b32.xlu1 %v1186_v22, %s2279_s3 }
 0xe50   :  { %1064 = vrot.lane.b32.xlu1 %v1062_v23, %s2281_s30 }
 0xeb3   :  { %v1076_v24 = vpop.permute.xlu0 %1075 }
 0xeb4   :  { %1078 = vst.msk [vmem:[#allocation4] sm:$0xff] %vm420_vm8, %v1076_v24 }
 0xebb   :  { %v1086_v25 = vld [vmem:[#allocation4] sm:$0xff] }
 0xebc   :  { %2073 = vmatmul.mubr.msk.f32.vlgmr.msra.gmra.mxu0 %vm204_vm0, %v1086_v25 }
 0xebd   :  { %1521 = vmatpush1.msra.mxu0 %v2764_v42  ;;  %1568 = vmatprep.mubr.f32.mxu0 %v2277_v3 }
 0xebe   :  { %v2835_v48 = vpop.permute.xlu1 %1188  ;;  %1522 = vmatprep.subr.mxu0 %v2769_v43 }
 0xebf   :  { %1523 = vmatpush1.msra.mxu0 %v2776_v12 }
 0xec0   :  { %1524 = vmatprep.subr.mxu0 %v2782_v44 }
 0xec1   :  { %1525 = vmatpush1.msra.mxu0 %v2789_v41 }
 0xec2   :  { %v1065_v51 = vpop.permute.xlu1 %1064  ;;  %1526 = vmatprep.subr.mxu0 %v2796_v45 }
 0xec3   :  { %1067 = vst.msk [vmem:[#allocation6] sm:$0xff] %vm206_vm2, %v1065_v51 }
 0xeca   :  { %v1240_v19 = vld [vmem:[#allocation6] sm:$0xff] }
 0xf7c   :  { %v1172_v57 = vpop.f32.mrf.mxu0 }
 0xf7d   :  { %v1178_v30 = vadd.f32 %v1172_v57, %v166_v55 }
 0xf7e   :  { %v1174_v63 = vpop.f32.mrf.mxu0 }
 0xf7f   :  { %2213 = vtanh.f32 %v1178_v30  ;;  %v2074_v60 = vmul.f32 -1.442695, %v1178_v30  ;;  %v1232_v11 = vadd.f32 %v1174_v63, %v162_v8  ;;  %v1293_v63 = vld [vmem:[%s3197_s4 + $0x38] sm:$0xff]  ;;  %v1292_v8 = vld [vmem:[%s3197_s4 + $0x30] sm:$0xff] }
 0xf81   :  { %2215 = vpow2.f32 %v2074_v60  ;;  %v2075_v1 = vmul.f32 -1.442695, %v1232_v11 }
 0xf8c   :  { %v2214_v59 = vpop.eup %2213 }
 0xf8d   :  { %1193 = vrot.lane.b32.xlu0 %v2214_v59, %s2279_s3 }
 0xf8e   :  { %v2216_v61 = vpop.eup %2215 }
 0xf8f   :  { %v1182_v21 = vadd.f32 1.0, %v2216_v61 }
 0xf91   :  { %2217 = vrcp.f32 %v1182_v21  ;;  %v1294_v21 = vld [vmem:[%s3197_s4 + $0x40] sm:$0xff] }
 0xf92   :  { %2219 = vtanh.f32 %v1232_v11  ;;  %1328 = vmatpush1.msra.mxu1 %v1294_v21  ;;  %1527 = vmatpush1.msra.mxu0 %v1294_v21  ;;  %v1290_v11 = vld [vmem:[%s3197_s4 + $0x20] sm:$0xff] }
 0xf93   :  { %2221 = vpow2.f32 %v2075_v1  ;;  %1329 = vmatprep.subr.mxu1 %v1293_v63  ;;  %1528 = vmatprep.subr.mxu0 %v1293_v63 }
 0xf94   :  { %1330 = vmatpush1.msra.mxu1 %v1292_v8  ;;  %1529 = vmatpush1.msra.mxu0 %v1292_v8 }
 0xf9e   :  { %v2218_v62 = vpop.eup %2217 }
 0xf9f   :  { %v2220_v27 = vpop.eup %2219  ;;  %v1191_v37 = vmul.f32 %v2218_v62, %v2835_v48 }
 0xfa0   :  { %v2222_v2 = vpop.eup %2221 }
 0xfa1   :  { %v1236_v4 = vadd.f32 1.0, %v2222_v2 }
 0xfa3   :  { %2223 = vrcp.f32 %v1236_v4 }
 0xfb0   :  { %v2224_v13 = vpop.eup %2223 }
 0xfff   :  { %v1194_v46 = vpop.permute.xlu0 %1193 }
0x1000   :  { %v1196_v29 = vmul.f32 %v2218_v62, %v1194_v46  ;;  %v1288_v46 = vld [vmem:[%s3197_s4 + $0x10] sm:$0xff] }
0x1002   :  { %1198 = vrot.lane.b32.xlu0 %v1196_v29, %s2279_s3  ;;  %v1287_v29 = vld [vmem:[%s3197_s4 + $0x8] sm:$0xff] }
0x1006   :  { %1247 = vrot.lane.b32.xlu0 %v2220_v27, %s2279_s3  ;;  %v1286_v27 = vld [vmem:[%s3197_s4] sm:$0xff] }
0x100a   :  { %1216 = vrot.lane.b32.xlu0 %v1086_v25, %s2280_s1 }
0x1074   :  { %v1199_v5 = vpop.permute.xlu0 %1198 }
0x1075   :  { %v1201_v6 = vadd.f32 %v1199_v5, %v1191_v37 }
0x1077   :  { %2225 = vtanh.f32 %v1201_v6  ;;  %v1208_v61 = vsel %vm1061_vm7, %v1201_v6, %v2835_v48  ;;  %v1291_v48 = vld [vmem:[%s3197_s4 + $0x28] sm:$0xff] }
0x1078   :  { %v1248_v31 = vpop.permute.xlu0 %1247  ;;  %1331 = vmatprep.subr.mxu1 %v1291_v48  ;;  %1530 = vmatprep.subr.mxu0 %v1291_v48 }
0x1079   :  { %v1250_v47 = vmul.f32 %v2224_v13, %v1248_v31  ;;  %1332 = vmatpush1.msra.mxu1 %v1290_v11  ;;  %1531 = vmatpush1.msra.mxu0 %v1290_v11 }
0x107b   :  { %1252 = vrot.lane.b32.xlu0 %v1250_v47, %s2279_s3 }
0x107c   :  { %v1217_v23 = vpop.permute.xlu0 %1216 }
0x1084   :  { %v2226_v18 = vpop.eup %2225 }
0x1085   :  { %1204 = vrot.lane.b32.xlu1 %v2226_v18, %s2279_s3 }
0x1089   :  { %1242 = vrot.lane.b32.xlu1 %v1240_v19, %s2279_s3 }
0x10ed   :  { %v1253_v55 = vpop.permute.xlu0 %1252 }
0x10f7   :  { %v1205_v20 = vpop.permute.xlu1 %1204 }
0x10f8   :  { %v2855_v22 = vmul.f32 %v2218_v62, %v1205_v20  ;;  %v1289_v62 = vld [vmem:[%s3197_s4 + $0x18] sm:$0xff]  ;;  %v156_v20 = vadd.f32 %v2667_v26, %v2533_v54 }
0x10f9   :  { %1333 = vmatprep.subr.mxu1 %v1289_v62  ;;  %1532 = vmatprep.subr.mxu0 %v1289_v62 }
0x10fa   :  { %v1219_v24 = vsel %vm1061_vm7, %v2855_v22, %v1217_v23  ;;  %1334 = vmatpush1.msra.mxu1 %v1288_v46  ;;  %1533 = vmatpush1.msra.mxu0 %v1288_v46 }
0x10fb   :  { %1221 = vrot.lane.b32.xlu1 %v1219_v24, %s2280_s1  ;;  %v1243_v25 = vpop.permute.xlu1 %1242  ;;  %1335 = vmatprep.subr.mxu1 %v1287_v29 }
0x10fc   :  { %v1245_v51 = vmul.f32 %v2224_v13, %v1243_v25  ;;  %1534 = vmatprep.subr.mxu0 %v1287_v29  ;;  %1336 = vmatpush1.msra.mxu1 %v1286_v27 }
0x10fd   :  { %1535 = vmatpush1.msra.mxu0 %v1286_v27  ;;  %1719 = vmatprep.subr.mxu1 %v2759_v40 }
0x10fe   :  { %v1255_v57 = vadd.f32 %v1253_v55, %v1245_v51  ;;  %2110 = vmatprep.subr.mxu0 %v1897_v10 }
0x1100   :  { %2227 = vtanh.f32 %v1255_v57  ;;  %v1262_v31 = vsel %vm997_vm4, %v1255_v57, %v1243_v25 }
0x110d   :  { %v2228_v30 = vpop.eup %2227 }
0x110e   :  { %1258 = vrot.lane.b32.xlu0 %v2228_v30, %s2279_s3 }
0x116d   :  { %v1222_v59 = vpop.permute.xlu1 %1221 }
0x116e   :  { %1224 = vst.msk [vmem:[#allocation4] sm:$0xff] %vm206_vm2, %v1222_v59 }
0x1175   :  { %v1268_v60 = vld [vmem:[#allocation4] sm:$0xff] }
0x1176   :  { %1270 = vrot.lane.b32.xlu1 %v1268_v60, %s2279_s3 }
0x117a   :  { %1210 = vrot.lane.b32.xlu1 %v1208_v61, %s2281_s30 }
0x1180   :  { %v1259_v1 = vpop.permute.xlu0 %1258 }
0x1181   :  { %v2896_v2 = vmul.f32 %v2224_v13, %v1259_v1 }
0x1183   :  { %v1279_v49 = vsel %vm997_vm4, %v2896_v2, 0.0 }
0x11e8   :  { %v1271_v4 = vpop.permute.xlu1 %1270 }
0x11e9   :  { %v1273_v37 = vsel %vm997_vm4, %v2896_v2, %v1271_v4  ;;  %v1894_v2 = vld [vmem:[%s3200_s5 + $0x20] sm:$0xff] }
0x11ea   :  { %1275 = vrot.lane.b32.xlu0 %v1273_v37, %s2281_s30 }
0x11ec   :  { %v1211_v5 = vpop.permute.xlu1 %1210 }
0x11ed   :  { %1213 = vst.msk [vmem:[#allocation5] sm:$0xff] %vm206_vm2, %v1211_v5 }
0x11f4   :  { %v1385_v6 = vld [vmem:[#allocation5] sm:$0xff] }
0x11f5   :  { %1387 = vrot.lane.b32.xlu1 %v1385_v6, %s2279_s3 }
0x11f9   :  { %1264 = vrot.lane.b32.xlu1 %v1262_v31, %s2281_s30 }
0x125c   :  { %v1276_v40 = vpop.permute.xlu0 %1275 }
0x125d   :  { %1278 = vst.msk [vmem:[#allocation4] sm:$0xff] %vm420_vm8, %v1276_v40 }
0x1264   :  { %v1285_v13 = vld [vmem:[#allocation4] sm:$0xff] }
0x1265   :  { %2076 = vmatmul.mubr.msk.f32.vlgmr.msra.gmra.mxu1 %vm204_vm0, %v1285_v13 }
0x1266   :  { %1720 = vmatpush1.msra.mxu1 %v2764_v42  ;;  %1767 = vmatprep.mubr.f32.mxu1 %v2277_v3  ;;  %v172_v3 = vadd.f32 %v2507_v32, %v2518_v38 }
0x1267   :  { %v2911_v47 = vpop.permute.xlu1 %1387  ;;  %1721 = vmatprep.subr.mxu1 %v2769_v43 }
0x1268   :  { %1722 = vmatpush1.msra.mxu1 %v2776_v12 }
0x1269   :  { %1723 = vmatprep.subr.mxu1 %v2782_v44 }
0x126a   :  { %1724 = vmatpush1.msra.mxu1 %v2789_v41 }
0x126b   :  { %v1265_v18 = vpop.permute.xlu1 %1264  ;;  %1725 = vmatprep.subr.mxu1 %v2796_v45 }
0x126c   :  { %1267 = vst.msk [vmem:[#allocation6] sm:$0xff] %vm206_vm2, %v1265_v18  ;;  %1726 = vmatpush1.msra.mxu1 %v1294_v21 }
0x126d   :  { %1727 = vmatprep.subr.mxu1 %v1293_v63 }
0x126e   :  { %1728 = vmatpush1.msra.mxu1 %v1292_v8 }
0x126f   :  { %1729 = vmatprep.subr.mxu1 %v1291_v48 }
0x1270   :  { %1730 = vmatpush1.msra.mxu1 %v1290_v11 }
0x1271   :  { %1731 = vmatprep.subr.mxu1 %v1289_v62 }
0x1272   :  { %1732 = vmatpush1.msra.mxu1 %v1288_v46 }
0x1273   :  { %1733 = vmatprep.subr.mxu1 %v1287_v29  ;;  %v1439_v48 = vld [vmem:[#allocation6] sm:$0xff] }
0x1274   :  { %1734 = vmatpush1.msra.mxu1 %v1286_v27 }
0x1325   :  { %v1371_v42 = vpop.f32.mrf.mxu1 }
0x1326   :  { %v1377_v43 = vadd.f32 %v1371_v42, %v172_v3 }
0x1327   :  { %v1373_v19 = vpop.f32.mrf.mxu1 }
0x1328   :  { %2229 = vtanh.f32 %v1377_v43  ;;  %v2077_v44 = vmul.f32 -1.442695, %v1377_v43  ;;  %v1431_v23 = vadd.f32 %v1373_v19, %v156_v20  ;;  %v178_v20 = vadd.f32 %v2514_v36, %v2518_v38 }
0x132a   :  { %2231 = vpow2.f32 %v2077_v44  ;;  %v2078_v55 = vmul.f32 -1.442695, %v1431_v23 }
0x1335   :  { %v2230_v12 = vpop.eup %2229 }
0x1336   :  { %1392 = vrot.lane.b32.xlu0 %v2230_v12, %s2279_s3 }
0x1337   :  { %v2232_v41 = vpop.eup %2231 }
0x1338   :  { %v1381_v45 = vadd.f32 1.0, %v2232_v41 }
0x133a   :  { %2233 = vrcp.f32 %v1381_v45 }
0x133b   :  { %2235 = vtanh.f32 %v1431_v23 }
0x133c   :  { %2237 = vpow2.f32 %v2078_v55 }
0x1347   :  { %v2234_v24 = vpop.eup %2233 }
0x1348   :  { %v2236_v51 = vpop.eup %2235  ;;  %v1390_v26 = vmul.f32 %v2234_v24, %v2911_v47 }
0x1349   :  { %v2238_v57 = vpop.eup %2237 }
0x134a   :  { %v1435_v30 = vadd.f32 1.0, %v2238_v57 }
0x134c   :  { %2239 = vrcp.f32 %v1435_v30  ;;  %v150_v30 = vadd.f32 %v2665_v35, %v2533_v54 }
0x1359   :  { %v2240_v61 = vpop.eup %2239 }
0x13a8   :  { %v1393_v25 = vpop.permute.xlu0 %1392 }
0x13a9   :  { %v1395_v32 = vmul.f32 %v2234_v24, %v1393_v25 }
0x13ab   :  { %1397 = vrot.lane.b32.xlu0 %v1395_v32, %s2279_s3 }
0x13af   :  { %1446 = vrot.lane.b32.xlu0 %v2236_v51, %s2279_s3 }
0x13b3   :  { %1415 = vrot.lane.b32.xlu0 %v1285_v13, %s2280_s1 }
0x141d   :  { %v1398_v59 = vpop.permute.xlu0 %1397 }
0x141e   :  { %v1400_v60 = vadd.f32 %v1398_v59, %v1390_v26 }
0x1420   :  { %2241 = vtanh.f32 %v1400_v60  ;;  %v1407_v40 = vsel %vm842_vm15, %v1400_v60, %v2911_v47 }
0x1421   :  { %v1447_v21 = vpop.permute.xlu0 %1446 }
0x1422   :  { %v1449_v63 = vmul.f32 %v2240_v61, %v1447_v21 }
0x1424   :  { %1451 = vrot.lane.b32.xlu0 %v1449_v63, %s2279_s3 }
0x1425   :  { %v1416_v46 = vpop.permute.xlu0 %1415 }
0x142d   :  { %v2242_v8 = vpop.eup %2241 }
0x142e   :  { %1403 = vrot.lane.b32.xlu1 %v2242_v8, %s2279_s3 }
0x1432   :  { %1441 = vrot.lane.b32.xlu1 %v1439_v48, %s2279_s3 }
0x1496   :  { %v1452_v4 = vpop.permute.xlu0 %1451 }
0x14a0   :  { %v1404_v11 = vpop.permute.xlu1 %1403 }
0x14a1   :  { %v2931_v62 = vmul.f32 %v2234_v24, %v1404_v11 }
0x14a3   :  { %v1418_v29 = vsel %vm842_vm15, %v2931_v62, %v1416_v46 }
0x14a4   :  { %1420 = vrot.lane.b32.xlu1 %v1418_v29, %s2280_s1  ;;  %v1442_v27 = vpop.permute.xlu1 %1441 }
0x14a5   :  { %v1444_v1 = vmul.f32 %v2240_v61, %v1442_v27 }
0x14a7   :  { %v1454_v37 = vadd.f32 %v1452_v4, %v1444_v1 }
0x14a9   :  { %2243 = vtanh.f32 %v1454_v37  ;;  %v1461_v47 = vsel %vm778_vm14, %v1454_v37, %v1442_v27 }
0x14b6   :  { %v2244_v5 = vpop.eup %2243 }
0x14b7   :  { %1457 = vrot.lane.b32.xlu0 %v2244_v5, %s2279_s3 }
0x1516   :  { %v1421_v6 = vpop.permute.xlu1 %1420 }
0x1517   :  { %1423 = vst.msk [vmem:[#allocation4] sm:$0xff] %vm206_vm2, %v1421_v6 }
0x151e   :  { %v1467_v31 = vld [vmem:[#allocation4] sm:$0xff] }
0x151f   :  { %1469 = vrot.lane.b32.xlu1 %v1467_v31, %s2279_s3 }
0x1523   :  { %1409 = vrot.lane.b32.xlu1 %v1407_v40, %s2281_s30 }
0x1529   :  { %v1458_v13 = vpop.permute.xlu0 %1457 }
0x152a   :  { %v2944_v18 = vmul.f32 %v2240_v61, %v1458_v13 }
0x1591   :  { %v1470_v3 = vpop.permute.xlu1 %1469 }
0x1592   :  { %v1472_v42 = vsel %vm778_vm14, %v2944_v18, %v1470_v3 }
0x1593   :  { %1474 = vrot.lane.b32.xlu0 %v1472_v42, %s2281_s30 }
0x1595   :  { %v1410_v43 = vpop.permute.xlu1 %1409 }
0x1596   :  { %1412 = vst.msk [vmem:[#allocation5] sm:$0xff] %vm206_vm2, %v1410_v43 }
0x159d   :  { %v1584_v12 = vld [vmem:[#allocation5] sm:$0xff] }
0x159e   :  { %1586 = vrot.lane.b32.xlu1 %v1584_v12, %s2279_s3 }
0x15a2   :  { %1463 = vrot.lane.b32.xlu1 %v1461_v47, %s2281_s30 }
0x1605   :  { %v1475_v44 = vpop.permute.xlu0 %1474 }
0x1606   :  { %1477 = vst.msk [vmem:[#allocation4] sm:$0xff] %vm420_vm8, %v1475_v44 }
0x160d   :  { %v1484_v41 = vld [vmem:[#allocation4] sm:$0xff] }
0x160e   :  { %2079 = vmatmul.mubr.msk.f32.vlgmr.msra.gmra.mxu0 %vm204_vm0, %v1484_v41 }
0x160f   :  { %2111 = vmatpush3.msra.mxu0 %v1897_v10 }
0x1610   :  { %v1587_v45 = vpop.permute.xlu1 %1586 }
0x1614   :  { %v1464_v19 = vpop.permute.xlu1 %1463 }
0x1615   :  { %1466 = vst.msk [vmem:[#allocation6] sm:$0xff] %vm206_vm2, %v1464_v19 }
0x161c   :  { %v1638_v4 = vld [vmem:[#allocation6] sm:$0xff] }
0x16ce   :  { %v1570_v23 = vpop.f32.mrf.mxu0 }
0x16cf   :  { %v1576_v24 = vadd.f32 %v1570_v23, %v178_v20 }
0x16d0   :  { %v1572_v57 = vpop.f32.mrf.mxu0 }
0x16d1   :  { %2245 = vtanh.f32 %v1576_v24  ;;  %v2080_v32 = vmul.f32 -1.442695, %v1576_v24  ;;  %v1630_v26 = vadd.f32 %v1572_v57, %v150_v30 }
0x16d3   :  { %2247 = vpow2.f32 %v2080_v32  ;;  %v2081_v21 = vmul.f32 -1.442695, %v1630_v26 }
0x16de   :  { %v2246_v25 = vpop.eup %2245 }
0x16df   :  { %1591 = vrot.lane.b32.xlu0 %v2246_v25, %s2279_s3 }
0x16e0   :  { %v2248_v51 = vpop.eup %2247 }
0x16e1   :  { %v1580_v55 = vadd.f32 1.0, %v2248_v51 }
0x16e3   :  { %2249 = vrcp.f32 %v1580_v55 }
0x16e4   :  { %2251 = vtanh.f32 %v1630_v26  ;;  %v144_v26 = vadd.f32 %v2602_v7, %v2533_v54 }
0x16e5   :  { %2253 = vpow2.f32 %v2081_v21 }
0x16f0   :  { %v2250_v59 = vpop.eup %2249 }
0x16f1   :  { %v2252_v61 = vpop.eup %2251  ;;  %v1589_v48 = vmul.f32 %v2250_v59, %v1587_v45 }
0x16f2   :  { %v2254_v63 = vpop.eup %2253 }
0x16f3   :  { %v1634_v8 = vadd.f32 1.0, %v2254_v63 }
0x16f5   :  { %2255 = vrcp.f32 %v1634_v8 }
0x1702   :  { %v2256_v46 = vpop.eup %2255 }
0x1751   :  { %v1592_v60 = vpop.permute.xlu0 %1591 }
0x1752   :  { %v1594_v36 = vmul.f32 %v2250_v59, %v1592_v60 }
0x1754   :  { %1596 = vrot.lane.b32.xlu0 %v1594_v36, %s2279_s3  ;;  %v184_v36 = vadd.f32 %v2520_v39, %v2518_v38 }
0x1758   :  { %1645 = vrot.lane.b32.xlu0 %v2252_v61, %s2279_s3 }
0x175c   :  { %1614 = vrot.lane.b32.xlu0 %v1484_v41, %s2280_s1 }
0x17c6   :  { %v1597_v35 = vpop.permute.xlu0 %1596 }
0x17c7   :  { %v1599_v11 = vadd.f32 %v1597_v35, %v1589_v48 }
0x17c9   :  { %2257 = vtanh.f32 %v1599_v11  ;;  %v1606_v41 = vsel %vm623_vm11, %v1599_v11, %v1587_v45 }
0x17ca   :  { %v1646_v29 = vpop.permute.xlu0 %1645 }
0x17cb   :  { %v1648_v27 = vmul.f32 %v2256_v46, %v1646_v29 }
0x17cd   :  { %1650 = vrot.lane.b32.xlu0 %v1648_v27, %s2279_s3 }
0x17ce   :  { %v1615_v6 = vpop.permute.xlu0 %1614 }
0x17d6   :  { %v2258_v1 = vpop.eup %2257 }
0x17d7   :  { %1602 = vrot.lane.b32.xlu1 %v2258_v1, %s2279_s3 }
0x17db   :  { %1640 = vrot.lane.b32.xlu1 %v1638_v4, %s2279_s3 }
0x183f   :  { %v1651_v3 = vpop.permute.xlu0 %1650 }
0x1849   :  { %v1603_v37 = vpop.permute.xlu1 %1602 }
0x184a   :  { %v2969_v5 = vmul.f32 %v2250_v59, %v1603_v37 }
0x184c   :  { %v1617_v31 = vsel %vm623_vm11, %v2969_v5, %v1615_v6 }
0x184d   :  { %1619 = vrot.lane.b32.xlu1 %v1617_v31, %s2280_s1  ;;  %v1641_v40 = vpop.permute.xlu1 %1640 }
0x184e   :  { %v1643_v13 = vmul.f32 %v2256_v46, %v1641_v40 }
0x1850   :  { %v1653_v42 = vadd.f32 %v1651_v3, %v1643_v13 }
0x1852   :  { %2259 = vtanh.f32 %v1653_v42  ;;  %v1660_v44 = vsel %vm559_vm10, %v1653_v42, %v1641_v40 }
0x185f   :  { %v2260_v43 = vpop.eup %2259 }
0x1860   :  { %1656 = vrot.lane.b32.xlu0 %v2260_v43, %s2279_s3 }
0x18bf   :  { %v1620_v12 = vpop.permute.xlu1 %1619 }
0x18c0   :  { %1622 = vst.msk [vmem:[#allocation4] sm:$0xff] %vm206_vm2, %v1620_v12 }
0x18c7   :  { %v1666_v47 = vld [vmem:[#allocation4] sm:$0xff] }
0x18c8   :  { %1668 = vrot.lane.b32.xlu1 %v1666_v47, %s2279_s3  ;;  %v358_v47 = vsel %vm340_vm5, %v2546_v34, 0.0  ;;  %v1478_v34 = vsel %vm778_vm14, %v2944_v18, 0.0  ;;  %v1424_v18 = vsel %vm842_vm15, %v2931_v62, 0.0 }
0x18cc   :  { %1662 = vrot.lane.b32.xlu1 %v1660_v44, %s2281_s30  ;;  %v796_v44 = vsel %vm778_vm14, %v2687_v16, 0.0  ;;  %v1079_v16 = vsel %vm1061_vm7, %v2819_v17, 0.0  ;;  %v1895_v17 = vld [vmem:[%s3200_s5 + $0x28] sm:$0xff] }
0x18d0   :  { %1608 = vrot.lane.b32.xlu1 %v1606_v41, %s2281_s30  ;;  %v577_v41 = vsel %vm559_vm10, %v2618_v53, 0.0  ;;  %v1015_v53 = vsel %vm997_vm4, %v2742_v33, 0.0  ;;  %v1896_v33 = vld [vmem:[%s3200_s5 + $0x30] sm:$0xff] }
0x18d1   :  { %2112 = vmatprep.subr.mxu0 %v1896_v33 }
0x18d2   :  { %v1657_v19 = vpop.permute.xlu0 %1656  ;;  %2113 = vmatpush3.msra.mxu0 %v1896_v33 }
0x18d3   :  { %v2984_v20 = vmul.f32 %v2256_v46, %v1657_v19  ;;  %2114 = vmatprep.subr.mxu0 %v1895_v17 }
0x18d4   :  { %2115 = vmatpush3.msra.mxu0 %v1895_v17 }
0x18d5   :  { %v1677_v19 = vsel %vm559_vm10, %v2984_v20, 0.0  ;;  %2116 = vmatprep.subr.mxu0 %v1894_v2 }
0x18d6   :  { %2117 = vmatpush3.msra.mxu0 %v1894_v2 }
0x193a   :  { %v1669_v23 = vpop.permute.xlu1 %1668 }
0x193b   :  { %v1671_v24 = vsel %vm559_vm10, %v2984_v20, %v1669_v23  ;;  %v1893_v20 = vld [vmem:[%s3200_s5 + $0x18] sm:$0xff]  ;;  %v1892_v23 = vld [vmem:[%s3200_s5 + $0x10] sm:$0xff] }
0x193c   :  { %1673 = vrot.lane.b32.xlu0 %v1671_v24, %s2281_s30  ;;  %2118 = vmatprep.subr.mxu0 %v1893_v20 }
0x193d   :  { %2119 = vmatpush3.msra.mxu0 %v1893_v20 }
0x193e   :  { %v1663_v25 = vpop.permute.xlu1 %1662  ;;  %2120 = vmatprep.subr.mxu0 %v1892_v23 }
0x193f   :  { %1665 = vst.msk [vmem:[#allocation6] sm:$0xff] %vm206_vm2, %v1663_v25  ;;  %2121 = vmatpush3.msra.mxu0 %v1892_v23 }
0x1940   :  { %2122 = vmatprep.subr.mxu0 %v1891_v56 }
0x1941   :  { %2123 = vmatpush3.msra.mxu0 %v1891_v56 }
0x1942   :  { %v1609_v32 = vpop.permute.xlu1 %1608  ;;  %2124 = vmatprep.subr.mxu0 %v1890_v52 }
0x1943   :  { %1611 = vst.msk [vmem:[#allocation5] sm:$0xff] %vm206_vm2, %v1609_v32  ;;  %2125 = vmatpush3.msra.mxu0 %v1890_v52 }
0x1946   :  { %v1837_v51 = vld [vmem:[#allocation6] sm:$0xff] }
0x1947   :  { %1839 = vrot.lane.b32.xlu1 %v1837_v51, %s2279_s3 }
0x194a   :  { %v1783_v45 = vld [vmem:[#allocation5] sm:$0xff] }
0x194b   :  { %1785 = vrot.lane.b32.xlu1 %v1783_v45, %s2279_s3 }
0x19ae   :  { %v1674_v55 = vpop.permute.xlu0 %1673 }
0x19af   :  { %1676 = vst.msk [vmem:[#allocation4] sm:$0xff] %vm420_vm8, %v1674_v55  ;;  %v1225_v55 = vsel %vm1061_vm7, %v2855_v22, 0.0  ;;  %v1623_v22 = vsel %vm623_vm11, %v2969_v5, 0.0 }
0x19b6   :  { %v2995_v57 = vld [vmem:[#allocation4] sm:$0xff] }
0x19b7   :  { %2082 = vmatmul.mubr.msk.f32.vlgmr.msra.gmra.mxu1 %vm204_vm0, %v2995_v57 }
0x19b9   :  { %v3013_v4 = vpop.permute.xlu1 %1839 }
0x19bd   :  { %v3019_v40 = vpop.permute.xlu1 %1785 }
0x1a77   :  { %v1769_v30 = vpop.f32.mrf.mxu1 }
0x1a78   :  { %v1775_v61 = vadd.f32 %v1769_v30, %v184_v36 }
0x1a79   :  { %v1771_v59 = vpop.f32.mrf.mxu1 }
0x1a7a   :  { %v1829_v60 = vadd.f32 %v1771_v59, %v144_v26  ;;  %v2083_v48 = vmul.f32 -1.442695, %v1775_v61 }
0x1a7c   :  { %2261 = vtanh.f32 %v1829_v60  ;;  %v2084_v8 = vmul.f32 -1.442695, %v1829_v60  ;;  %v641_v60 = vsel %vm623_vm11, %v2644_v0, 0.0 }
0x1a7d   :  { %2263 = vtanh.f32 %v1775_v61 }
0x1a7e   :  { %2265 = vpow2.f32 %v2084_v8 }
0x1a7f   :  { %2267 = vpow2.f32 %v2083_v48 }
0x1a89   :  { %v2262_v21 = vpop.eup %2261 }
0x1a8a   :  { %1844 = vrot.lane.b32.xlu0 %v2262_v21, %s2279_s3  ;;  %v2264_v63 = vpop.eup %2263 }
0x1a8b   :  { %v2266_v35 = vpop.eup %2265 }
0x1a8c   :  { %v1833_v54 = vadd.f32 1.0, %v2266_v35  ;;  %v2268_v7 = vpop.eup %2267 }
0x1a8d   :  { %v1779_v11 = vadd.f32 1.0, %v2268_v7 }
0x1a8e   :  { %1790 = vrot.lane.b32.xlu0 %v2264_v63, %s2279_s3  ;;  %2269 = vrcp.f32 %v1833_v54 }
0x1a8f   :  { %2271 = vrcp.f32 %v1779_v11 }
0x1a9b   :  { %v3005_v38 = vpop.eup %2269 }
0x1a9c   :  { %v3009_v29 = vpop.eup %2271  ;;  %v1842_v37 = vmul.f32 %v3005_v38, %v3013_v4 }
0x1a9d   :  { %v1788_v13 = vmul.f32 %v3009_v29, %v3019_v40 }
0x1afc   :  { %v1845_v39 = vpop.permute.xlu0 %1844 }
0x1afd   :  { %v1847_v46 = vmul.f32 %v3005_v38, %v1845_v39 }
0x1aff   :  { %1849 = vrot.lane.b32.xlu0 %v1847_v46, %s2279_s3 }
0x1b00   :  { %v1791_v27 = vpop.permute.xlu0 %1790 }
0x1b01   :  { %v1793_v1 = vmul.f32 %v3009_v29, %v1791_v27 }
0x1b03   :  { %1795 = vrot.lane.b32.xlu0 %v1793_v1, %s2279_s3 }
0x1b71   :  { %v1850_v6 = vpop.permute.xlu0 %1849 }
0x1b72   :  { %v3017_v31 = vadd.f32 %v1850_v6, %v1842_v37 }
0x1b74   :  { %2273 = vtanh.f32 %v3017_v31 }
0x1b75   :  { %v1796_v3 = vpop.permute.xlu0 %1795 }
0x1b76   :  { %v3024_v42 = vadd.f32 %v1796_v3, %v1788_v13 }
0x1b78   :  { %2275 = vtanh.f32 %v3024_v42  ;;  %v1805_v13 = vsel %vm403_vm6, %v3024_v42, %v3019_v40 }
0x1b81   :  { %v2274_v43 = vpop.eup %2273 }
0x1b82   :  { %1855 = vrot.lane.b32.xlu1 %v2274_v43, %s2279_s3 }
0x1b85   :  { %v2276_v12 = vpop.eup %2275 }
0x1b86   :  { %360 = vrot.lane.b32.xlu1 %v358_v47, %s2280_s1  ;;  %1801 = vrot.lane.b32.xlu0 %v2276_v12, %s2279_s3  ;;  %v1859_v47 = vsel %vm340_vm5, %v3017_v31, %v3013_v4 }
0x1b8a   :  { %798 = vrot.lane.b32.xlu1 %v796_v44, %s2280_s1  ;;  %579 = vrot.lane.b32.xlu0 %v577_v41, %s2280_s1 }
0x1b8e   :  { %1480 = vrot.lane.b32.xlu1 %v1478_v34, %s2281_s30  ;;  %1679 = vrot.lane.b32.xlu0 %v1677_v19, %s2281_s30 }
0x1b92   :  { %1081 = vrot.lane.b32.xlu1 %v1079_v16, %s2281_s30  ;;  %1017 = vrot.lane.b32.xlu0 %v1015_v53, %s2280_s1 }
0x1b96   :  { %1281 = vrot.lane.b32.xlu0 %v1279_v49, %s2281_s30 }
0x1b9a   :  { %862 = vrot.lane.b32.xlu0 %v860_v9, %s2281_s30 }
0x1b9e   :  { %1426 = vrot.lane.b32.xlu0 %v1424_v18, %s2280_s1 }
0x1ba2   :  { %424 = vrot.lane.b32.xlu0 %v422_v58, %s2281_s30 }
0x1bf4   :  { %v1856_v62 = vpop.permute.xlu1 %1855 }
0x1bf5   :  { %v3098_v24 = vmul.f32 %v3005_v38, %v1856_v62 }
0x1bf7   :  { %v1876_v25 = vsel %vm340_vm5, %v3098_v24, 0.0 }
0x1bf8   :  { %v1802_v32 = vpop.permute.xlu0 %1801  ;;  %1878 = vrot.lane.b32.xlu1 %v1876_v25, %s2281_s30  ;;  %v361_v51 = vpop.permute.xlu1 %360 }
0x1bf9   :  { %v1804_v45 = vmul.f32 %v3009_v29, %v1802_v32  ;;  %363 = vst.msk [vmem:[#allocation3] sm:$0xff] %vm206_vm2, %v361_v51 }
0x1bfb   :  { %v1822_v30 = vsel %vm403_vm6, %v1804_v45, 0.0 }
0x1bfc   :  { %1824 = vrot.lane.b32.xlu0 %v1822_v30, %s2280_s1  ;;  %v580_v26 = vpop.permute.xlu0 %579  ;;  %1227 = vrot.lane.b32.xlu1 %v1225_v55, %s2280_s1  ;;  %v799_v59 = vpop.permute.xlu1 %798 }
0x1bfd   :  { %583 = vst.msk [vmem:[#allocation3 + $0x8] sm:$0xff] %vm206_vm2, %v580_v26  ;;  %802 = vst.msk [vmem:[#allocation3 + $0x10] sm:$0xff] %vm206_vm2, %v799_v59 }
0x1c00   :  { %v1680_v36 = vpop.permute.xlu0 %1679  ;;  %643 = vrot.lane.b32.xlu1 %v641_v60, %s2281_s30  ;;  %v1481_v15 = vpop.permute.xlu1 %1480 }
0x1c01   :  { %1682 = vst.msk [vmem:[#allocation3 + $0x8] sm:$0xff] %vm420_vm8, %v1680_v36  ;;  %1483 = vst.msk [vmem:[#allocation3 + $0x10] sm:$0xff] %vm420_vm8, %v1481_v15 }
0x1c04   :  { %v1018_v61 = vpop.permute.xlu0 %1017  ;;  %1625 = vrot.lane.b32.xlu1 %v1623_v22, %s2280_s1  ;;  %v1082_v21 = vpop.permute.xlu1 %1081 }
0x1c05   :  { %1021 = vst.msk [vmem:[#allocation3 + $0x18] sm:$0xff] %vm206_vm2, %v1018_v61 }
0x1c06   :  { %1085 = vst.msk [vmem:[#allocation3 + $0x20] sm:$0xff] %vm420_vm8, %v1082_v21 }
0x1c08   :  { %v1282_v0 = vpop.permute.xlu0 %1281  ;;  %1813 = vrot.lane.b32.xlu1 %v2995_v57, %s2280_s1  ;;  %v1883_v7 = vld [vmem:[#allocation3 + $0x8] sm:$0xff]  ;;  %v1884_v11 = vld [vmem:[#allocation3 + $0x10] sm:$0xff] }
0x1c09   :  { %1284 = vst.msk [vmem:[#allocation3 + $0x18] sm:$0xff] %vm420_vm8, %v1282_v0 }
0x1c0c   :  { %v863_v63 = vpop.permute.xlu0 %862 }
0x1c0d   :  { %866 = vst.msk [vmem:[#allocation3 + $0x28] sm:$0xff] %vm420_vm8, %v863_v63 }
0x1c10   :  { %v1427_v8 = vpop.permute.xlu0 %1426  ;;  %v1885_v39 = vld [vmem:[#allocation3 + $0x18] sm:$0xff] }
0x1c11   :  { %1429 = vst.msk [vmem:[#allocation3 + $0x28] sm:$0xff] %vm206_vm2, %v1427_v8 }
0x1c14   :  { %v425_v14 = vpop.permute.xlu0 %424 }
0x1c15   :  { %428 = vst.msk [vmem:[#allocation3 + $0x38] sm:$0xff] %vm420_vm8, %v425_v14 }
0x1c18   :  { %v1887_v1 = vld [vmem:[#allocation3 + $0x28] sm:$0xff] }
0x1c6a   :  { %v1879_v5 = vpop.permute.xlu1 %1878 }
0x1c6b   :  { %1881 = vst.msk [vmem:[#allocation3] sm:$0xff] %vm420_vm8, %v1879_v5 }
0x1c6e   :  { %v1825_v48 = vpop.permute.xlu0 %1824  ;;  %v1228_v35 = vpop.permute.xlu1 %1227 }
0x1c6f   :  { %1827 = vst.msk [vmem:[#allocation3 + $0x38] sm:$0xff] %vm206_vm2, %v1825_v48  ;;  %1230 = vst.msk [vmem:[#allocation3 + $0x20] sm:$0xff] %vm206_vm2, %v1228_v35 }
0x1c72   :  { %v644_v57 = vpop.permute.xlu1 %643  ;;  %v1882_v54 = vld [vmem:[#allocation3] sm:$0xff] }
0x1c73   :  { %647 = vst.msk [vmem:[#allocation3 + $0x30] sm:$0xff] %vm420_vm8, %v644_v57  ;;  %2126 = vmatprep.mubr.msk.f32.mxu0 %vm204_vm0, %v1882_v54 }
0x1c74   :  { %2127 = vmatmul.mubr.msk.f32.vlgmr.msra.gmra.mxu0 %vm204_vm0, %v1883_v7 }
0x1c75   :  { %2129 = vmatprep.mubr.msk.f32.mxu0 %vm204_vm0, %v1884_v11 }
0x1c76   :  { %v1626_v38 = vpop.permute.xlu1 %1625  ;;  %v1886_v46 = vld [vmem:[#allocation3 + $0x20] sm:$0xff]  ;;  %v1889_v6 = vld [vmem:[#allocation3 + $0x38] sm:$0xff] }
0x1c77   :  { %1628 = vst.msk [vmem:[#allocation3 + $0x30] sm:$0xff] %vm206_vm2, %v1626_v38 }
0x1c78   :  { %2130 = vmatmul.mubr.msk.f32.gmra.mxu0 %vm204_vm0, %v1885_v39 }
0x1c79   :  { %2132 = vmatprep.mubr.msk.f32.mxu0 %vm204_vm0, %v1886_v46 }
0x1c7a   :  { %v1814_v29 = vpop.permute.xlu1 %1813 }
0x1c7b   :  { %v1816_v27 = vsel %vm403_vm6, %v1804_v45, %v1814_v29 }
0x1c7c   :  { %2133 = vmatmul.mubr.msk.f32.gmra.mxu0 %vm204_vm0, %v1887_v1  ;;  %1818 = vrot.lane.b32.xlu0 %v1816_v27, %s2280_s1 }
0x1c7e   :  { %v1888_v37 = vld [vmem:[#allocation3 + $0x30] sm:$0xff] }
0x1c7f   :  { %2135 = vmatprep.mubr.msk.f32.mxu0 %vm204_vm0, %v1888_v37 }
0x1c80   :  { %2136 = vmatmul.mubr.msk.f32.gmra.mxu0 %vm204_vm0, %v1889_v6  ;;  %1807 = vrot.lane.b32.xlu0 %v1805_v13, %s2281_s30 }
0x1cee   :  { %v1819_v3 = vpop.permute.xlu0 %1818 }
0x1cef   :  { %1821 = vst.msk [vmem:[#allocation4] sm:$0xff] %vm206_vm2, %v1819_v3 }
0x1cf2   :  { %v1808_v43 = vpop.permute.xlu0 %1807 }
0x1cf3   :  { %1810 = vst.msk [vmem:[#allocation5] sm:$0xff] %vm206_vm2, %v1808_v43 }
0x1cf6   :  { %v1865_v12 = vld [vmem:[#allocation4] sm:$0xff] }
0x1cf7   :  { %1867 = vrot.lane.b32.xlu1 %v1865_v12, %s2279_s3 }
0x1cfb   :  { %1861 = vrot.lane.b32.xlu1 %v1859_v47, %s2281_s30 }
0x1d34   :  { %v2128_v40 = vpop.f32.mrf.mxu0 }
0x1d35   :  { %v2001_v42 = vadd.f32 %v2128_v40, %v2085_v50 }
0x1d36   :  { %v1995_v44 = vpop.f32.mrf.mxu0 }
0x1d37   :  { %2035 = vst [vmem:[%s3202_s7 + $0x8] sm:$0xff] %v2001_v42  ;;  %v1996_v41 = vadd.f32 %v2085_v50, %v1995_v44 }
0x1d38   :  { %v2131_v34 = vpop.f32.mrf.mxu0 }
0x1d39   :  { %2034 = vst [vmem:[%s3202_s7] sm:$0xff] %v1996_v41  ;;  %v2011_v4 = vadd.f32 %v2131_v34, %v2085_v50 }
0x1d3a   :  { %v2005_v31 = vpop.f32.mrf.mxu0 }
0x1d3b   :  { %2037 = vst [vmem:[%s3202_s7 + $0x18] sm:$0xff] %v2011_v4  ;;  %v2006_v19 = vadd.f32 %v2085_v50, %v2005_v31 }
0x1d3c   :  { %v2134_v53 = vpop.f32.mrf.mxu0 }
0x1d3d   :  { %2036 = vst [vmem:[%s3202_s7 + $0x10] sm:$0xff] %v2006_v19  ;;  %v2021_v16 = vadd.f32 %v2134_v53, %v2085_v50 }
0x1d3e   :  { %v2015_v49 = vpop.f32.mrf.mxu0 }
0x1d3f   :  { %2039 = vst [vmem:[%s3202_s7 + $0x28] sm:$0xff] %v2021_v16  ;;  %v2016_v10 = vadd.f32 %v2085_v50, %v2015_v49 }
0x1d40   :  { %v2137_v33 = vpop.f32.mrf.mxu0 }
0x1d41   :  { %2038 = vst [vmem:[%s3202_s7 + $0x20] sm:$0xff] %v2016_v10  ;;  %v2031_v17 = vadd.f32 %v2137_v33, %v2085_v50 }
0x1d42   :  { %v2025_v9 = vpop.f32.mrf.mxu0 }
0x1d43   :  { %2041 = vst [vmem:[%s3202_s7 + $0x38] sm:$0xff] %v2031_v17  ;;  %v2026_v2 = vadd.f32 %v2085_v50, %v2025_v9 }
0x1d45   :  { %2040 = vst [vmem:[%s3202_s7 + $0x30] sm:$0xff] %v2026_v2 }
0x1d69   :  { %v1868_v18 = vpop.permute.xlu1 %1867 }
0x1d6a   :  { %v1870_v58 = vsel %vm340_vm5, %v3098_v24, %v1868_v18 }
0x1d6b   :  { %1872 = vrot.lane.b32.xlu0 %v1870_v58, %s2281_s30 }
0x1d6d   :  { %v1862_v20 = vpop.permute.xlu1 %1861 }
0x1d6e   :  { %1864 = vst.msk [vmem:[#allocation6] sm:$0xff] %vm206_vm2, %v1862_v20 }
0x1ddd   :  { %v1873_v23 = vpop.permute.xlu0 %1872 }
0x1dde   :  { %1875 = vst.msk [vmem:[#allocation4] sm:$0xff] %vm420_vm8, %v1873_v23 }

</bundles_post_ra>
